<compile_context>
chip_gen: v7x
topology: tpu7x:2x2x1
jax: 0.10.0
libtpu: 0.0.40
codegen_flags: <defaults>
</compile_context>

<pallas_src>
import functools

import jax
import jax.numpy as jnp
from jax.experimental import pallas as pl
from jax.experimental.pallas import tpu as pltpu


def _bottleblock_kernel(x_ref, w1_ref, t1a_ref, w2_ref, t1b_ref, w3_ref, t3a_ref,
                        o_ref, col_ref, *, H, W, compute_dtype):
    """One batch element per grid step.

    x_ref:   (1, H*W, Cin_p)  f32 (residual kept exact)
    w2_ref:  (9*Cmid_p, Cmid_p) conv2 taps stacked along K
    o_ref:   (1, H*W, Cout_p) out_dtype
    col_ref: (H*W, 9*Cmid_p)  im2col scratch (compute dtype)
    """
    HW = H * W
    Cmid_p = w2_ref.shape[1]
    xf = x_ref[0]                                                   # (HW, Cin_p) f32

    # --- conv1 (1x1) + folded (bias, bn1) + relu ------------------------------
    y = jnp.dot(xf.astype(compute_dtype), w1_ref[...],
                preferred_element_type=jnp.float32) + t1a_ref[...]
    y = jnp.maximum(y, 0.0)                                         # (HW, Cmid_p) f32
    yc = y.astype(compute_dtype)

    # --- conv2 (3x3, stride 1, pad 1) as im2col-in-VMEM -----------------------
    # Spatial coordinates of each flattened position, for the edge masks.
    idx = jax.lax.broadcasted_iota(jnp.int32, (HW, 1), 0)
    if (W & (W - 1)) == 0:                     # power-of-two W: shifts/AND only
        hh = idx >> (W.bit_length() - 1)
        ww = idx & (W - 1)
    else:
        hh = idx // W
        ww = idx % W

    # Rolls happen on the operand BEFORE the matmul (nothing competes with vmatmul on
    # the product side any more).  They are applied to the f32 activation (sublane
    # rotates of packed bf16 are not reliably lowered); the per-tap cast keeps the big
    # conv2 matmul operand in compute_dtype.
    t = 0
    for ky in (-1, 0, 1):
        for kx in (-1, 0, 1):
            if ky == 0 and kx == 0:
                tap = yc                                            # center tap: as-is
            else:
                d = ky * W + kx
                tap_f32 = pltpu.roll(y, shift=(-d) % HW, axis=0)    # tap[s] = y[s + d]
                conds = []
                if ky < 0:
                    conds.append(hh >= -ky)
                if ky > 0:
                    conds.append(hh < H - ky)
                if kx < 0:
                    conds.append(ww >= -kx)
                if kx > 0:
                    conds.append(ww < W - kx)
                mask = conds[0]
                for c in conds[1:]:
                    mask = mask & c
                tap = jnp.where(mask, tap_f32, 0.0).astype(compute_dtype)
            col_ref[:, t * Cmid_p:(t + 1) * Cmid_p] = tap           # lane-aligned store
            t += 1

    # Single wide matmul: (HW, 9*Cmid_p) x (9*Cmid_p, Cmid_p), f32 accumulation.
    acc = jnp.dot(col_ref[...], w2_ref[...], preferred_element_type=jnp.float32)

    # --- bn1 AGAIN (the reference module reuses bn1 here; folded incl. conv2 bias), relu
    y2 = jnp.maximum(acc + t1b_ref[...], 0.0).astype(compute_dtype)

    # --- conv3 (1x1) + folded (bias, bn3), exact f32 identity residual, relu --
    y3 = jnp.dot(y2, w3_ref[...], preferred_element_type=jnp.float32) + t3a_ref[...]
    o_ref[0] = jnp.maximum(y3 + xf, 0.0).astype(o_ref.dtype)


def _round_up(c, m=128):
    return ((c + m - 1) // m) * m


def _pad_to(a, axis, target):
    pad = target - a.shape[axis]
    if pad == 0:
        return a
    widths = [(0, 0)] * a.ndim
    widths[axis] = (0, pad)
    return jnp.pad(a, widths)


def _vmem_cap_bytes():
    """~90% of physical per-core VMEM (64 MiB on v7x, 128 MiB on v5e/v6e)."""
    cap = 64 * 1024 * 1024
    try:
        info = pltpu.get_tpu_info()
        cap = int(getattr(info, "vmem_capacity_bytes", cap) or cap)
    except Exception:
        pass
    return int(cap * 0.9)


def prepare_bottleblock_params(params, *, compute_dtype=jnp.bfloat16):
    """Fold conv biases + BN affines into weights / per-channel shifts, pad channels to
    multiples of 128 (lane-dense), stack the 9 conv2 taps along K."""
    Cin, Cmid = params["w1"].shape
    Cout = params["w3"].shape[1]
    Cin_p, Cmid_p, Cout_p = _round_up(Cin), _round_up(Cmid), _round_up(Cout)

    s1, t1 = params["s1"], params["t1"]
    s3, t3 = params["s3"], params["t3"]
    w1f = params["w1"] * s1                                  # scale output columns by bn1
    t1a = t1 + params["b1"] * s1                             # conv1 bias through bn1
    w2f = params["w2"] * s1.reshape(1, 1, 1, Cmid)           # bn1 reused after conv2
    t1b = t1 + params["b2"] * s1                             # conv2 bias through bn1
    w3f = params["w3"] * s3
    t3a = t3 + params["b3"] * s3

    w1f = _pad_to(_pad_to(w1f, 0, Cin_p), 1, Cmid_p).astype(compute_dtype)
    w2f = _pad_to(_pad_to(w2f, 2, Cmid_p), 3, Cmid_p)        # (3, 3, Cmid_p, Cmid_p) HWIO
    w2f = w2f.reshape(9 * Cmid_p, Cmid_p).astype(compute_dtype)   # taps stacked along K
    w3f = _pad_to(_pad_to(w3f, 0, Cmid_p), 1, Cout_p).astype(compute_dtype)
    t1a = _pad_to(t1a, 1, Cmid_p)
    t1b = _pad_to(t1b, 1, Cmid_p)
    t3a = _pad_to(t3a, 1, Cout_p)
    return dict(w1=w1f, t1a=t1a, w2=w2f, t1b=t1b, w3=w3f, t3a=t3a,
                dims=(Cin, Cmid, Cout, Cin_p, Cmid_p, Cout_p))


def bottleblock_apply_flat(x_flat, prepped, *, H, W,
                           compute_dtype=jnp.bfloat16, out_dtype=jnp.float32):
    """Compute-layout entry point: x_flat is (N, H*W, Cin_p) float32 (channel-padded);
    returns (N, H*W, Cout_p) in out_dtype.  Chain blocks through this to avoid repeated
    NCHW<->NHWC transposes and channel padding."""
    Cin, Cmid, Cout, Cin_p, Cmid_p, Cout_p = prepped["dims"]
    N, HW, _ = x_flat.shape
    assert HW == H * W and x_flat.shape[2] == Cin_p
    assert Cout == Cin, "identity residual requires in_channels == out_channels * expansion"

    c_isz = jnp.dtype(compute_dtype).itemsize
    o_isz = jnp.dtype(out_dtype).itemsize
    vmem_est = (
        2 * HW * Cin_p * 4                                    # x blocks (f32, double-buffered)
        + 2 * HW * Cout_p * o_isz                             # out blocks
        + HW * 9 * Cmid_p * c_isz                             # im2col scratch
        + 2 * (Cin_p * Cmid_p + 9 * Cmid_p * Cmid_p + Cmid_p * Cout_p) * c_isz  # weights
        + 8 * (2 * Cmid_p + Cout_p) * 4                       # shift rows
        + 6 * HW * Cmid_p * 4 + 2 * HW * Cout_p * 4           # in-kernel temporaries
    )
    vmem_limit = int(min(max(2 * vmem_est, 32 * 1024 * 1024), _vmem_cap_bytes()))

    kernel = functools.partial(_bottleblock_kernel, H=H, W=W, compute_dtype=compute_dtype)

    # NOTE: weight/shift index maps are constant, so their blocks are only fetched once;
    # pipeline_mode=pl.Buffered(1) on those specs would additionally halve their VMEM on
    # v7x (left off here: negligible at demo shapes).
    out_flat = pl.pallas_call(
        kernel,
        out_shape=jax.ShapeDtypeStruct((N, HW, Cout_p), out_dtype),
        grid_spec=pltpu.PrefetchScalarGridSpec(
            num_scalar_prefetch=0,
            grid=(N,),
            in_specs=[
                pl.BlockSpec((1, HW, Cin_p), lambda n: (n, 0, 0)),          # x (f32)
                pl.BlockSpec((Cin_p, Cmid_p), lambda n: (0, 0)),            # w1 (folded)
                pl.BlockSpec((1, Cmid_p), lambda n: (0, 0)),                # conv1+bn1 shift
                pl.BlockSpec((9 * Cmid_p, Cmid_p), lambda n: (0, 0)),       # w2 (K-stacked)
                pl.BlockSpec((1, Cmid_p), lambda n: (0, 0)),                # conv2+bn1 shift
                pl.BlockSpec((Cmid_p, Cout_p), lambda n: (0, 0)),           # w3 (folded)
                pl.BlockSpec((1, Cout_p), lambda n: (0, 0)),                # conv3+bn3 shift
            ],
            out_specs=pl.BlockSpec((1, HW, Cout_p), lambda n: (n, 0, 0)),
            scratch_shapes=[pltpu.VMEM((HW, 9 * Cmid_p), compute_dtype)],   # im2col
        ),
        compiler_params=pltpu.CompilerParams(
            dimension_semantics=("parallel",),
            vmem_limit_bytes=vmem_limit,
        ),
    )(x_flat, prepped["w1"], prepped["t1a"], prepped["w2"], prepped["t1b"],
      prepped["w3"], prepped["t3a"])
    return out_flat


def bottleblock_forward(x_nchw, params, *, compute_dtype=jnp.bfloat16,
                        out_dtype=jnp.float32):
    """x_nchw: (N, Cin, H, W) float32 with Cin == out_channels * 4 (stride=1, no downsample)."""
    N, Cin, H, W = x_nchw.shape
    prepped = prepare_bottleblock_params(params, compute_dtype=compute_dtype)
    _, _, Cout, Cin_p, _, _ = prepped["dims"]
    HW = H * W

    # Layout plumbing (amortized once per network when chaining via bottleblock_apply_flat).
    x_flat = jnp.transpose(x_nchw, (0, 2, 3, 1)).reshape(N, HW, Cin)
    x_flat = _pad_to(x_flat, 2, Cin_p).astype(jnp.float32)   # f32: exact identity residual

    out_flat = bottleblock_apply_flat(x_flat, prepped, H=H, W=W,
                                      compute_dtype=compute_dtype, out_dtype=out_dtype)

    out = out_flat[:, :, :Cout].reshape(N, H, W, Cout)
    return jnp.transpose(out, (0, 3, 1, 2))


def make_params(key, in_channels, out_channels):
    """Deterministic synthetic parameters (Conv2d has bias=True by default)."""
    Cin, Cmid, Cout = in_channels, out_channels, out_channels * 4
    ks = jax.random.split(key, 14)
    eps = 1e-5

    w1 = 0.2 * jax.random.normal(ks[0], (Cin, Cmid), jnp.float32)
    b1 = 0.1 * jax.random.normal(ks[1], (1, Cmid), jnp.float32)
    w2 = 0.2 * jax.random.normal(ks[2], (3, 3, Cmid, Cmid), jnp.float32)   # HWIO
    b2 = 0.1 * jax.random.normal(ks[3], (1, Cmid), jnp.float32)
    w3 = 0.2 * jax.random.normal(ks[4], (Cmid, Cout), jnp.float32)
    b3 = 0.1 * jax.random.normal(ks[5], (1, Cout), jnp.float32)

    # bn1 (eval mode, folded into scale/shift)
    g1 = jax.random.uniform(ks[6], (1, Cmid), jnp.float32, 0.5, 1.5)
    be1 = 0.1 * jax.random.normal(ks[7], (1, Cmid), jnp.float32)
    m1 = 0.1 * jax.random.normal(ks[8], (1, Cmid), jnp.float32)
    v1 = jax.random.uniform(ks[9], (1, Cmid), jnp.float32, 0.5, 1.5)
    s1 = g1 / jnp.sqrt(v1 + eps)
    t1 = be1 - m1 * s1

    # bn3
    g3 = jax.random.uniform(ks[10], (1, Cout), jnp.float32, 0.5, 1.5)
    be3 = 0.1 * jax.random.normal(ks[11], (1, Cout), jnp.float32)
    m3 = 0.1 * jax.random.normal(ks[12], (1, Cout), jnp.float32)
    v3 = jax.random.uniform(ks[13], (1, Cout), jnp.float32, 0.5, 1.5)
    s3 = g3 / jnp.sqrt(v3 + eps)
    t3 = be3 - m3 * s3

    return dict(w1=w1, b1=b1, s1=s1, t1=t1, w2=w2, b2=b2,
                w3=w3, b3=b3, s3=s3, t3=t3)


def ref_forward(x_nchw, p):
    """Pure-JAX reference (same semantics, including the bn1 reuse after conv2)."""
    x = jnp.transpose(x_nchw, (0, 2, 3, 1))            # NHWC
    dn = ("NHWC", "HWIO", "NHWC")
    Cin, Cmid = p["w1"].shape

    y = jax.lax.conv_general_dilated(x, p["w1"].reshape(1, 1, Cin, Cmid),
                                     (1, 1), "VALID", dimension_numbers=dn) + p["b1"]
    y = jnp.maximum(y * p["s1"] + p["t1"], 0.0)

    y = jax.lax.conv_general_dilated(y, p["w2"], (1, 1), ((1, 1), (1, 1)),
                                     dimension_numbers=dn) + p["b2"]
    y = jnp.maximum(y * p["s1"] + p["t1"], 0.0)         # bn1 reused, as in the module

    Cout = p["w3"].shape[1]
    y = jax.lax.conv_general_dilated(y, p["w3"].reshape(1, 1, Cmid, Cout),
                                     (1, 1), "VALID", dimension_numbers=dn) + p["b3"]
    y = y * p["s3"] + p["t3"]

    y = jnp.maximum(y + x, 0.0)
    return jnp.transpose(y, (0, 3, 1, 2))


if __name__ == "__main__":
    N, out_channels, H, W = 2, 4, 16, 16
    in_channels = out_channels * 4                      # needed for the identity residual

    root = jax.random.PRNGKey(0)
    kx, kp = jax.random.split(root)
    x = jax.random.normal(kx, (N, in_channels, H, W), jnp.float32)   # NCHW, like PyTorch
    params = make_params(kp, in_channels, out_channels)

    ref = jax.block_until_ready(ref_forward(x, params))

    # f32 compute path: tight check of the fused algorithm.
    out_f32 = jax.block_until_ready(
        bottleblock_forward(x, params, compute_dtype=jnp.float32))
    assert out_f32.shape == (N, in_channels, H, W)
    assert jnp.allclose(out_f32, ref, atol=2e-3, rtol=2e-3), \
        float(jnp.max(jnp.abs(out_f32 - ref)))

    # Default bf16 path (all generations): bf16 MXU operands, f32 accumulation,
    # exact f32 identity residual.
    out_bf16 = jax.block_until_ready(bottleblock_forward(x, params))
    assert out_bf16.shape == (N, in_channels, H, W)
    assert jnp.allclose(out_bf16, ref, atol=1e-1, rtol=1e-1), \
        float(jnp.max(jnp.abs(out_bf16 - ref)))

    # bf16 output path (for chaining into another bf16 block: halves writeback bytes).
    out_bf16_store = jax.block_until_ready(
        bottleblock_forward(x, params, out_dtype=jnp.bfloat16))
    assert out_bf16_store.dtype == jnp.bfloat16
    assert jnp.allclose(out_bf16_store.astype(jnp.float32), ref, atol=1e-1, rtol=1e-1), \
        float(jnp.max(jnp.abs(out_bf16_store.astype(jnp.float32) - ref)))

    print("KERNEL_OK")
</pallas_src>

<mosaic_0001>
module attributes {stable_mosaic.version = 11 : i64} {
  func.func @_bottleblock_kernel(%arg0: i32, %arg1: memref<1x256x128xf32, #tpu.memory_space<vmem>>, %arg2: memref<128x128xf32, #tpu.memory_space<vmem>>, %arg3: memref<1x128xf32, #tpu.memory_space<vmem>>, %arg4: memref<1152x128xf32, #tpu.memory_space<vmem>>, %arg5: memref<1x128xf32, #tpu.memory_space<vmem>>, %arg6: memref<128x128xf32, #tpu.memory_space<vmem>>, %arg7: memref<1x128xf32, #tpu.memory_space<vmem>>, %arg8: memref<1x256x128xf32, #tpu.memory_space<vmem>>, %arg9: memref<256x1152xf32, #tpu.memory_space<vmem>>) attributes {dimension_semantics = [#tpu.dimension_semantics<parallel>], iteration_bounds = array<i64: 2>, scalar_prefetch = 0 : i64, scratch_operands = 1 : i64, tpu.core_type = #tpu.core_type<tc>, window_params = [{transform_indices = @transform_0, window_bounds = array<i64: 1, 256, 128>}, {pipeline_mode = #tpu.pipeline_mode<synchronous>, transform_indices = @transform_1, window_bounds = array<i64: 128, 128>}, {pipeline_mode = #tpu.pipeline_mode<synchronous>, transform_indices = @transform_2, window_bounds = array<i64: 1, 128>}, {pipeline_mode = #tpu.pipeline_mode<synchronous>, transform_indices = @transform_3, window_bounds = array<i64: 1152, 128>}, {pipeline_mode = #tpu.pipeline_mode<synchronous>, transform_indices = @transform_4, window_bounds = array<i64: 1, 128>}, {pipeline_mode = #tpu.pipeline_mode<synchronous>, transform_indices = @transform_5, window_bounds = array<i64: 128, 128>}, {pipeline_mode = #tpu.pipeline_mode<synchronous>, transform_indices = @transform_6, window_bounds = array<i64: 1, 128>}, {transform_indices = @transform_7, window_bounds = array<i64: 1, 256, 128>}]} {
    %c0 = arith.constant 0 : index
    %c0_0 = arith.constant 0 : index
    %c0_1 = arith.constant 0 : index
    %0 = vector.load %arg1[%c0, %c0_0, %c0_1] : memref<1x256x128xf32, #tpu.memory_space<vmem>>, vector<1x256x128xf32>
    %1 = vector.shape_cast %0 : vector<1x256x128xf32> to vector<256x128xf32>
    %c0_2 = arith.constant 0 : index
    %c0_3 = arith.constant 0 : index
    %2 = vector.load %arg2[%c0_2, %c0_3] : memref<128x128xf32, #tpu.memory_space<vmem>>, vector<128x128xf32>
    %cst = arith.constant dense<0.000000e+00> : vector<256x128xf32>
    %3 = tpu.matmul %1, %2, %cst {dimension_numbers = #tpu.dot_dimension_numbers<[1], [0], [0], [1], [0, 0, 1, 1], [], []>} : vector<256x128xf32>, vector<128x128xf32>, vector<256x128xf32> -> vector<256x128xf32>
    %c0_4 = arith.constant 0 : index
    %c0_5 = arith.constant 0 : index
    %4 = vector.load %arg3[%c0_4, %c0_5] : memref<1x128xf32, #tpu.memory_space<vmem>>, vector<1x128xf32>
    %5 = vector.broadcast %4 : vector<1x128xf32> to vector<256x128xf32>
    %6 = arith.addf %3, %5 : vector<256x128xf32>
    %cst_6 = arith.constant 0.000000e+00 : f32
    %7 = vector.broadcast %cst_6 : f32 to vector<256x128xf32>
    %8 = arith.maximumf %6, %7 : vector<256x128xf32>
    %9 = tpu.iota {dimensions = array<i32: 0>} : vector<256x1xi32>
    %c4_i32 = arith.constant 4 : i32
    %10 = vector.broadcast %c4_i32 : i32 to vector<256x1xi32>
    %11 = arith.shrsi %9, %10 : vector<256x1xi32>
    %c15_i32 = arith.constant 15 : i32
    %12 = vector.broadcast %c15_i32 : i32 to vector<256x1xi32>
    %13 = arith.andi %9, %12 : vector<256x1xi32>
    %c17_i32 = arith.constant 17 : i32
    %14 = tpu.dynamic_rotate %8 by %c17_i32 dim 0 : vector<256x128xf32>, i32 -> vector<256x128xf32>
    %c1_i32 = arith.constant 1 : i32
    %15 = vector.broadcast %c1_i32 : i32 to vector<256x1xi32>
    %16 = arith.cmpi sge, %11, %15 : vector<256x1xi32>
    %c1_i32_7 = arith.constant 1 : i32
    %17 = vector.broadcast %c1_i32_7 : i32 to vector<256x1xi32>
    %18 = arith.cmpi sge, %13, %17 : vector<256x1xi32>
    %19 = arith.andi %16, %18 : vector<256x1xi1>
    %cst_8 = arith.constant 0.000000e+00 : f32
    %20 = vector.shape_cast %19 : vector<256x1xi1> to vector<256x1xi1>
    %21 = vector.broadcast %20 : vector<256x1xi1> to vector<256x128xi1>
    %22 = vector.broadcast %cst_8 : f32 to vector<256x128xf32>
    %23 = arith.select %21, %14, %22 : vector<256x128xi1>, vector<256x128xf32>
    %c0_9 = arith.constant 0 : index
    %c0_10 = arith.constant 0 : index
    %24 = vector.load %arg9[%c0_9, %c0_10] : memref<256x1152xf32, #tpu.memory_space<vmem>>, vector<256x128xf32>
    tpu.vector_store %arg9[%c0_9, %c0_10], %23 {strides = array<i32>} : memref<256x1152xf32, #tpu.memory_space<vmem>>, vector<256x128xf32>,
    %c16_i32 = arith.constant 16 : i32
    %25 = tpu.dynamic_rotate %8 by %c16_i32 dim 0 : vector<256x128xf32>, i32 -> vector<256x128xf32>
    %c1_i32_11 = arith.constant 1 : i32
    %26 = vector.broadcast %c1_i32_11 : i32 to vector<256x1xi32>
    %27 = arith.cmpi sge, %11, %26 : vector<256x1xi32>
    %cst_12 = arith.constant 0.000000e+00 : f32
    %28 = vector.shape_cast %27 : vector<256x1xi1> to vector<256x1xi1>
    %29 = vector.broadcast %28 : vector<256x1xi1> to vector<256x128xi1>
    %30 = vector.broadcast %cst_12 : f32 to vector<256x128xf32>
    %31 = arith.select %29, %25, %30 : vector<256x128xi1>, vector<256x128xf32>
    %c0_13 = arith.constant 0 : index
    %c128 = arith.constant 128 : index
    %32 = vector.load %arg9[%c0_13, %c128] : memref<256x1152xf32, #tpu.memory_space<vmem>>, vector<256x128xf32>
    tpu.vector_store %arg9[%c0_13, %c128], %31 {strides = array<i32>} : memref<256x1152xf32, #tpu.memory_space<vmem>>, vector<256x128xf32>,
    %c15_i32_14 = arith.constant 15 : i32
    %33 = tpu.dynamic_rotate %8 by %c15_i32_14 dim 0 : vector<256x128xf32>, i32 -> vector<256x128xf32>
    %c1_i32_15 = arith.constant 1 : i32
    %34 = vector.broadcast %c1_i32_15 : i32 to vector<256x1xi32>
    %35 = arith.cmpi sge, %11, %34 : vector<256x1xi32>
    %c15_i32_16 = arith.constant 15 : i32
    %36 = vector.broadcast %c15_i32_16 : i32 to vector<256x1xi32>
    %37 = arith.cmpi slt, %13, %36 : vector<256x1xi32>
    %38 = arith.andi %35, %37 : vector<256x1xi1>
    %cst_17 = arith.constant 0.000000e+00 : f32
    %39 = vector.shape_cast %38 : vector<256x1xi1> to vector<256x1xi1>
    %40 = vector.broadcast %39 : vector<256x1xi1> to vector<256x128xi1>
    %41 = vector.broadcast %cst_17 : f32 to vector<256x128xf32>
    %42 = arith.select %40, %33, %41 : vector<256x128xi1>, vector<256x128xf32>
    %c0_18 = arith.constant 0 : index
    %c256 = arith.constant 256 : index
    %43 = vector.load %arg9[%c0_18, %c256] : memref<256x1152xf32, #tpu.memory_space<vmem>>, vector<256x128xf32>
    tpu.vector_store %arg9[%c0_18, %c256], %42 {strides = array<i32>} : memref<256x1152xf32, #tpu.memory_space<vmem>>, vector<256x128xf32>,
    %c1_i32_19 = arith.constant 1 : i32
    %44 = tpu.dynamic_rotate %8 by %c1_i32_19 dim 0 : vector<256x128xf32>, i32 -> vector<256x128xf32>
    %c1_i32_20 = arith.constant 1 : i32
    %45 = vector.broadcast %c1_i32_20 : i32 to vector<256x1xi32>
    %46 = arith.cmpi sge, %13, %45 : vector<256x1xi32>
    %cst_21 = arith.constant 0.000000e+00 : f32
    %47 = vector.shape_cast %46 : vector<256x1xi1> to vector<256x1xi1>
    %48 = vector.broadcast %47 : vector<256x1xi1> to vector<256x128xi1>
    %49 = vector.broadcast %cst_21 : f32 to vector<256x128xf32>
    %50 = arith.select %48, %44, %49 : vector<256x128xi1>, vector<256x128xf32>
    %c0_22 = arith.constant 0 : index
    %c384 = arith.constant 384 : index
    %51 = vector.load %arg9[%c0_22, %c384] : memref<256x1152xf32, #tpu.memory_space<vmem>>, vector<256x128xf32>
    tpu.vector_store %arg9[%c0_22, %c384], %50 {strides = array<i32>} : memref<256x1152xf32, #tpu.memory_space<vmem>>, vector<256x128xf32>,
    %c0_23 = arith.constant 0 : index
    %c512 = arith.constant 512 : index
    %52 = vector.load %arg9[%c0_23, %c512] : memref<256x1152xf32, #tpu.memory_space<vmem>>, vector<256x128xf32>
    tpu.vector_store %arg9[%c0_23, %c512], %8 {strides = array<i32>} : memref<256x1152xf32, #tpu.memory_space<vmem>>, vector<256x128xf32>,
    %c255_i32 = arith.constant 255 : i32
    %53 = tpu.dynamic_rotate %8 by %c255_i32 dim 0 : vector<256x128xf32>, i32 -> vector<256x128xf32>
    %c15_i32_24 = arith.constant 15 : i32
    %54 = vector.broadcast %c15_i32_24 : i32 to vector<256x1xi32>
    %55 = arith.cmpi slt, %13, %54 : vector<256x1xi32>
    %cst_25 = arith.constant 0.000000e+00 : f32
    %56 = vector.shape_cast %55 : vector<256x1xi1> to vector<256x1xi1>
    %57 = vector.broadcast %56 : vector<256x1xi1> to vector<256x128xi1>
    %58 = vector.broadcast %cst_25 : f32 to vector<256x128xf32>
    %59 = arith.select %57, %53, %58 : vector<256x128xi1>, vector<256x128xf32>
    %c0_26 = arith.constant 0 : index
    %c640 = arith.constant 640 : index
    %60 = vector.load %arg9[%c0_26, %c640] : memref<256x1152xf32, #tpu.memory_space<vmem>>, vector<256x128xf32>
    tpu.vector_store %arg9[%c0_26, %c640], %59 {strides = array<i32>} : memref<256x1152xf32, #tpu.memory_space<vmem>>, vector<256x128xf32>,
    %c241_i32 = arith.constant 241 : i32
    %61 = tpu.dynamic_rotate %8 by %c241_i32 dim 0 : vector<256x128xf32>, i32 -> vector<256x128xf32>
    %c15_i32_27 = arith.constant 15 : i32
    %62 = vector.broadcast %c15_i32_27 : i32 to vector<256x1xi32>
    %63 = arith.cmpi slt, %11, %62 : vector<256x1xi32>
    %c1_i32_28 = arith.constant 1 : i32
    %64 = vector.broadcast %c1_i32_28 : i32 to vector<256x1xi32>
    %65 = arith.cmpi sge, %13, %64 : vector<256x1xi32>
    %66 = arith.andi %63, %65 : vector<256x1xi1>
    %cst_29 = arith.constant 0.000000e+00 : f32
    %67 = vector.shape_cast %66 : vector<256x1xi1> to vector<256x1xi1>
    %68 = vector.broadcast %67 : vector<256x1xi1> to vector<256x128xi1>
    %69 = vector.broadcast %cst_29 : f32 to vector<256x128xf32>
    %70 = arith.select %68, %61, %69 : vector<256x128xi1>, vector<256x128xf32>
    %c0_30 = arith.constant 0 : index
    %c768 = arith.constant 768 : index
    %71 = vector.load %arg9[%c0_30, %c768] : memref<256x1152xf32, #tpu.memory_space<vmem>>, vector<256x128xf32>
    tpu.vector_store %arg9[%c0_30, %c768], %70 {strides = array<i32>} : memref<256x1152xf32, #tpu.memory_space<vmem>>, vector<256x128xf32>,
    %c240_i32 = arith.constant 240 : i32
    %72 = tpu.dynamic_rotate %8 by %c240_i32 dim 0 : vector<256x128xf32>, i32 -> vector<256x128xf32>
    %c15_i32_31 = arith.constant 15 : i32
    %73 = vector.broadcast %c15_i32_31 : i32 to vector<256x1xi32>
    %74 = arith.cmpi slt, %11, %73 : vector<256x1xi32>
    %cst_32 = arith.constant 0.000000e+00 : f32
    %75 = vector.shape_cast %74 : vector<256x1xi1> to vector<256x1xi1>
    %76 = vector.broadcast %75 : vector<256x1xi1> to vector<256x128xi1>
    %77 = vector.broadcast %cst_32 : f32 to vector<256x128xf32>
    %78 = arith.select %76, %72, %77 : vector<256x128xi1>, vector<256x128xf32>
    %c0_33 = arith.constant 0 : index
    %c896 = arith.constant 896 : index
    %79 = vector.load %arg9[%c0_33, %c896] : memref<256x1152xf32, #tpu.memory_space<vmem>>, vector<256x128xf32>
    tpu.vector_store %arg9[%c0_33, %c896], %78 {strides = array<i32>} : memref<256x1152xf32, #tpu.memory_space<vmem>>, vector<256x128xf32>,
    %c239_i32 = arith.constant 239 : i32
    %80 = tpu.dynamic_rotate %8 by %c239_i32 dim 0 : vector<256x128xf32>, i32 -> vector<256x128xf32>
    %c15_i32_34 = arith.constant 15 : i32
    %81 = vector.broadcast %c15_i32_34 : i32 to vector<256x1xi32>
    %82 = arith.cmpi slt, %11, %81 : vector<256x1xi32>
    %c15_i32_35 = arith.constant 15 : i32
    %83 = vector.broadcast %c15_i32_35 : i32 to vector<256x1xi32>
    %84 = arith.cmpi slt, %13, %83 : vector<256x1xi32>
    %85 = arith.andi %82, %84 : vector<256x1xi1>
    %cst_36 = arith.constant 0.000000e+00 : f32
    %86 = vector.shape_cast %85 : vector<256x1xi1> to vector<256x1xi1>
    %87 = vector.broadcast %86 : vector<256x1xi1> to vector<256x128xi1>
    %88 = vector.broadcast %cst_36 : f32 to vector<256x128xf32>
    %89 = arith.select %87, %80, %88 : vector<256x128xi1>, vector<256x128xf32>
    %c0_37 = arith.constant 0 : index
    %c1024 = arith.constant 1024 : index
    %90 = vector.load %arg9[%c0_37, %c1024] : memref<256x1152xf32, #tpu.memory_space<vmem>>, vector<256x128xf32>
    tpu.vector_store %arg9[%c0_37, %c1024], %89 {strides = array<i32>} : memref<256x1152xf32, #tpu.memory_space<vmem>>, vector<256x128xf32>,
    %c0_38 = arith.constant 0 : index
    %c0_39 = arith.constant 0 : index
    %91 = vector.load %arg9[%c0_38, %c0_39] : memref<256x1152xf32, #tpu.memory_space<vmem>>, vector<256x1152xf32>
    %c0_40 = arith.constant 0 : index
    %c0_41 = arith.constant 0 : index
    %92 = vector.load %arg4[%c0_40, %c0_41] : memref<1152x128xf32, #tpu.memory_space<vmem>>, vector<1152x128xf32>
    %cst_42 = arith.constant dense<0.000000e+00> : vector<256x128xf32>
    %93 = tpu.matmul %91, %92, %cst_42 {dimension_numbers = #tpu.dot_dimension_numbers<[1], [0], [0], [1], [0, 0, 1, 1], [], []>} : vector<256x1152xf32>, vector<1152x128xf32>, vector<256x128xf32> -> vector<256x128xf32>
    %c0_43 = arith.constant 0 : index
    %c0_44 = arith.constant 0 : index
    %94 = vector.load %arg5[%c0_43, %c0_44] : memref<1x128xf32, #tpu.memory_space<vmem>>, vector<1x128xf32>
    %95 = vector.broadcast %94 : vector<1x128xf32> to vector<256x128xf32>
    %96 = arith.addf %93, %95 : vector<256x128xf32>
    %cst_45 = arith.constant 0.000000e+00 : f32
    %97 = vector.broadcast %cst_45 : f32 to vector<256x128xf32>
    %98 = arith.maximumf %96, %97 : vector<256x128xf32>
    %c0_46 = arith.constant 0 : index
    %c0_47 = arith.constant 0 : index
    %99 = vector.load %arg6[%c0_46, %c0_47] : memref<128x128xf32, #tpu.memory_space<vmem>>, vector<128x128xf32>
    %cst_48 = arith.constant dense<0.000000e+00> : vector<256x128xf32>
    %100 = tpu.matmul %98, %99, %cst_48 {dimension_numbers = #tpu.dot_dimension_numbers<[1], [0], [0], [1], [0, 0, 1, 1], [], []>} : vector<256x128xf32>, vector<128x128xf32>, vector<256x128xf32> -> vector<256x128xf32>
    %c0_49 = arith.constant 0 : index
    %c0_50 = arith.constant 0 : index
    %101 = vector.load %arg7[%c0_49, %c0_50] : memref<1x128xf32, #tpu.memory_space<vmem>>, vector<1x128xf32>
    %102 = vector.broadcast %101 : vector<1x128xf32> to vector<256x128xf32>
    %103 = arith.addf %100, %102 : vector<256x128xf32>
    %104 = arith.addf %103, %1 : vector<256x128xf32>
    %cst_51 = arith.constant 0.000000e+00 : f32
    %105 = vector.broadcast %cst_51 : f32 to vector<256x128xf32>
    %106 = arith.maximumf %104, %105 : vector<256x128xf32>
    %c0_52 = arith.constant 0 : index
    %c0_53 = arith.constant 0 : index
    %c0_54 = arith.constant 0 : index
    %107 = vector.load %arg8[%c0_52, %c0_53, %c0_54] : memref<1x256x128xf32, #tpu.memory_space<vmem>>, vector<1x256x128xf32>
    %108 = vector.shape_cast %107 : vector<1x256x128xf32> to vector<256x128xf32>
    %109 = vector.shape_cast %106 : vector<256x128xf32> to vector<1x256x128xf32>
    tpu.vector_store %arg8[%c0_52, %c0_53, %c0_54], %109 {strides = array<i32>} : memref<1x256x128xf32, #tpu.memory_space<vmem>>, vector<1x256x128xf32>,
    return
  }
  func.func @transform_0(%arg0: i32) -> (i32, i32, i32) {
    %c0_i32 = arith.constant 0 : i32
    %c0_i32_0 = arith.constant 0 : i32
    %c0_i32_1 = arith.constant 0 : i32
    return %arg0, %c0_i32, %c0_i32_0 : i32, i32, i32
  }
  func.func @transform_1(%arg0: i32) -> (i32, i32) {
    %c0_i32 = arith.constant 0 : i32
    %c0_i32_0 = arith.constant 0 : i32
    %c0_i32_1 = arith.constant 0 : i32
    return %c0_i32, %c0_i32_0 : i32, i32
  }
  func.func @transform_2(%arg0: i32) -> (i32, i32) {
    %c0_i32 = arith.constant 0 : i32
    %c0_i32_0 = arith.constant 0 : i32
    %c0_i32_1 = arith.constant 0 : i32
    return %c0_i32, %c0_i32_0 : i32, i32
  }
  func.func @transform_3(%arg0: i32) -> (i32, i32) {
    %c0_i32 = arith.constant 0 : i32
    %c0_i32_0 = arith.constant 0 : i32
    %c0_i32_1 = arith.constant 0 : i32
    return %c0_i32, %c0_i32_0 : i32, i32
  }
  func.func @transform_4(%arg0: i32) -> (i32, i32) {
    %c0_i32 = arith.constant 0 : i32
    %c0_i32_0 = arith.constant 0 : i32
    %c0_i32_1 = arith.constant 0 : i32
    return %c0_i32, %c0_i32_0 : i32, i32
  }
  func.func @transform_5(%arg0: i32) -> (i32, i32) {
    %c0_i32 = arith.constant 0 : i32
    %c0_i32_0 = arith.constant 0 : i32
    %c0_i32_1 = arith.constant 0 : i32
    return %c0_i32, %c0_i32_0 : i32, i32
  }
  func.func @transform_6(%arg0: i32) -> (i32, i32) {
    %c0_i32 = arith.constant 0 : i32
    %c0_i32_0 = arith.constant 0 : i32
    %c0_i32_1 = arith.constant 0 : i32
    return %c0_i32, %c0_i32_0 : i32, i32
  }
  func.func @transform_7(%arg0: i32) -> (i32, i32, i32) {
    %c0_i32 = arith.constant 0 : i32
    %c0_i32_0 = arith.constant 0 : i32
    %c0_i32_1 = arith.constant 0 : i32
    return %arg0, %c0_i32, %c0_i32_0 : i32, i32, i32
  }
}

</mosaic_0001>

<bundles_post_ra>
// kernel: tpu_custom_call.1
= control target key start
LH: loop header
LB: loop body
LE: loop exit
PB: predicated region body
PF: predicated region fallthrough
CT: control target
= control target key end

     0   :  { %12 = vsyncpa [#allocation4], 0  ;;  %s8593_s0 = inlined_call_operand.hbm [shape: f32[2,256,128], index: 0, kind: input, shape index: {}]   ;;  %s8594_s1 = inlined_call_operand.hbm [shape: f32[128,128], index: 1, kind: input, shape index: {}]   ;;  %s8595_s2 = inlined_call_operand.vmem [shape: f32[1,128], index: 2, kind: input, shape index: {}]   ;;  %s8596_s3 = inlined_call_operand.hbm [shape: f32[1152,128], index: 3, kind: input, shape index: {}]   ;;  %s8597_s4 = inlined_call_operand.vmem [shape: f32[1,128], index: 4, kind: input, shape index: {}]   ;;  %s8598_s5 = inlined_call_operand.hbm [shape: f32[128,128], index: 5, kind: input, shape index: {}]   ;;  %s8599_s6 = inlined_call_operand.vmem [shape: f32[1,128], index: 6, kind: input, shape index: {}]   ;;  %s8600_s7 = inlined_call_operand.hbm [shape: f32[2,256,128], index: 7, kind: output, shape index: {}]  }
   0x1   :  { %14 = vsyncpa [#allocation4 + $0x1], 0 }
   0x2   :  { %15 = vsyncpa [#allocation7], 0 }
   0x3   :  { %16 = vsyncpa [#allocation10], 0 }
   0x4   :  { %17 = vsyncpa [#allocation5], 0 }
   0x5   :  { %19 = vsyncpa [#allocation5 + $0x1], 0  ;;  %s5747_s24 = smov 0   ;;  %s5749_s25 = smov 0  }
   0x6   :  { %s5751_s26 = smov 0   ;;  %s5753_s27 = smov 0  }
   0x7 LB: > { %s5768_s28 = sadd.s32 4294967295, %s5695_s27   ;;  %s4248_s29 = sadd.s32 4294967294, %s5695_s27   ;;  %s5695_s27 = sphi %s5753_s27, %s9835_s27   ;;  %s5691_s26 = sphi %s5751_s26, %s9834_s26   ;;  %s5687_s25 = sphi %s5749_s25, %s9833_s25   ;;  %s5683_s24 = sphi %s5747_s24, %s9832_s24  }
   0x8   : > { %p45_p0 = scmp.ne.s32.totalorder %s5687_s25, %s5683_s24  ;;  %p8601_p1 = scmp.eq.s32.totalorder %s5768_s28, 0 }
   0x9   : > { %p201_p3 = scmp.eq.s32.totalorder %s4248_s29, 1  ;;  %p4249_p5 = scmp.ge.s32.totalorder %s5695_s27, 1 }
   0xa   : > { %p5777_p4 = por %p8601_p1, %p45_p0  ;;  %p208_p7 = scmp.lt.s32.totalorder %s5695_s27, 3 }
   0xb   : > { %p5782_p6 = por %p201_p3, %p45_p0  ;;  %s5697_s10 = smov [#allocation6]  }
   0xc   : > { %s9002_s30 = scalar_select %p5777_p4, 1, 0 }
   0xd   : > { %s9003_s8 = scalar_select %p5782_p6, 1, 0 }
   0xe   : > { %p5787_p8 = pnand %p4249_p5, %p208_p7  ;;  %s220_s11 = sshll.u32 %s5697_s10, 4  ;;  %s5791_s11 = int_to_ptr.vmem [resolvable:$true] %s220_s11 }
   0xf   : > { %9004 = sst [smem:[#allocation16_spill]] %s9003_s8  ;;  %s5698_s13 = smov [#allocation8]  }
  0x10   : > { %s9005_s9 = scalar_select %p5787_p8, 1, 0 }
  0x11   : > { %p5409_p9 = pneg %p5787_p8  ;;  %s236_s14 = sshll.u32 %s5698_s13, 4  ;;  %s5802_s14 = int_to_ptr.vmem [resolvable:$true] %s236_s14 }
  0x12   : > { %s5699_s15 = smov [#allocation9]   ;;  %s5507_s19 = scalar_lea.hbm %s8594_s1, 2048 }
  0x13   : > { %p5798_p11 = pnand %p5409_p9, %p8601_p1  ;;  %s5804_s16 = sshll.u32 %s5699_s15, 4  ;;  %s253_s16 = int_to_ptr.vmem [resolvable:$true] %s5804_s16 }
  0x14   : > { %p5508_p12 = scmp.ne.s32.totalorder %s8594_s1, %s5507_s19  ;;  %p5514_p5 = scmp.lt.u32.totalorder %s5507_s19, %s8594_s1 }
  0x15   : > { %p5814_p13 = pneg %p5798_p11 }
  0x17   : > { %p5510_p0 = pnand %p5814_p13, %p5508_p12 }
  0x19   : > { %p5511_p3 = pneg %p5510_p0 }
  0x1b   : > { %p5516_p7 = pnand %p5514_p5, %p5511_p3 }
  0x1d   : > { %5519 = shalt.err (!%p5516_p7)
}
  0x1e   : > { %s5520_s10 = scalar_lea.vmem %s5791_s11, 2048  ;;  %p5528_p2 = scmp.lt.s32.totalorder %s5791_s11, %s5791_s11 }
  0x1f   : > { %p5521_p9 = scmp.ne.s32.totalorder %s5791_s11, %s5520_s10  ;;  %p5529_p6 = scmp.lt.s32.totalorder %s5520_s10, %s5520_s10 }
  0x21   : > { %p5523_p10 = pnand %p5521_p9, %p5814_p13  ;;  %p5530_p12 = por %p5529_p6, %p5528_p2 }
  0x23   : > { %p5524_p1 = pneg %p5523_p10 }
  0x25   : > { %p5531_p0 = pnand %p5530_p12, %p5524_p1 }
  0x27   : > { %5534 = shalt.err (!%p5531_p0)
}
  0x28   : > { %s5700_s13 = smov 128   ;;  %s5701_s15 = smov 8  }
  0x29   : > { %5412 = dma.hbm_to_vmem [thread:$0]  (!%p5798_p11), %s8594_s1, 2048, %s5791_s11, [#allocation7], %s5700_s13, %s5700_s13, %s5701_s15  }
  0x2a   : > { %s5535_s21 = scalar_lea.hbm %s8596_s3, 18432 }
  0x2b   : > { %p5536_p1 = scmp.ne.s32.totalorder %s8596_s3, %s5535_s21  ;;  %p5542_p10 = scmp.lt.u32.totalorder %s5535_s21, %s8596_s3 }
  0x2d   : > { %p5538_p2 = pnand %p5536_p1, %p5814_p13 }
  0x2f   : > { %p5539_p6 = pneg %p5538_p2 }
  0x31   : > { %p5544_p3 = pnand %p5542_p10, %p5539_p6 }
  0x33   : > { %5547 = shalt.err (!%p5544_p3)
}
  0x34   : > { %s5548_s11 = scalar_lea.vmem %s5802_s14, 18432  ;;  %p5556_p12 = scmp.lt.s32.totalorder %s5802_s14, %s5802_s14 }
  0x35   : > { %p5549_p5 = scmp.ne.s32.totalorder %s5802_s14, %s5548_s11  ;;  %p5557_p0 = scmp.lt.s32.totalorder %s5548_s11, %s5548_s11 }
  0x37   : > { %p5551_p7 = pnand %p5549_p5, %p5814_p13  ;;  %p5558_p1 = por %p5557_p0, %p5556_p12 }
  0x39   : > { %p5552_p9 = pneg %p5551_p7 }
  0x3b   : > { %p5559_p2 = pnand %p5558_p1, %p5552_p9 }
  0x3d   : > { %5562 = shalt.err (!%p5559_p2)
}
  0x3e   : > { %5415 = dma.hbm_to_vmem [thread:$0]  (!%p5798_p11), %s8596_s3, 18432, %s5802_s14, [#allocation7], %s5700_s13, %s5700_s13, %s5701_s15  }
  0x3f   : > { %s5563_s20 = scalar_lea.hbm %s8598_s5, 2048 }
  0x40   : > { %p5564_p6 = scmp.ne.s32.totalorder %s8598_s5, %s5563_s20  ;;  %p5570_p5 = scmp.lt.u32.totalorder %s5563_s20, %s8598_s5 }
  0x42   : > { %p5566_p10 = pnand %p5564_p6, %p5814_p13 }
  0x44   : > { %p5567_p3 = pneg %p5566_p10 }
  0x46   : > { %p5572_p7 = pnand %p5570_p5, %p5567_p3 }
  0x48   : > { %5575 = shalt.err (!%p5572_p7)
}
  0x49   : > { %s5576_s11 = scalar_lea.vmem %s253_s16, 2048  ;;  %p5584_p1 = scmp.lt.s32.totalorder %s253_s16, %s253_s16 }
  0x4a   : > { %p5577_p9 = scmp.ne.s32.totalorder %s253_s16, %s5576_s11  ;;  %p5585_p2 = scmp.lt.s32.totalorder %s5576_s11, %s5576_s11 }
  0x4c   : > { %p5579_p12 = pnand %p5577_p9, %p5814_p13  ;;  %p5586_p4 = por %p5585_p2, %p5584_p1 }
  0x4e   : > { %p5580_p0 = pneg %p5579_p12 }
  0x50   : > { %p5587_p8 = pnand %p5586_p4, %p5580_p0 }
  0x52   : > { %5590 = shalt.err (!%p5587_p8)
}
  0x53   : > { %5418 = dma.hbm_to_vmem [thread:$0]  (!%p5798_p11), %s8598_s5, 2048, %s253_s16, [#allocation10], %s5700_s13, %s5700_s13, %s5701_s15  }
  0x54   : > { %s5887_s22 = sadd.s32 1, %s5695_s27   ;;  %s32_s17 = sadd.s32 1, %s5691_s26 }
  0x55   : > { %s29_s12 = ssub.s32 %s5695_s27, %s5887_s22  ;;  %p39_p8 = scmp.ne.s32.totalorder %s5691_s26, %s5687_s25 }
  0x56   : > { %p30_p4 = scmp.eq.s32.totalorder %s29_s12, 0  ;;  %p40_p13 = scmp.eq.s32.totalorder %s5695_s27, 0 }
  0x57   : > { %p5430_p6 = scmp.lt.s32.totalorder %s5695_s27, 2  ;;  %p9008_p3 = scmp.eq.s32.totalorder %s5768_s28, 1 }
  0x58   : > { %s5897_s18 = scalar_select %p30_p4, %s5691_s26, %s32_s17  }
  0x59   : > { %p41_p10 = por %p40_p13, %p39_p8  ;;  %p5901_p5 = por %p9008_p3, %p39_p8 }
  0x5a   : > { %s269_s20 = sand.u32 1, %s5691_s26   ;;  %s4271_s21 = sshll.u32 %s5695_s27, 12 }
  0x5b   : > { %s4254_s16 = sshll.u32 %s269_s20, 8  ;;  %s5910_s10 = scalar_lea.hbm %s8593_s0, %s4271_s21 }
  0x5c   : > { %s273_s11 = scalar_lea.vmem [#allocation3], %s4254_s16  ;;  %p5912_p11 = pnand %p5430_p6, %p41_p10 }
  0x5d   : > { %s280_s14 = sshll.u32 %s273_s11, 4  ;;  %s5918_s12 = scalar_lea.sflag [#allocation4], %s269_s20  ;;  %s5916_s14 = int_to_ptr.vmem [resolvable:$true] %s280_s14 }
  0x5e   : > { %s5591_s17 = scalar_lea.hbm %s5910_s10, 4096  ;;  %p5593_p9 = pneg %p5912_p11 }
  0x5f   : > { %p5592_p7 = scmp.ne.s32.totalorder %s5910_s10, %s5591_s17  ;;  %s5596_s23 = scalar_lea.hbm %s8593_s0, 8192 }
  0x60   : > { %p5597_p1 = scmp.lt.u32.totalorder %s5910_s10, %s8593_s0  ;;  %p5598_p2 = scmp.lt.u32.totalorder %s5596_s23, %s5591_s17 }
  0x61   : > { %p5594_p12 = pnand %p5593_p9, %p5592_p7  ;;  %p5600_p8 = scmp.lt.u32.totalorder %s5591_s17, %s5910_s10 }
  0x62   : > { %p5599_p4 = por %p5598_p2, %p5597_p1 }
  0x63   : > { %p5595_p0 = pneg %p5594_p12 }
  0x64   : > { %p5601_p13 = por %p5600_p8, %p5599_p4 }
  0x66   : > { %p5602_p6 = pnand %p5601_p13, %p5595_p0 }
  0x68   : > { %5605 = shalt.err (!%p5602_p6)
}
  0x69   : > { %s5606_s20 = scalar_lea.vmem %s5916_s14, 4096  ;;  %s5702_s21 = smov [#allocation3]  }
  0x6a   : > { %p5607_p10 = scmp.ne.s32.totalorder %s5916_s14, %s5606_s20  ;;  %s5611_s16 = sshll.u32 %s5702_s21, 4  ;;  %s5612_s16 = int_to_ptr.vmem [resolvable:$false] %s5611_s16 }
  0x6b   : > { %s5613_s29 = scalar_lea.vmem %s5612_s16, 8192  ;;  %p5614_p12 = scmp.lt.s32.totalorder %s5916_s14, %s5612_s16 }
  0x6c   : > { %p5609_p3 = pnand %p5607_p10, %p5593_p9  ;;  %p5615_p1 = scmp.lt.s32.totalorder %s5613_s29, %s5606_s20 }
  0x6e   : > { %p5610_p7 = pneg %p5609_p3  ;;  %p5616_p2 = por %p5615_p1, %p5614_p12 }
  0x70   : > { %p5617_p4 = pnand %p5616_p2, %p5610_p7 }
  0x72   : > { %5620 = shalt.err (!%p5617_p4)
}
  0x73   : > { %5422 = dma.hbm_to_vmem [thread:$0]  (!%p5912_p11), %s5910_s10, 4096, %s5916_s14, %s5918_s12, %s5700_s13, %s5700_s13, %s5701_s15  }
  0x74   : > { %p9011_p9 = scmp.ne.s32.totalorder %s9005_s9, 0 }
  0x76   : > { %292 = sbr.rel (%p9011_p9) target bundleno = 1233 (0x4d1), region = 48 }
  0x7d   : > { %s5952_s17 = sand.u32 1, %s5687_s25   ;;  %p9012_p0 = scmp.ne.s32.totalorder %s9002_s30, 0 }
  0x7e   : > { %s4258_s23 = sshll.u32 %s5952_s17, 8  ;;  %s295_s11 = scalar_lea.sflag [#allocation4], %s5952_s17 }
  0x7f   : > { %s5958_s8 = scalar_lea.vmem [#allocation3], %s4258_s23 }
  0x80   : > { %5666 = dma.done.wait (%p9012_p0), %s295_s11, 4096  }
  0x81   : > { %5668 = vsyncadd (%p9012_p0), %s295_s11, 4294963200  ;;  %p9013_p11 = scmp.eq.s32.totalorder %s5768_s28, 0 }
  0x83   : > { %5670 = dma.done.wait (%p9013_p11), [#allocation7], 20480   ;;  %p9014_p8 = pmov %p9013_p11 }
  0x85   : > { %5672 = vsyncadd (%p9014_p8), [#allocation7], 4294946816  ;;  %p9015_p13 = pmov %p9014_p8 }
  0x86   : > { %p9016_p6 = pmov %p9014_p8 }
  0x87   : > { %5674 = dma.done.wait (%p9015_p13), [#allocation10], 2048  }
  0x88   : > { %5676 = vsyncadd (%p9016_p6), [#allocation10], 4294965248  ;;  %v8613_v0 = vmov 0.0|0.0   ;;  %v373_v1 = vld [vmem:[#allocation6] sm:$0xff]  ;;  %v374_v2 = vld [vmem:[#allocation6 + $0x8] sm:$0xff]  ;;  %s8448_s12 = scalar_lea.vmem [#allocation11], %s4258_s23 }
  0x89   : > { %5169 = vmatprep.subr.bf16.mxu1 %v8613_v0  ;;  %v375_v3 = vld [vmem:[#allocation6 + $0x10] sm:$0xff]  ;;  %v4881_v4 = vpack.c.bf16 %v374_v2, %v373_v1  ;;  %v376_v5 = vld [vmem:[#allocation6 + $0x18] sm:$0xff]  ;;  %v377_v7 = vld [vmem:[#allocation6 + $0x20] sm:$0xff]  ;;  %s4272_s20 = sshll.u32 %s5768_s28, 12  ;;  %s4146_s21 = sshll.u32 %s8448_s12, 4  ;;  %s8547_s21 = int_to_ptr.vmem [resolvable:$true] %s4146_s21 }
  0x8a   : > { %v4885_v6 = vpack.c.bf16 %v376_v5, %v375_v3  ;;  %v378_v8 = vld [vmem:[#allocation6 + $0x28] sm:$0xff]  ;;  %v341_v10 = vld [vmem:[%s5958_s8] sm:$0xff]  ;;  %v379_v11 = vld [vmem:[#allocation6 + $0x30] sm:$0xff]  ;;  %s8545_s23 = scalar_lea.hbm %s8600_s7, %s4272_s20  ;;  %s4133_s28 = scalar_lea.sflag [#allocation5], %s5952_s17 }
  0x8b   : > { %4882 = vmatprep.subr.bf16.mxu0 %v4881_v4  ;;  %v4889_v9 = vpack.c.bf16 %v378_v8, %v377_v7  ;;  %v380_v12 = vld [vmem:[#allocation6 + $0x38] sm:$0xff]  ;;  %4673 = vmatprep.mubr.f32.mxu0 %v341_v10  ;;  %v381_v14 = vld [vmem:[#allocation6 + $0x40] sm:$0xff]  ;;  %v382_v15 = vld [vmem:[#allocation6 + $0x48] sm:$0xff]  ;;  %s5621_s11 = scalar_lea.vmem %s8547_s21, 4096 }
  0x8c   : > { %4884 = vmatpush3.bf16.msra.mxu0 %v4881_v4  ;;  %v4893_v13 = vpack.c.bf16 %v380_v12, %v379_v11  ;;  %v4897_v16 = vpack.c.bf16 %v382_v15, %v381_v14  ;;  %v383_v17 = vld [vmem:[#allocation6 + $0x50] sm:$0xff]  ;;  %v384_v18 = vld [vmem:[#allocation6 + $0x58] sm:$0xff]  ;;  %v2512_v19 = vld [vmem:[#allocation8 + $0x100] sm:$0xff]  ;;  %p5622_p10 = scmp.ne.s32.totalorder %s8547_s21, %s5621_s11 }
  0x8d   : > { %4886 = vmatprep.subr.bf16.mxu0 %v4885_v6  ;;  %v2513_v20 = vld [vmem:[#allocation8 + $0x108] sm:$0xff]  ;;  %v2514_v21 = vld [vmem:[#allocation8 + $0x110] sm:$0xff]  ;;  %v4901_v22 = vpack.c.bf16 %v384_v18, %v383_v17  ;;  %v2515_v24 = vld [vmem:[#allocation8 + $0x118] sm:$0xff] }
  0x8e   : > { %v5974_v23 = vpack.c.bf16 %v2513_v20, %v2512_v19  ;;  %v385_v25 = vld [vmem:[#allocation6 + $0x60] sm:$0xff]  ;;  %v386_v26 = vld [vmem:[#allocation6 + $0x68] sm:$0xff]  ;;  %v5977_v27 = vpack.c.bf16 %v2515_v24, %v2514_v21  ;;  %v387_v31 = vld [vmem:[#allocation6 + $0x70] sm:$0xff]  ;;  %p5623_p3 = pnand %p5622_p10, %p5901_p5 }
  0x8f   : > { %v2516_v28 = vld [vmem:[#allocation8 + $0x120] sm:$0xff]  ;;  %v2517_v29 = vld [vmem:[#allocation8 + $0x128] sm:$0xff]  ;;  %v4905_v30 = vpack.c.bf16 %v386_v26, %v385_v25  ;;  %v388_v32 = vld [vmem:[#allocation6 + $0x78] sm:$0xff] }
  0x90   : > { %4888 = vmatpush3.bf16.msra.mxu0 %v4885_v6  ;;  %5185 = vmatpush1.bf16.msra.mxu1 %v5974_v23  ;;  %v5981_v33 = vpack.c.bf16 %v2517_v29, %v2516_v28  ;;  %v2518_v34 = vld [vmem:[#allocation8 + $0x130] sm:$0xff]  ;;  %v2519_v35 = vld [vmem:[#allocation8 + $0x138] sm:$0xff]  ;;  %v4909_v36 = vpack.c.bf16 %v388_v32, %v387_v31  ;;  %v2520_v38 = vld [vmem:[#allocation8 + $0x140] sm:$0xff]  ;;  %p5624_p7 = pneg %p5623_p3 }
  0x91   : > { %4890 = vmatprep.subr.bf16.mxu0 %v4889_v9  ;;  %5170 = vmatprep.subr.bf16.mxu1 %v8613_v0  ;;  %v5985_v37 = vpack.c.bf16 %v2519_v35, %v2518_v34  ;;  %v2521_v39 = vld [vmem:[#allocation8 + $0x148] sm:$0xff]  ;;  %v2522_v42 = vld [vmem:[#allocation8 + $0x150] sm:$0xff]  ;;  %v2523_v43 = vld [vmem:[#allocation8 + $0x158] sm:$0xff] }
  0x92   : > { %v5989_v40 = vpack.c.bf16 %v2521_v39, %v2520_v38  ;;  %v342_v41 = vld [vmem:[%s5958_s8 + $0x8] sm:$0xff]  ;;  %v343_v44 = vld [vmem:[%s5958_s8 + $0x10] sm:$0xff]  ;;  %v5996_v45 = vpack.c.bf16 %v2523_v43, %v2522_v42  ;;  %v344_v46 = vld [vmem:[%s5958_s8 + $0x18] sm:$0xff] }
  0x93   : > { %v2524_v47 = vld [vmem:[#allocation8 + $0x160] sm:$0xff]  ;;  %v2525_v48 = vld [vmem:[#allocation8 + $0x168] sm:$0xff]  ;;  %v2526_v52 = vld [vmem:[#allocation8 + $0x170] sm:$0xff] }
  0x94   : > { %4892 = vmatpush3.bf16.msra.mxu0 %v4889_v9  ;;  %5186 = vmatpush1.bf16.msra.mxu1 %v5977_v27  ;;  %9017 = vst [vmem:[#allocation17_spill] sm:$0xff] %v5996_v45  ;;  %v345_v49 = vld [vmem:[%s5958_s8 + $0x20] sm:$0xff]  ;;  %v6002_v50 = vpack.c.bf16 %v2525_v48, %v2524_v47  ;;  %v346_v51 = vld [vmem:[%s5958_s8 + $0x28] sm:$0xff]  ;;  %v2527_v53 = vld [vmem:[#allocation8 + $0x178] sm:$0xff] }
  0x95   : > { %4894 = vmatprep.subr.bf16.mxu0 %v4893_v13  ;;  %5171 = vmatprep.subr.bf16.mxu1 %v8613_v0  ;;  %v347_v54 = vld [vmem:[%s5958_s8 + $0x30] sm:$0xff]  ;;  %v6008_v55 = vpack.c.bf16 %v2527_v53, %v2526_v52  ;;  %v348_v56 = vld [vmem:[%s5958_s8 + $0x38] sm:$0xff]  ;;  %v349_v57 = vld [vmem:[%s5958_s8 + $0x40] sm:$0xff] }
  0x96   : > { %9018 = vst [vmem:[#allocation18_spill] sm:$0xff] %v6002_v50  ;;  %v350_v58 = vld [vmem:[%s5958_s8 + $0x48] sm:$0xff]  ;;  %v351_v59 = vld [vmem:[%s5958_s8 + $0x50] sm:$0xff]  ;;  %v352_v60 = vld [vmem:[%s5958_s8 + $0x58] sm:$0xff] }
  0x97   : > { %9019 = vst [vmem:[#allocation19_spill] sm:$0xff] %v6008_v55  ;;  %v353_v61 = vld [vmem:[%s5958_s8 + $0x60] sm:$0xff]  ;;  %v354_v62 = vld [vmem:[%s5958_s8 + $0x68] sm:$0xff]  ;;  %v355_v63 = vld [vmem:[%s5958_s8 + $0x70] sm:$0xff] }
  0x98   : > { %4896 = vmatpush3.bf16.msra.mxu0 %v4893_v13  ;;  %5187 = vmatpush1.bf16.msra.mxu1 %v5981_v33  ;;  %v356_v1 = vld [vmem:[%s5958_s8 + $0x78] sm:$0xff]  ;;  %v357_v2 = vld [vmem:[%s5958_s8 + $0x80] sm:$0xff]  ;;  %v358_v3 = vld [vmem:[%s5958_s8 + $0x88] sm:$0xff] }
  0x99   : > { %4898 = vmatprep.subr.bf16.mxu0 %v4897_v16  ;;  %5172 = vmatprep.subr.bf16.mxu1 %v8613_v0  ;;  %v359_v4 = vld [vmem:[%s5958_s8 + $0x90] sm:$0xff]  ;;  %v360_v5 = vld [vmem:[%s5958_s8 + $0x98] sm:$0xff]  ;;  %v361_v6 = vld [vmem:[%s5958_s8 + $0xa0] sm:$0xff] }
  0x9a   : > { %v362_v7 = vld [vmem:[%s5958_s8 + $0xa8] sm:$0xff]  ;;  %v363_v8 = vld [vmem:[%s5958_s8 + $0xb0] sm:$0xff]  ;;  %v364_v9 = vld [vmem:[%s5958_s8 + $0xb8] sm:$0xff] }
  0x9b   : > { %v365_v10 = vld [vmem:[%s5958_s8 + $0xc0] sm:$0xff]  ;;  %v366_v11 = vld [vmem:[%s5958_s8 + $0xc8] sm:$0xff]  ;;  %v367_v12 = vld [vmem:[%s5958_s8 + $0xd0] sm:$0xff] }
  0x9c   : > { %4900 = vmatpush3.bf16.msra.mxu0 %v4897_v16  ;;  %5188 = vmatpush1.bf16.msra.mxu1 %v5985_v37  ;;  %v368_v13 = vld [vmem:[%s5958_s8 + $0xd8] sm:$0xff]  ;;  %v369_v14 = vld [vmem:[%s5958_s8 + $0xe0] sm:$0xff]  ;;  %v370_v15 = vld [vmem:[%s5958_s8 + $0xe8] sm:$0xff] }
  0x9d   : > { %4902 = vmatprep.subr.bf16.mxu0 %v4901_v22  ;;  %5173 = vmatprep.subr.bf16.mxu1 %v8613_v0  ;;  %v371_v16 = vld [vmem:[%s5958_s8 + $0xf0] sm:$0xff]  ;;  %v372_v17 = vld [vmem:[%s5958_s8 + $0xf8] sm:$0xff]  ;;  %v2528_v18 = vld [vmem:[#allocation8 + $0x180] sm:$0xff] }
  0x9e   : > { %v2529_v19 = vld [vmem:[#allocation8 + $0x188] sm:$0xff]  ;;  %v2480_v21 = vld [vmem:[#allocation8] sm:$0xff]  ;;  %v2530_v25 = vld [vmem:[#allocation8 + $0x190] sm:$0xff] }
  0x9f   : > { %v6038_v20 = vpack.c.bf16 %v2529_v19, %v2528_v18  ;;  %v2531_v26 = vld [vmem:[#allocation8 + $0x198] sm:$0xff]  ;;  %v2482_v29 = vld [vmem:[#allocation8 + $0x10] sm:$0xff]  ;;  %v2532_v32 = vld [vmem:[#allocation8 + $0x1a0] sm:$0xff] }
  0xa0   : > { %4904 = vmatpush3.bf16.msra.mxu0 %v4901_v22  ;;  %5189 = vmatpush1.bf16.msra.mxu1 %v5989_v40  ;;  %v2481_v22 = vld [vmem:[#allocation8 + $0x8] sm:$0xff]  ;;  %v6042_v28 = vpack.c.bf16 %v2531_v26, %v2530_v25  ;;  %v2535_v42 = vld [vmem:[#allocation8 + $0x1b8] sm:$0xff]  ;;  %v2536_v48 = vld [vmem:[#allocation8 + $0x1c0] sm:$0xff] }
  0xa1   : > { %4906 = vmatprep.subr.bf16.mxu0 %v4905_v30  ;;  %5174 = vmatprep.subr.bf16.mxu1 %v8613_v0  ;;  %9020 = vst [vmem:[#allocation20_spill] sm:$0xff] %v6038_v20  ;;  %v4914_v24 = vpack.c.bf16 %v2481_v22, %v2480_v21  ;;  %v2533_v34 = vld [vmem:[#allocation8 + $0x1a8] sm:$0xff]  ;;  %v2488_v52 = vld [vmem:[#allocation8 + $0x40] sm:$0xff]  ;;  %v2502_v21 = vld [vmem:[#allocation8 + $0xb0] sm:$0xff] }
  0xa2   : > { %9021 = vst [vmem:[#allocation21_spill] sm:$0xff] %v6042_v28  ;;  %v6047_v35 = vpack.c.bf16 %v2533_v34, %v2532_v32  ;;  %v2485_v38 = vld [vmem:[#allocation8 + $0x28] sm:$0xff]  ;;  %v2503_v22 = vld [vmem:[#allocation8 + $0xb8] sm:$0xff]  ;;  %v2504_v25 = vld [vmem:[#allocation8 + $0xc0] sm:$0xff] }
  0xa3   : > { %v2489_v53 = vld [vmem:[#allocation8 + $0x48] sm:$0xff]  ;;  %v2508_v34 = vld [vmem:[#allocation8 + $0xe0] sm:$0xff] }
  0xa4   : > { %4908 = vmatpush3.bf16.msra.mxu0 %v4905_v30  ;;  %5190 = vmatpush1.bf16.msra.mxu1 %v5996_v45  ;;  %v2483_v30 = vld [vmem:[#allocation8 + $0x18] sm:$0xff]  ;;  %9022 = vst [vmem:[#allocation22_spill] sm:$0xff] %v6047_v35  ;;  %v2501_v18 = vld [vmem:[#allocation8 + $0xa8] sm:$0xff] }
  0xa5   : > { %4910 = vmatprep.subr.bf16.mxu0 %v4909_v36  ;;  %5175 = vmatprep.subr.bf16.mxu1 %v8613_v0  ;;  %v4917_v31 = vpack.c.bf16 %v2483_v30, %v2482_v29  ;;  %v2505_v26 = vld [vmem:[#allocation8 + $0xc8] sm:$0xff]  ;;  %v2506_v30 = vld [vmem:[#allocation8 + $0xd0] sm:$0xff] }
  0xa6   : > { %v4950_v29 = vpack.c.bf16 %v2505_v26, %v2504_v25 }
  0xa8   : > { %4912 = vmatpush3.bf16.msra.mxu0 %v4909_v36  ;;  %5191 = vmatpush1.bf16.msra.mxu1 %v6002_v50  ;;  %v2484_v36 = vld [vmem:[#allocation8 + $0x20] sm:$0xff] }
  0xa9   : > { %4913 = vmatprep.subr.bf16.mxu0 %v8613_v0  ;;  %5176 = vmatprep.subr.bf16.mxu1 %v8613_v0  ;;  %v4920_v39 = vpack.c.bf16 %v2485_v38, %v2484_v36  ;;  %v2509_v36 = vld [vmem:[#allocation8 + $0xe8] sm:$0xff] }
  0xaa   : > { %v4956_v38 = vpack.c.bf16 %v2509_v36, %v2508_v34  ;;  %v2544_v36 = vld [vmem:[#allocation8 + $0x200] sm:$0xff] }
  0xab   : > { %4674 = vmatmul.mubr.f32.vlgmr.msra.gmra.mrb[0].mxu0 %v342_v41  ;;  %v2534_v41 = vld [vmem:[#allocation8 + $0x1b0] sm:$0xff] }
  0xac   : > { %4676 = vmatprep.mubr.f32.mxu0 %v343_v44  ;;  %5192 = vmatpush1.bf16.msra.mxu1 %v6008_v55  ;;  %v6052_v43 = vpack.c.bf16 %v2535_v42, %v2534_v41  ;;  %v2486_v44 = vld [vmem:[#allocation8 + $0x30] sm:$0xff]  ;;  %v2511_v41 = vld [vmem:[#allocation8 + $0xf8] sm:$0xff] }
  0xad   : > { %5177 = vmatprep.subr.bf16.mxu1 %v8613_v0  ;;  %4915 = vmatpush1.bf16.msra.mxu0 %v4914_v24  ;;  %v4947_v24 = vpack.c.bf16 %v2503_v22, %v2502_v21  ;;  %v6523_v55 = vld [vmem:[#allocation8 + $0x298] sm:$0xff] }
  0xae   : > { %4916 = vmatprep.subr.bf16.mxu0 %v8613_v0  ;;  %9023 = vst [vmem:[#allocation23_spill] sm:$0xff] %v6052_v43 }
  0xaf   : > { %4677 = vmatmul.mubr.f32.gmra.mrb[2].mxu0 %v344_v46  ;;  %v2487_v46 = vld [vmem:[#allocation8 + $0x38] sm:$0xff] }
  0xb0   : > { %4679 = vmatprep.mubr.f32.mxu0 %v345_v49  ;;  %5193 = vmatpush1.bf16.msra.mxu1 %v6038_v20  ;;  %v4923_v47 = vpack.c.bf16 %v2487_v46, %v2486_v44  ;;  %v2537_v49 = vld [vmem:[#allocation8 + $0x1c8] sm:$0xff]  ;;  %v6521_v20 = vld [vmem:[#allocation8 + $0x290] sm:$0xff] }
  0xb1   : > { %5178 = vmatprep.subr.bf16.mxu1 %v8613_v0  ;;  %4918 = vmatpush1.bf16.msra.mxu0 %v4917_v31  ;;  %v2507_v31 = vld [vmem:[#allocation8 + $0xd8] sm:$0xff] }
  0xb2   : > { %4919 = vmatprep.subr.bf16.mxu0 %v8613_v0  ;;  %v4953_v32 = vpack.c.bf16 %v2507_v31, %v2506_v30 }
  0xb3   : > { %4680 = vmatmul.mubr.f32.gmra.mrb[4].mxu0 %v346_v51  ;;  %v6057_v51 = vpack.c.bf16 %v2537_v49, %v2536_v48  ;;  %v6097_v49 = vld [vmem:[%s8595_s2] ss:$0 sm:$0xff] }
  0xb4   : > { %4682 = vmatprep.mubr.f32.mxu0 %v347_v54  ;;  %5194 = vmatpush1.bf16.msra.mxu1 %v6042_v28  ;;  %v4926_v54 = vpack.c.bf16 %v2489_v53, %v2488_v52 }
  0xb5   : > { %5179 = vmatprep.subr.bf16.mxu1 %v8613_v0  ;;  %4921 = vmatpush1.bf16.msra.mxu0 %v4920_v39  ;;  %9024 = vst [vmem:[#allocation24_spill] sm:$0xff] %v6057_v51  ;;  %v2510_v39 = vld [vmem:[#allocation8 + $0xf0] sm:$0xff] }
  0xb6   : > { %4922 = vmatprep.subr.bf16.mxu0 %v8613_v0  ;;  %v4959_v42 = vpack.c.bf16 %v2511_v41, %v2510_v39 }
  0xb7   : > { %4683 = vmatmul.mubr.f32.gmra.mrb[6].mxu0 %v348_v56  ;;  %v2538_v56 = vld [vmem:[#allocation8 + $0x1d0] sm:$0xff] }
  0xb8   : > { %4685 = vmatprep.mubr.f32.mxu0 %v349_v57  ;;  %5195 = vmatpush1.bf16.msra.mxu1 %v6047_v35  ;;  %v2539_v57 = vld [vmem:[#allocation8 + $0x1d8] sm:$0xff]  ;;  %v6459_v35 = vld [vmem:[#allocation8 + $0x288] sm:$0xff] }
  0xb9   : > { %5180 = vmatprep.subr.bf16.mxu1 %v8613_v0  ;;  %4924 = vmatpush1.bf16.msra.mxu0 %v4923_v47 }
  0xba   : > { %4925 = vmatprep.subr.bf16.mxu0 %v8613_v0 }
  0xbb   : > { %4686 = vmatmul.mubr.f32.gmra.mrb[8].mxu0 %v350_v58  ;;  %v6062_v58 = vpack.c.bf16 %v2539_v57, %v2538_v56 }
  0xbc   : > { %4688 = vmatprep.mubr.f32.mxu0 %v351_v59  ;;  %5196 = vmatpush1.bf16.msra.mxu1 %v6052_v43  ;;  %v2490_v59 = vld [vmem:[#allocation8 + $0x50] sm:$0xff] }
  0xbd   : > { %5181 = vmatprep.subr.bf16.mxu1 %v8613_v0  ;;  %9025 = vst [vmem:[#allocation25_spill] sm:$0xff] %v6062_v58  ;;  %4927 = vmatpush1.bf16.msra.mxu0 %v4926_v54 }
  0xbe   : > { %4928 = vmatprep.subr.bf16.mxu0 %v8613_v0 }
  0xbf   : > { %4689 = vmatmul.mubr.f32.gmra.mrb[10].mxu0 %v352_v60  ;;  %v2491_v60 = vld [vmem:[#allocation8 + $0x58] sm:$0xff] }
  0xc0   : > { %4691 = vmatprep.mubr.f32.mxu0 %v353_v61  ;;  %5197 = vmatpush1.bf16.msra.mxu1 %v6057_v51  ;;  %v4929_v61 = vpack.c.bf16 %v2491_v60, %v2490_v59  ;;  %v2555_v51 = vld [vmem:[#allocation8 + $0x258] sm:$0xff] }
  0xc1   : > { %5182 = vmatprep.subr.bf16.mxu1 %v8613_v0 }
  0xc2   : > { %4930 = vmatpush1.bf16.msra.mxu0 %v4929_v61  ;;  %v653_v61 = vlaneseq }
  0xc3   : > { %4692 = vmatmul.mubr.f32.gmra.mrb[12].mxu0 %v354_v62  ;;  %v2540_v62 = vld [vmem:[#allocation8 + $0x1e0] sm:$0xff]  ;;  %4931 = vmatprep.subr.bf16.mxu0 %v8613_v0 }
  0xc4   : > { %4694 = vmatprep.mubr.f32.mxu0 %v355_v63  ;;  %5198 = vmatpush1.bf16.msra.mxu1 %v6062_v58  ;;  %v2541_v63 = vld [vmem:[#allocation8 + $0x1e8] sm:$0xff] }
  0xc5   : > { %5183 = vmatprep.subr.bf16.mxu1 %v8613_v0 }
  0xc7   : > { %4695 = vmatmul.mubr.f32.gmra.mrb[14].mxu0 %v356_v1  ;;  %v6067_v1 = vpack.c.bf16 %v2541_v63, %v2540_v62 }
  0xc8   : > { %4697 = vmatprep.mubr.f32.mxu0 %v357_v2  ;;  %v2492_v2 = vld [vmem:[#allocation8 + $0x60] sm:$0xff] }
  0xc9   : > { %9026 = vst [vmem:[#allocation26_spill] sm:$0xff] %v6067_v1  ;;  %5199 = vmatpush1.bf16.msra.mxu1 %v6067_v1  ;;  %v9088_v1 = vmov 0 }
  0xca   : > { %5184 = vmatprep.subr.bf16.mxu1 %v8613_v0 }
  0xcb   : > { %4698 = vmatmul.mubr.f32.gmra.mrb[16].mxu0 %v358_v3  ;;  %v2493_v3 = vld [vmem:[#allocation8 + $0x68] sm:$0xff] }
  0xcc   : > { %4700 = vmatprep.mubr.f32.mxu0 %v359_v4  ;;  %v4932_v4 = vpack.c.bf16 %v2493_v3, %v2492_v2 }
  0xce   : > { %4933 = vmatpush1.bf16.msra.mxu0 %v4932_v4  ;;  %v6114_v4 = vshrl.u32 %v653_v61, 7 }
  0xcf   : > { %4701 = vmatmul.mubr.f32.gmra.mrb[18].mxu0 %v360_v5  ;;  %v2542_v5 = vld [vmem:[#allocation8 + $0x1f0] sm:$0xff]  ;;  %4934 = vmatprep.subr.bf16.mxu0 %v8613_v0 }
  0xd0   : > { %4703 = vmatprep.mubr.f32.mxu0 %v361_v6  ;;  %v2543_v6 = vld [vmem:[#allocation8 + $0x1f8] sm:$0xff]  ;;  %vm8658_vm0 = vcmp.lt.s32.totalorder %v6114_v4, 1  ;;  %vm8651_vm1 = vcmp.lt.s32.totalorder %v6114_v4, 7  ;;  %v6147_v39 = vadd.s32 112, %v6114_v4 }
  0xd2   : > { %9038 = vst [vmem:[#allocation38_spill] sm:$0xff] %v6147_v39 }
  0xd3   : > { %4704 = vmatmul.mubr.f32.gmra.mrb[20].mxu0 %v362_v7  ;;  %v6072_v7 = vpack.c.bf16 %v2543_v6, %v2542_v5 }
  0xd4   : > { %4706 = vmatprep.mubr.f32.mxu0 %v363_v8  ;;  %v2494_v8 = vld [vmem:[#allocation8 + $0x70] sm:$0xff] }
  0xd5   : > { %9027 = vst [vmem:[#allocation27_spill] sm:$0xff] %v6072_v7  ;;  %5200 = vmatpush1.bf16.msra.mxu1 %v6072_v7 }
  0xd6   : > { %5009 = vmatprep.subr.bf16.mxu1 %v8613_v0 }
  0xd7   : > { %4707 = vmatmul.mubr.f32.gmra.mrb[22].mxu0 %v364_v9  ;;  %v2495_v9 = vld [vmem:[#allocation8 + $0x78] sm:$0xff] }
  0xd8   : > { %4709 = vmatprep.mubr.f32.mxu0 %v365_v10  ;;  %v4935_v10 = vpack.c.bf16 %v2495_v9, %v2494_v8  ;;  %v6118_v9 = vadd.s32 96, %v6114_v4 }
  0xda   : > { %4936 = vmatpush1.bf16.msra.mxu0 %v4935_v10  ;;  %9031 = vst [vmem:[#allocation31_spill] sm:$0xff] %v6118_v9  ;;  %v8606_v21 = vshra.s32 %v6118_v9, 4 }
  0xdb   : > { %4710 = vmatmul.mubr.f32.gmra.mrb[24].mxu0 %v366_v11  ;;  %4937 = vmatprep.subr.bf16.mxu0 %v8613_v0  ;;  %v2496_v11 = vld [vmem:[#allocation8 + $0x80] sm:$0xff] }
  0xdc   : > { %4712 = vmatprep.mubr.f32.mxu0 %v367_v12  ;;  %v2497_v12 = vld [vmem:[#allocation8 + $0x88] sm:$0xff]  ;;  %vm6161_vm3 = vcmp.ge.s32.totalorder %v8606_v21, 1 }
  0xdf   : > { %4713 = vmatmul.mubr.f32.gmra.mrb[26].mxu0 %v368_v13  ;;  %v4938_v13 = vpack.c.bf16 %v2497_v12, %v2496_v11 }
  0xe0   : > { %4715 = vmatprep.mubr.f32.mxu0 %v369_v14  ;;  %v2498_v14 = vld [vmem:[#allocation8 + $0x90] sm:$0xff] }
  0xe1   : > { %4939 = vmatpush1.bf16.msra.mxu0 %v4938_v13  ;;  %v6126_v13 = vadd.s32 104, %v6114_v4 }
  0xe2   : > { %4940 = vmatprep.subr.bf16.mxu0 %v8613_v0 }
  0xe3   : > { %4716 = vmatmul.mubr.f32.gmra.mrb[28].mxu0 %v370_v15  ;;  %v2499_v15 = vld [vmem:[#allocation8 + $0x98] sm:$0xff]  ;;  %9034 = vst [vmem:[#allocation34_spill] sm:$0xff] %v6126_v13  ;;  %v731_v30 = vand.u32 15, %v6126_v13 }
  0xe4   : > { %4718 = vmatprep.mubr.f32.mxu0 %v371_v16  ;;  %v4941_v16 = vpack.c.bf16 %v2499_v15, %v2498_v14 }
  0xe5   : > { %vm6182_vm5 = vcmp.lt.s32.totalorder %v731_v30, 15 }
  0xe6   : > { %4942 = vmatpush1.bf16.msra.mxu0 %v4941_v16 }
  0xe7   : > { %4719 = vmatmul.mubr.f32.gmra.mrb[30].mxu0 %v372_v17  ;;  %v2500_v17 = vld [vmem:[#allocation8 + $0xa0] sm:$0xff]  ;;  %4943 = vmatprep.subr.bf16.mxu0 %v8613_v0 }
  0xe8   : > { %v4944_v19 = vpack.c.bf16 %v2501_v18, %v2500_v17  ;;  %v730_v18 = vand.u32 15, %v6118_v9 }
  0xea   : > { %4945 = vmatpush1.bf16.msra.mxu0 %v4944_v19  ;;  %vm6155_vm2 = vcmp.ge.s32.totalorder %v730_v18, 1 }
  0xeb   : > { %4946 = vmatprep.subr.bf16.mxu0 %v8613_v0 }
  0xee   : > { %4948 = vmatpush1.bf16.msra.mxu0 %v4947_v24 }
  0xef   : > { %4949 = vmatprep.subr.bf16.mxu0 %v8613_v0 }
  0xf2   : > { %4951 = vmatpush1.bf16.msra.mxu0 %v4950_v29  ;;  %v8605_v29 = vshra.s32 %v6126_v13, 4  ;;  %v2549_v13 = vld [vmem:[#allocation8 + $0x228] sm:$0xff] }
  0xf3   : > { %4952 = vmatprep.subr.bf16.mxu0 %v8613_v0 }
  0xf4   : > { %vm6178_vm4 = vcmp.ge.s32.totalorder %v8605_v29, 1 }
  0xf5   : > { %vm1277_vm6 = vmand %vm6178_vm4, %vm6182_vm5 }
  0xf6   : > { %4954 = vmatpush1.bf16.msra.mxu0 %v4953_v32 }
  0xf7   : > { %4955 = vmatprep.subr.bf16.mxu0 %v8613_v0 }
  0xfa   : > { %4957 = vmatpush1.bf16.msra.mxu0 %v4956_v38  ;;  %v2545_v38 = vld [vmem:[#allocation8 + $0x208] sm:$0xff] }
  0xfb   : > { %4958 = vmatprep.subr.bf16.mxu0 %v8613_v0 }
  0xfe   : > { %4960 = vmatpush1.bf16.msra.mxu0 %v4959_v42 }
  0xff   : > { %4961 = vmatprep.subr.bf16.mxu0 %v8613_v0 }
 0x17e   : > { %v6086_v44 = vpop.f32.mrb[0].mxu0 }
 0x17f   : > { %v6088_v46 = vpop.f32.mrb[1].mxu0 }
 0x182   : > { %v6090_v47 = vpop.f32.mrb[2].mxu0 }
 0x183   : > { %v6092_v48 = vpop.f32.mrb[3].mxu0 }
 0x186   : > { %v4681_v52 = vpop.f32.mrb[4].mxu0 }
 0x187   : > { %v6100_v53 = vadd.f32 %v4681_v52, %v6097_v49  ;;  %v6102_v54 = vpop.f32.mrb[5].mxu0  ;;  %v9040_v52 = vmov 0 }
 0x188   : > { %v9041_v52 = vsel %vm6155_vm2, 4294967295, %v9040_v52 }
 0x189   : > { %9042 = vst [vmem:[#allocation40_spill] sm:$0xff] %v9041_v52 }
 0x18a   : > { %v4684_v56 = vpop.f32.mrb[6].mxu0 }
 0x18b   : > { %v6105_v57 = vadd.f32 %v4684_v56, %v6097_v49  ;;  %v492_v59 = vpop.f32.mrb[7].mxu0  ;;  %v9043_v56 = vmov 0 }
 0x18c   : > { %v6108_v60 = vadd.f32 %v6097_v49, %v492_v59  ;;  %v9044_v56 = vsel %vm6161_vm3, 4294967295, %v9043_v56 }
 0x18d   : > { %9028 = vst [vmem:[#allocation28_spill] sm:$0xff] %v6105_v57  ;;  %9045 = vst [vmem:[#allocation41_spill] sm:$0xff] %v9044_v56 }
 0x18e   : > { %9029 = vst [vmem:[#allocation29_spill] sm:$0xff] %v6108_v60  ;;  %v4687_v62 = vpop.f32.mrb[8].mxu0 }
 0x18f   : > { %v508_v63 = vadd.f32 %v4687_v62, %v6097_v49  ;;  %v502_v2 = vpop.f32.mrb[9].mxu0 }
 0x190   : > { %v6112_v3 = vadd.f32 %v6097_v49, %v502_v2 }
 0x191   : > { %v6121_v11 = vmax.f32 %v508_v63, 0.0 }
 0x192   : > { %9030 = vst [vmem:[#allocation30_spill] sm:$0xff] %v6112_v3  ;;  %v4690_v5 = vpop.f32.mrb[10].mxu0 }
 0x193   : > { %v518_v6 = vadd.f32 %v4690_v5, %v6097_v49  ;;  %v512_v8 = vpop.f32.mrb[11].mxu0  ;;  %9032 = vst [vmem:[#allocation32_spill] sm:$0xff] %v6121_v11  ;;  %v8607_v31 = vrot.slane %v6121_v11, 1 }
 0x194   : > { %v513_v10 = vadd.f32 %v6097_v49, %v512_v8  ;;  %v9047_v8 = vmov 0 }
 0x195   : > { %v6123_v12 = vmax.f32 %v518_v6, 0.0  ;;  %v5010_v6 = vpack.c.bf16 %v2545_v38, %v2544_v36  ;;  %v9048_v8 = vsel %vm6178_vm4, 4294967295, %v9047_v8  ;;  %v2547_v36 = vld [vmem:[#allocation8 + $0x218] sm:$0xff]  ;;  %v6197_v38 = vadd.s32 128, %v6114_v4 }
 0x196   : > { %v6128_v14 = vmax.f32 %v513_v10, 0.0  ;;  %v4693_v15 = vpop.f32.mrb[12].mxu0  ;;  %9049 = vst [vmem:[#allocation43_spill] sm:$0xff] %v9048_v8  ;;  %v9050_v10 = vmov 0 }
 0x197   : > { %9033 = vst [vmem:[#allocation33_spill] sm:$0xff] %v6123_v12  ;;  %v528_v16 = vadd.f32 %v4693_v15, %v6097_v49  ;;  %v522_v17 = vpop.f32.mrb[13].mxu0  ;;  %v761_v19 = vrot.slane %v6123_v12, 7  ;;  %v1178_v59 = vrot.slane %v6123_v12, 1  ;;  %v9051_v10 = vsel %vm6182_vm5, 4294967295, %v9050_v10  ;;  %9056 = vst [vmem:[#allocation48_spill] sm:$0xff] %v6197_v38 }
 0x198   : > { %9035 = vst [vmem:[#allocation35_spill] sm:$0xff] %v6128_v14  ;;  %v523_v22 = vadd.f32 %v6097_v49, %v522_v17  ;;  %v1177_v24 = vrot.slane %v6128_v14, 1  ;;  %v8608_v25 = vrot.slane %v6128_v14, 7  ;;  %9052 = vst [vmem:[#allocation44_spill] sm:$0xff] %v9051_v10  ;;  %v6187_v15 = vadd.s32 120, %v6114_v4  ;;  %v6457_v14 = vld [vmem:[#allocation8 + $0x280] sm:$0xff] }
 0x199   : > { %v6138_v26 = vmax.f32 %v528_v16, 0.0  ;;  %v734_v9 = vand.u32 15, %v6197_v38  ;;  %vm9129_vm5 = vcmp.lt.s32.totalorder %v6114_v4, 7 }
 0x19a   : > { %v6143_v32 = vmax.f32 %v523_v22, 0.0  ;;  %v4696_v34 = vpop.f32.mrb[14].mxu0  ;;  %v6153_v41 = vsel %vm8658_vm0, %v8608_v25, %v761_v19  ;;  %v6170_v61 = vsel %vm8651_vm1, %v8607_v31, %v1177_v24  ;;  %9053 = vst [vmem:[#allocation45_spill] sm:$0xff] %v6187_v15  ;;  %v732_v22 = vand.u32 15, %v6147_v39 }
 0x19b   : > { %9036 = vst [vmem:[#allocation36_spill] sm:$0xff] %v6138_v26  ;;  %9039 = vst [vmem:[#allocation39_spill] sm:$0xff] %v6153_v41  ;;  %v532_v42 = vpop.f32.mrb[15].mxu0  ;;  %v538_v62 = vadd.f32 %v4696_v34, %v6097_v49  ;;  %v763_v5 = vrot.slane %v6138_v26, 7  ;;  %v2546_v34 = vld [vmem:[#allocation8 + $0x210] sm:$0xff]  ;;  %vm6280_vm11 = vcmp.ge.s32.totalorder %v734_v9, 1 }
 0x19c   : > { %9037 = vst [vmem:[#allocation37_spill] sm:$0xff] %v6143_v32  ;;  %9046 = vst [vmem:[#allocation42_spill] sm:$0xff] %v6170_v61  ;;  %v533_v63 = vadd.f32 %v6097_v49, %v532_v42  ;;  %v762_v2 = vrot.slane %v6143_v32, 7  ;;  %v6204_v42 = vsel %vm8651_vm1, %v1177_v24, %v1178_v59  ;;  %v5013_v24 = vpack.c.bf16 %v2547_v36, %v2546_v34  ;;  %v2554_v41 = vld [vmem:[#allocation8 + $0x250] sm:$0xff] }
 0x19d   : > { %9057 = vst [vmem:[#allocation49_spill] sm:$0xff] %v6204_v42  ;;  %v6208_v29 = vmax.f32 %v538_v62, 0.0  ;;  %vm6226_vm7 = vcmp.ge.s32.totalorder %v732_v22, 1  ;;  %v9064_v36 = vshra.s32 %v6147_v39, 4  ;;  %v1180_v22 = vrot.slane %v6138_v26, 1 }
 0x19e   : > { %v6189_v16 = vmax.f32 %v533_v63, 0.0  ;;  %v4699_v17 = vpop.f32.mrb[16].mxu0  ;;  %v6193_v18 = vsel %vm8658_vm0, %v761_v19, %v762_v2  ;;  %v1179_v63 = vrot.slane %v6143_v32, 1  ;;  %v6216_v31 = vsel %vm8658_vm0, %v762_v2, %v763_v5  ;;  %v2548_v2 = vld [vmem:[#allocation8 + $0x220] sm:$0xff] }
 0x19f   : > { %9055 = vst [vmem:[#allocation47_spill] sm:$0xff] %v6193_v18  ;;  %v542_v30 = vpop.f32.mrb[17].mxu0  ;;  %4355 = vmatprep.mubr.msk.f32.mxu1 %vm6155_vm2, %v6193_v18  ;;  %9058 = vst [vmem:[#allocation50_spill] sm:$0xff] %v6208_v29  ;;  %v9060_v19 = vmov 0  ;;  %vm6238_vm8 = vcmp.ge.s32.totalorder %v9064_v36, 1  ;;  %v6244_v62 = vadd.s32 136, %v6114_v4  ;;  %v548_v61 = vadd.f32 %v4699_v17, %v6097_v49 }
 0x1a0   : > { %9054 = vst [vmem:[#allocation46_spill] sm:$0xff] %v6189_v16  ;;  %v543_v21 = vadd.f32 %v6097_v49, %v542_v30  ;;  %4356 = vmatmul.mubr.msk.f32.vlgmr.msra.gmra.mrb[0].mxu1 %vm6161_vm3, %v6204_v42  ;;  %9059 = vst [vmem:[#allocation51_spill] sm:$0xff] %v6216_v31  ;;  %v764_v25 = vrot.slane %v6189_v16, 7  ;;  %v9061_v19 = vsel %vm6226_vm7, 4294967295, %v9060_v19  ;;  %v6234_v42 = vsel %vm8651_vm1, %v1178_v59, %v1179_v63 }
 0x1a1   : > { %5011 = vmatpush1.bf16.msra.mxu1 %v5010_v6  ;;  %2985 = vmatprep.mubr.f32.mxu1 %v6216_v31  ;;  %9062 = vst [vmem:[#allocation52_spill] sm:$0xff] %v9061_v19  ;;  %v733_v6 = vand.u32 15, %v6187_v15  ;;  %9063 = vst [vmem:[#allocation53_spill] sm:$0xff] %v6234_v42  ;;  %v765_v36 = vrot.slane %v6208_v29, 7  ;;  %v9071_v17 = vshra.s32 %v6187_v15, 4  ;;  %v9072_v39 = vmov 0 }
 0x1a2   : > { %5012 = vmatprep.subr.bf16.mxu1 %v8613_v0  ;;  %v4702_v30 = vpop.f32.mrb[18].mxu0  ;;  %v9065_v0 = vmov 0  ;;  %9068 = vst [vmem:[#allocation55_spill] sm:$0xff] %v6244_v62  ;;  %v6247_v7 = vmax.f32 %v543_v21, 0.0  ;;  %v6257_v59 = vsel %vm8658_vm0, %v763_v5, %v764_v25  ;;  %v5016_v21 = vpack.c.bf16 %v2549_v13, %v2548_v2  ;;  %v2551_v2 = vld [vmem:[#allocation8 + $0x238] sm:$0xff] }
 0x1a3   : > { %v552_v34 = vpop.f32.mrb[19].mxu0  ;;  %v9066_v0 = vsel %vm6238_vm8, 4294967295, %v9065_v0  ;;  %9070 = vst [vmem:[#allocation57_spill] sm:$0xff] %v6257_v59  ;;  %vm6265_vm9 = vcmp.ge.s32.totalorder %v9071_v17, 1  ;;  %v9076_v5 = vmov 0.0|0.0   ;;  %vm6274_vm10 = vcmp.lt.s32.totalorder %v733_v6, 15 }
 0x1a4   : > { %9067 = vst [vmem:[#allocation54_spill] sm:$0xff] %v9066_v0  ;;  %9069 = vst [vmem:[#allocation56_spill] sm:$0xff] %v6247_v7  ;;  %4357 = vmatmul.mubr.msk.f32.gmra.mrb[2].mxu1 %vm1277_vm6, %v6234_v42  ;;  %v9073_v39 = vsel %vm6265_vm9, 4294967295, %v9072_v39  ;;  %v6271_v42 = vadd.s32 144, %v6114_v4  ;;  %v9077_v31 = vmov 0  ;;  %v9080_v13 = vmov 0 }
 0x1a5   : > { %4358 = vmatprep.mubr.msk.f32.mxu1 %vm6226_vm7, %v6257_v59  ;;  %5014 = vmatpush1.bf16.msra.mxu1 %v5013_v24  ;;  %9074 = vst [vmem:[#allocation58_spill] sm:$0xff] %v9073_v39  ;;  %v9078_v31 = vsel %vm6274_vm10, 4294967295, %v9077_v31  ;;  %v9081_v13 = vsel %vm6280_vm11, 4294967295, %v9080_v13  ;;  %v2550_v24 = vld [vmem:[#allocation8 + $0x230] sm:$0xff]  ;;  %v6285_v17 = vadd.s32 152, %v6114_v4  ;;  %v6289_v10 = vsel %vm8651_vm1, %v1179_v63, %v1180_v22  ;;  %vm1279_vm12 = vmand %vm6265_vm9, %vm6274_vm10 }
 0x1a6   : > { %9075 = vst [vmem:[#allocation59_spill] sm:$0xff] %v6271_v42  ;;  %5015 = vmatprep.subr.bf16.mxu1 %v9076_v5  ;;  %9079 = vst [vmem:[#allocation60_spill] sm:$0xff] %v9078_v31  ;;  %v6278_v59 = vpop.f32.mrb[20].mxu0  ;;  %v1181_v6 = vrot.slane %v6189_v16, 1  ;;  %v735_v26 = vand.u32 15, %v6244_v62  ;;  %v6294_v9 = vmax.f32 %v548_v61, 0.0  ;;  %v553_v18 = vadd.f32 %v6097_v49, %v552_v34 }
 0x1a7   : > { %9082 = vst [vmem:[#allocation61_spill] sm:$0xff] %v9081_v13  ;;  %9083 = vst [vmem:[#allocation62_spill] sm:$0xff] %v6285_v17  ;;  %v562_v15 = vpop.f32.mrb[21].mxu0  ;;  %v6302_v58 = vsel %vm8658_vm0, %v764_v25, %v765_v36  ;;  %v766_v63 = vrot.slane %v6247_v7, 7  ;;  %v5019_v61 = vpack.c.bf16 %v2551_v2, %v2550_v24  ;;  %v9087_v34 = vshra.s32 %v6197_v38, 4  ;;  %v2553_v16 = vld [vmem:[#allocation8 + $0x248] sm:$0xff] }
 0x1a8   : > { %9084 = vst [vmem:[#allocation63_spill] sm:$0xff] %v6289_v10  ;;  %9085 = vst [vmem:[#allocation64_spill] sm:$0xff] %v6294_v9  ;;  %4359 = vmatmul.mubr.msk.f32.gmra.mrb[4].mxu1 %vm6238_vm8, %v6289_v10  ;;  %v736_v25 = vand.u32 15, %v6271_v42  ;;  %v737_v24 = vand.u32 15, %v6285_v17  ;;  %v6324_v2 = vadd.s32 160, %v6114_v4  ;;  %v1182_v38 = vrot.slane %v6208_v29, 1 }
 0x1a9   : > { %9086 = vst [vmem:[#allocation65_spill] sm:$0xff] %v6302_v58  ;;  %2995 = vmatprep.mubr.f32.mxu1 %v6302_v58  ;;  %5017 = vmatpush1.bf16.msra.mxu1 %v5016_v21  ;;  %vm6312_vm13 = vcmp.ge.s32.totalorder %v9087_v34, 1  ;;  %v2552_v21 = vld [vmem:[#allocation8 + $0x240] sm:$0xff]  ;;  %v6328_v34 = vsel %vm8651_vm1, %v1180_v22, %v1181_v6  ;;  %v9093_v0 = vshra.s32 %v6244_v62, 4  ;;  %v9094_v32 = vmov 0  ;;  %v6404_v13 = vld [vmem:[#allocation8 + $0x278] sm:$0xff] }
 0x1aa   : > { %v9089_v1 = vsel %vm6312_vm13, 4294967295, %v9088_v1  ;;  %5018 = vmatprep.subr.bf16.mxu1 %v9076_v5  ;;  %v6319_v58 = vpop.f32.mrb[22].mxu0  ;;  %9091 = vst [vmem:[#allocation67_spill] sm:$0xff] %v6324_v2  ;;  %9092 = vst [vmem:[#allocation68_spill] sm:$0xff] %v6328_v34  ;;  %vm6339_vm15 = vcmp.lt.s32.totalorder %v735_v26, 15  ;;  %v9097_v19 = vmov 0  ;;  %v558_v8 = vadd.f32 %v4702_v30, %v6097_v49 }
 0x1ab   : > { %9090 = vst [vmem:[#allocation66_spill] sm:$0xff] %v9089_v1  ;;  %v6331_v10 = vpop.f32.mrb[23].mxu0  ;;  %vm6335_vm14 = vcmp.ge.s32.totalorder %v9093_v0, 1  ;;  %v9098_v19 = vsel %vm6339_vm15, 4294967295, %v9097_v19  ;;  %v6344_v22 = vmax.f32 %v553_v18, 0.0  ;;  %v6354_v0 = vsel %vm8658_vm0, %v765_v36, %v766_v63 }
 0x1ac   : > { %v9095_v32 = vsel %vm6335_vm14, 4294967295, %v9094_v32  ;;  %9099 = vst [vmem:[#allocation70_spill] sm:$0xff] %v9098_v19  ;;  %4360 = vmatmul.mubr.msk.f32.gmra.mrb[6].mxu1 %vm1279_vm12, %v6328_v34  ;;  %9101 = vst [vmem:[#allocation72_spill] sm:$0xff] %v6354_v0  ;;  %v767_v26 = vrot.slane %v6294_v9, 7  ;;  %v5022_v18 = vpack.c.bf16 %v2553_v16, %v2552_v21  ;;  %vm6360_vm6 = vcmp.ge.s32.totalorder %v736_v25, 1  ;;  %v6387_v21 = vld [vmem:[#allocation8 + $0x260] sm:$0xff] }
 0x1ad   : > { %9096 = vst [vmem:[#allocation69_spill] sm:$0xff] %v9095_v32  ;;  %9100 = vst [vmem:[#allocation71_spill] sm:$0xff] %v6344_v22  ;;  %4361 = vmatprep.mubr.msk.f32.mxu1 %vm6280_vm11, %v6354_v0  ;;  %5020 = vmatpush1.bf16.msra.mxu1 %v5019_v61  ;;  %v9102_v30 = vmov 0  ;;  %v9105_v62 = vshra.s32 %v6271_v42, 4  ;;  %v9106_v31 = vmov 0  ;;  %v6371_v36 = vadd.s32 168, %v6114_v4 }
 0x1ae   : > { %v9103_v30 = vsel %vm6360_vm6, 4294967295, %v9102_v30  ;;  %5021 = vmatprep.subr.bf16.mxu1 %v9076_v5  ;;  %v6374_v34 = vpop.f32.mrb[24].mxu0  ;;  %v5025_v0 = vpack.c.bf16 %v2555_v51, %v2554_v41  ;;  %v9110_v16 = vshra.s32 %v6285_v17, 4  ;;  %v9111_v61 = vmov 0  ;;  %v6389_v42 = vld [vmem:[#allocation8 + $0x268] sm:$0xff]  ;;  %v6402_v17 = vld [vmem:[#allocation8 + $0x270] sm:$0xff]  ;;  %vm9132_vm11 = vmand %vm6335_vm14, %vm6339_vm15 }
 0x1af   : > { %9104 = vst [vmem:[#allocation73_spill] sm:$0xff] %v9103_v30  ;;  %vm6366_vm1 = vcmp.ge.s32.totalorder %v9105_v62, 1  ;;  %9109 = vst [vmem:[#allocation75_spill] sm:$0xff] %v6371_v36  ;;  %vm6382_vm0 = vcmp.lt.s32.totalorder %v737_v24, 15  ;;  %v9114_v25 = vmov 0  ;;  %v738_v62 = vand.u32 15, %v6324_v2 }
 0x1b0   : > { %v9107_v31 = vsel %vm6366_vm1, 4294967295, %v9106_v31  ;;  %vm6378_vm12 = vcmp.ge.s32.totalorder %v9110_v16, 1  ;;  %v9115_v25 = vsel %vm6382_vm0, 4294967295, %v9114_v25  ;;  %v6393_v51 = vadd.s32 176, %v6114_v4  ;;  %v6400_v16 = vpop.f32.mrb[25].mxu0 }
 0x1b1   : > { %9108 = vst [vmem:[#allocation74_spill] sm:$0xff] %v9107_v31  ;;  %v9112_v61 = vsel %vm6378_vm12, 4294967295, %v9111_v61  ;;  %9116 = vst [vmem:[#allocation77_spill] sm:$0xff] %v9115_v25  ;;  %vm9118_vm10 = vcmp.lt.s32.totalorder %v6114_v4, 7  ;;  %v1183_v24 = vrot.slane %v6247_v7, 1  ;;  %v6407_v39 = vadd.s32 8, %v6114_v4  ;;  %5023 = vmatpush1.bf16.msra.mxu1 %v5022_v18 }
 0x1b2   : > { %9113 = vst [vmem:[#allocation76_spill] sm:$0xff] %v9112_v61  ;;  %9117 = vst [vmem:[#allocation78_spill] sm:$0xff] %v6393_v51  ;;  %v6397_v41 = vsel %vm9118_vm10, %v1181_v6, %v1182_v38  ;;  %v6410_v29 = vadd.s32 16, %v6114_v4  ;;  %v6412_v12 = vmax.f32 %v558_v8, 0.0  ;;  %v563_v43 = vadd.f32 %v6097_v49, %v562_v15  ;;  %v6433_v1 = vpop.f32.mrb[26].mxu0  ;;  %5024 = vmatprep.subr.bf16.mxu1 %v9076_v5 }
 0x1b3   : > { %9119 = vst [vmem:[#allocation79_spill] sm:$0xff] %v6397_v41  ;;  %9120 = vst [vmem:[#allocation80_spill] sm:$0xff] %v6407_v39  ;;  %4362 = vmatmul.mubr.msk.f32.gmra.mrb[8].mxu1 %vm6312_vm13, %v6397_v41  ;;  %vm9123_vm10 = vcmp.lt.s32.totalorder %v6114_v4, 1  ;;  %v768_v7 = vrot.slane %v6344_v22, 7  ;;  %v5028_v8 = vpack.c.bf16 %v6389_v42, %v6387_v21  ;;  %v718_v41 = vand.u32 15, %v6114_v4 }
 0x1b4   : > { %9121 = vst [vmem:[#allocation81_spill] sm:$0xff] %v6410_v29  ;;  %9122 = vst [vmem:[#allocation82_spill] sm:$0xff] %v6412_v12  ;;  %v6420_v6 = vsel %vm9123_vm10, %v766_v63, %v767_v26  ;;  %vm6436_vm10 = vcmp.ge.s32.totalorder %v738_v62, 1  ;;  %v739_v52 = vand.u32 15, %v6371_v36  ;;  %v740_v42 = vand.u32 15, %v6393_v51  ;;  %v6453_v62 = vpop.f32.mrb[27].mxu0 }
 0x1b5   : > { %9124 = vst [vmem:[#allocation83_spill] sm:$0xff] %v6420_v6  ;;  %3005 = vmatprep.mubr.f32.mxu1 %v6420_v6  ;;  %v9125_v6 = vmov 0  ;;  %v6445_v21 = vadd.s32 184, %v6114_v4  ;;  %v568_v63 = vadd.f32 %v6278_v59, %v6097_v49  ;;  %v6451_v15 = vsel %vm9129_vm5, %v1182_v38, %v1183_v24  ;;  %5026 = vmatpush1.bf16.msra.mxu1 %v5025_v0 }
 0x1b6   : > { %v9126_v6 = vsel %vm6436_vm10, 4294967295, %v9125_v6  ;;  %9130 = vst [vmem:[#allocation86_spill] sm:$0xff] %v6451_v15  ;;  %v1184_v56 = vrot.slane %v6294_v9, 1  ;;  %v6461_v28 = vmax.f32 %v563_v43, 0.0  ;;  %vm9133_vm5 = vcmp.lt.s32.totalorder %v6114_v4, 1  ;;  %5027 = vmatprep.subr.bf16.mxu1 %v9076_v5 }
 0x1b7   : > { %9127 = vst [vmem:[#allocation84_spill] sm:$0xff] %v9126_v6  ;;  %9128 = vst [vmem:[#allocation85_spill] sm:$0xff] %v6445_v21  ;;  %4363 = vmatmul.mubr.msk.f32.gmra.mrb[10].mxu1 %vm9132_vm11, %v6451_v15  ;;  %v6471_v38 = vsel %vm9133_vm5, %v767_v26, %v768_v7  ;;  %v769_v59 = vrot.slane %v6412_v12, 7  ;;  %v9135_v43 = vshra.s32 %v6324_v2, 4  ;;  %v9136_v9 = vmov 0 }
 0x1b8   : > { %9131 = vst [vmem:[#allocation87_spill] sm:$0xff] %v6461_v28  ;;  %9134 = vst [vmem:[#allocation88_spill] sm:$0xff] %v6471_v38  ;;  %4364 = vmatprep.mubr.msk.f32.mxu1 %vm6360_vm6, %v6471_v38  ;;  %v9139_v19 = vshra.s32 %v6114_v4, 4  ;;  %v9140_v26 = vmov 0  ;;  %vm6490_vm5 = vcmp.ge.s32.totalorder %v718_v41, 1  ;;  %v9143_v15 = vmov 0 }
 0x1b9   : > { %vm6480_vm13 = vcmp.ge.s32.totalorder %v9135_v43, 1  ;;  %v9144_v15 = vsel %vm6490_vm5, 4294967295, %v9143_v15  ;;  %v6496_v0 = vadd.s32 24, %v6114_v4  ;;  %v6499_v43 = vadd.s32 192, %v6114_v4  ;;  %v4717_v38 = vpop.f32.mrb[28].mxu0  ;;  %5029 = vmatpush1.bf16.msra.mxu1 %v5028_v8 }
 0x1ba   : > { %v9137_v9 = vsel %vm6480_vm13, 4294967295, %v9136_v9  ;;  %vm6486_vm11 = vcmp.ge.s32.totalorder %v9139_v19, 1  ;;  %9145 = vst [vmem:[#allocation91_spill] sm:$0xff] %v9144_v15  ;;  %v6502_v2 = vadd.s32 32, %v6114_v4  ;;  %v463_v19 = vadd.f32 %v6097_v49, %v6088_v46  ;;  %v6532_v3 = vpop.f32.mrb[29].mxu0  ;;  %5030 = vmatprep.subr.bf16.mxu1 %v9076_v5 }
 0x1bb   : > { %9138 = vst [vmem:[#allocation89_spill] sm:$0xff] %v9137_v9  ;;  %v9141_v26 = vsel %vm6486_vm11, 4294967295, %v9140_v26  ;;  %9146 = vst [vmem:[#allocation92_spill] sm:$0xff] %v6496_v0  ;;  %v9149_v41 = vshra.s32 %v6371_v36, 4  ;;  %v9150_v30 = vmov 0  ;;  %vm6513_vm6 = vcmp.lt.s32.totalorder %v739_v52, 15 }
 0x1bc   : > { %9142 = vst [vmem:[#allocation90_spill] sm:$0xff] %v9141_v26  ;;  %9147 = vst [vmem:[#allocation93_spill] sm:$0xff] %v6499_v43  ;;  %v9152_v18 = vmov 0  ;;  %v720_v11 = vand.u32 15, %v6410_v29  ;;  %v6525_v36 = vmax.f32 %v568_v63, 0.0  ;;  %vm9156_vm14 = vcmp.lt.s32.totalorder %v6114_v4, 7 }
 0x1bd   : > { %9148 = vst [vmem:[#allocation94_spill] sm:$0xff] %v6502_v2  ;;  %vm6509_vm15 = vcmp.ge.s32.totalorder %v9149_v41, 1  ;;  %v9153_v18 = vsel %vm6513_vm6, 4294967295, %v9152_v18  ;;  %v608_v41 = vadd.f32 %v4717_v38, %v6097_v49  ;;  %v6530_v52 = vsel %vm9156_vm14, %v1183_v24, %v1184_v56  ;;  %v4720_v8 = vpop.f32.mrb[30].mxu0  ;;  %v2564_v9 = vld [vmem:[#allocation8 + $0x2a0] sm:$0xff] }
 0x1be   : > { %v9151_v30 = vsel %vm6509_vm15, 4294967295, %v9150_v30  ;;  %9154 = vst [vmem:[#allocation95_spill] sm:$0xff] %v9153_v18  ;;  %9155 = vst [vmem:[#allocation96_spill] sm:$0xff] %v6525_v36  ;;  %v1185_v32 = vrot.slane %v6344_v22, 1  ;;  %v573_v50 = vadd.f32 %v6097_v49, %v6331_v10  ;;  %4365 = vmatmul.mubr.msk.f32.gmra.mrb[12].mxu1 %vm6366_vm1, %v6530_v52  ;;  %vm9158_vm9 = vcmp.lt.s32.totalorder %v6114_v4, 1 }
 0x1bf   : > { %9157 = vst [vmem:[#allocation97_spill] sm:$0xff] %v6530_v52  ;;  %v6542_v63 = vsel %vm9158_vm9, %v768_v7, %v769_v59  ;;  %v770_v38 = vrot.slane %v6461_v28, 7  ;;  %v741_v24 = vand.u32 15, %v6445_v21  ;;  %v9160_v10 = vshra.s32 %v6407_v39, 4  ;;  %vm9171_vm1 = vmand %vm6378_vm12, %vm6382_vm0 }
 0x1c0   : > { %9159 = vst [vmem:[#allocation98_spill] sm:$0xff] %v6542_v63  ;;  %3015 = vmatprep.mubr.f32.mxu1 %v6542_v63  ;;  %v9161_v46 = vmov 0  ;;  %v742_v52 = vand.u32 15, %v6499_v43  ;;  %v6562_v31 = vmax.f32 %v463_v19, 0.0  ;;  %v6564_v57 = vmax.f32 %v608_v41, 0.0  ;;  %v612_v19 = vpop.f32.mrb[31].mxu0 }
 0x1c1   : > { %vm6553_vm7 = vcmp.ge.s32.totalorder %v9160_v10, 1  ;;  %v1186_v45 = vrot.slane %v6412_v12, 1  ;;  %vm6568_vm9 = vcmp.ge.s32.totalorder %v740_v42, 1  ;;  %v9166_v10 = vmov 0 }
 0x1c2   : > { %v9162_v46 = vsel %vm6553_vm7, 4294967295, %v9161_v46  ;;  %9164 = vst [vmem:[#allocation100_spill] sm:$0xff] %v6562_v31  ;;  %9165 = vst [vmem:[#allocation101_spill] sm:$0xff] %v6564_v57  ;;  %v9167_v10 = vsel %vm6568_vm9, 4294967295, %v9166_v10  ;;  %v578_v22 = vadd.f32 %v6319_v58, %v6097_v49  ;;  %v618_v63 = vadd.f32 %v4720_v8, %v6097_v49 }
 0x1c3   : > { %9163 = vst [vmem:[#allocation99_spill] sm:$0xff] %v9162_v46  ;;  %9168 = vst [vmem:[#allocation102_spill] sm:$0xff] %v9167_v10  ;;  %v6578_v41 = vsel %vm9156_vm14, %v1184_v56, %v1185_v32  ;;  %v771_v12 = vrot.slane %v6525_v36, 7  ;;  %v6581_v60 = vmax.f32 %v573_v50, 0.0  ;;  %v613_v42 = vadd.f32 %v6097_v49, %v612_v19 }
 0x1c4   : > { %9169 = vst [vmem:[#allocation103_spill] sm:$0xff] %v6578_v41  ;;  %4366 = vmatmul.mubr.msk.f32.gmra.mrb[14].mxu1 %vm9171_vm1, %v6578_v41  ;;  %vm9172_vm8 = vcmp.lt.s32.totalorder %v6114_v4, 1  ;;  %v6595_v56 = vadd.s32 200, %v6114_v4  ;;  %v6597_v8 = vmax.f32 %v618_v63, 0.0  ;;  %v9176_v50 = vpack.c.bf16 %v6404_v13, %v6402_v17 }
 0x1c5   : > { %9170 = vst [vmem:[#allocation104_spill] sm:$0xff] %v6581_v60  ;;  %v6592_v58 = vsel %vm9172_vm8, %v769_v59, %v770_v38  ;;  %v9177_v19 = vshra.s32 %v6410_v29, 4  ;;  %v9178_v7 = vmov 0  ;;  %v9181_v59 = vshra.s32 %v6393_v51, 4  ;;  %v2604_v51 = vld [vmem:[#allocation8 + $0x3e0] sm:$0xff] }
 0x1c6   : > { %9173 = vst [vmem:[#allocation105_spill] sm:$0xff] %v6592_v58  ;;  %9174 = vst [vmem:[#allocation106_spill] sm:$0xff] %v6595_v56  ;;  %4367 = vmatprep.mubr.msk.f32.mxu1 %vm6436_vm10, %v6592_v58  ;;  %5032 = vmatpush1.bf16.msra.mxu1 %v9176_v50  ;;  %v9182_v25 = vmov 0  ;;  %vm6617_vm14 = vcmp.ge.s32.totalorder %v720_v11, 1  ;;  %v9184_v63 = vmov 0  ;;  %v722_v41 = vand.u32 15, %v6502_v2 }
 0x1c7   : > { %9175 = vst [vmem:[#allocation107_spill] sm:$0xff] %v6597_v8  ;;  %vm6607_vm1 = vcmp.ge.s32.totalorder %v9177_v19, 1  ;;  %vm6613_vm8 = vcmp.ge.s32.totalorder %v9181_v59, 1  ;;  %v9185_v63 = vsel %vm6617_vm14, 4294967295, %v9184_v63  ;;  %v6623_v13 = vadd.s32 40, %v6114_v4  ;;  %5033 = vmatprep.subr.bf16.mxu1 %v9076_v5 }
 0x1c8   : > { %v9179_v7 = vsel %vm6607_vm1, 4294967295, %v9178_v7  ;;  %v9183_v25 = vsel %vm6613_vm8, 4294967295, %v9182_v25  ;;  %9186 = vst [vmem:[#allocation109_spill] sm:$0xff] %v9185_v63  ;;  %v719_v17 = vand.u32 15, %v6407_v39  ;;  %v6626_v50 = vmax.f32 %v613_v42, 0.0 }
 0x1c9   : > { %9180 = vst [vmem:[#allocation108_spill] sm:$0xff] %v9179_v7  ;;  %9187 = vst [vmem:[#allocation110_spill] sm:$0xff] %v6623_v13  ;;  %vm9189_vm0 = vcmp.lt.s32.totalorder %v6114_v4, 7  ;;  %v9191_v11 = vshra.s32 %v6445_v21, 4  ;;  %vm6640_vm12 = vcmp.lt.s32.totalorder %v741_v24, 15  ;;  %v9194_v29 = vmov 0 }
 0x1ca   : > { %9188 = vst [vmem:[#allocation111_spill] sm:$0xff] %v6626_v50  ;;  %v6630_v19 = vsel %vm9189_vm0, %v1185_v32, %v1186_v45  ;;  %v9195_v29 = vsel %vm6640_vm12, 4294967295, %v9194_v29  ;;  %v6645_v39 = vmax.f32 %v578_v22, 0.0  ;;  %vm9198_vm0 = vcmp.lt.s32.totalorder %v6114_v4, 1  ;;  %4273 = vmatprep.mubr.msk.f32.mxu0 %vm6486_vm11, %v6626_v50 }
 0x1cb   : > { %9190 = vst [vmem:[#allocation112_spill] sm:$0xff] %v6630_v19  ;;  %vm6636_vm10 = vcmp.ge.s32.totalorder %v9191_v11, 1  ;;  %9196 = vst [vmem:[#allocation113_spill] sm:$0xff] %v9195_v29  ;;  %v6649_v32 = vsel %vm9198_vm0, %v770_v38, %v771_v12  ;;  %v1187_v59 = vrot.slane %v6461_v28, 1  ;;  %v1198_v21 = vrot.slane %v6597_v8, 1  ;;  %4368 = vmatmul.mubr.msk.f32.gmra.mrb[16].mxu1 %vm6480_vm13, %v6630_v19 }
 0x1cc   : > { %9197 = vst [vmem:[#allocation114_spill] sm:$0xff] %v6645_v39  ;;  %9199 = vst [vmem:[#allocation115_spill] sm:$0xff] %v6649_v32  ;;  %v583_v11 = vadd.f32 %v6097_v49, %v6400_v16  ;;  %v780_v22 = vrot.slane %v6626_v50, 7  ;;  %v772_v38 = vrot.slane %v6581_v60, 7  ;;  %3025 = vmatprep.mubr.f32.mxu1 %v6649_v32  ;;  %v9200_v16 = vpack.c.bf16 %v6459_v35, %v6457_v14 }
 0x1cd   : > { %v9201_v42 = vshra.s32 %v6496_v0, 4  ;;  %v9202_v19 = vmov 0  ;;  %v743_v24 = vand.u32 15, %v6595_v56  ;;  %v6685_v32 = vadd.s32 208, %v6114_v4 }
 0x1ce   : > { %5035 = vmatpush1.bf16.msra.mxu1 %v9200_v16  ;;  %v9206_v28 = vrot.slane %v6562_v31, 1  ;;  %vm9207_vm0 = vcmp.lt.s32.totalorder %v6114_v4, 7  ;;  %v468_v35 = vadd.f32 %v6086_v44, %v6097_v49  ;;  %v9209_v14 = vrot.slane %v6564_v57, 7 }
 0x1cf   : > { %vm6678_vm4 = vcmp.ge.s32.totalorder %v9201_v42, 1  ;;  %9205 = vst [vmem:[#allocation117_spill] sm:$0xff] %v6685_v32  ;;  %vm9210_vm13 = vcmp.lt.s32.totalorder %v6114_v4, 1  ;;  %v781_v16 = vrot.slane %v6597_v8, 7  ;;  %5036 = vmatprep.subr.bf16.mxu1 %v9076_v5  ;;  %vm6703_vm2 = vcmp.ge.s32.totalorder %v742_v52, 1  ;;  %vm9218_vm3 = vmmov %vm9207_vm0 }
 0x1d0   : > { %v9203_v19 = vsel %vm6678_vm4, 4294967295, %v9202_v19  ;;  %v6691_v6 = vsel %vm9207_vm0, %v1198_v21, %v9206_v28  ;;  %v6699_v42 = vsel %vm9210_vm13, %v9209_v14, %v780_v22  ;;  %v9212_v58 = vmov 0  ;;  %v2565_v28 = vld [vmem:[#allocation8 + $0x2a8] sm:$0xff]  ;;  %vm9217_vm13 = vmand %vm6486_vm11, %vm6490_vm5 }
 0x1d1   : > { %9204 = vst [vmem:[#allocation116_spill] sm:$0xff] %v9203_v19  ;;  %9208 = vst [vmem:[#allocation118_spill] sm:$0xff] %v6691_v6  ;;  %v9213_v58 = vsel %vm6703_vm2, 4294967295, %v9212_v58  ;;  %v9215_v6 = vrot.slane %v6626_v50, 1  ;;  %v588_v14 = vadd.f32 %v6374_v34, %v6097_v49  ;;  %4274 = vmatmul.mubr.msk.f32.vlgmr.msra.gmra.mrb[32].mxu0 %vm9217_vm13, %v6699_v42  ;;  %v6723_v52 = vsel %vm9218_vm3, %v1186_v45, %v1187_v59 }
 0x1d2   : > { %9211 = vst [vmem:[#allocation119_spill] sm:$0xff] %v6699_v42  ;;  %9214 = vst [vmem:[#allocation120_spill] sm:$0xff] %v9213_v58  ;;  %v1188_v61 = vrot.slane %v6525_v36, 1  ;;  %vm6726_vm2 = vcmp.lt.s32.totalorder %v719_v17, 15  ;;  %vm9224_vm13 = vcmp.lt.s32.totalorder %v6114_v4, 1  ;;  %4275 = vmatprep.mubr.msk.f32.mxu0 %vm6553_vm7, %v6597_v8  ;;  %v9228_v17 = vpack.c.bf16 %v6523_v55, %v6521_v20  ;;  %v2566_v55 = vld [vmem:[#allocation8 + $0x2b0] sm:$0xff]  ;;  %4963 = vmatpush1.bf16.msra.mxu0 %v5974_v23 }
 0x1d3   : > { %v6711_v44 = vsel %vm9207_vm0, %v9215_v6, %v1198_v21  ;;  %9219 = vst [vmem:[#allocation122_spill] sm:$0xff] %v6723_v52  ;;  %v6730_v6 = vmax.f32 %v583_v11, 0.0  ;;  %vm9223_vm0 = vmand %vm6509_vm15, %vm6513_vm6  ;;  %v6740_v34 = vsel %vm9224_vm13, %v771_v12, %v772_v38  ;;  %v773_v21 = vrot.slane %v6645_v39, 7  ;;  %4964 = vmatprep.subr.bf16.mxu0 %v9076_v5 }
 0x1d4   : > { %9216 = vst [vmem:[#allocation121_spill] sm:$0xff] %v6711_v44  ;;  %4369 = vmatmul.mubr.msk.f32.gmra.mrb[18].mxu1 %vm9223_vm0, %v6723_v52  ;;  %9225 = vst [vmem:[#allocation124_spill] sm:$0xff] %v6740_v34  ;;  %v9229_v12 = vshra.s32 %v6502_v2, 4  ;;  %v9230_v11 = vmov 0  ;;  %v9233_v8 = vshra.s32 %v6499_v43, 4  ;;  %v5040_v26 = vpack.c.bf16 %v2565_v28, %v2564_v9  ;;  %v2573_v52 = vld [vmem:[#allocation8 + $0x2e8] sm:$0xff] }
 0x1d5   : > { %9222 = vst [vmem:[#allocation123_spill] sm:$0xff] %v6730_v6  ;;  %vm9226_vm3 = vmmov %vm9224_vm13  ;;  %4370 = vmatprep.mubr.msk.f32.mxu1 %vm6568_vm9, %v6740_v34  ;;  %5038 = vmatpush1.bf16.msra.mxu1 %v9228_v17  ;;  %v9236_v44 = vmov 0  ;;  %v6774_v20 = vadd.s32 48, %v6114_v4  ;;  %v6780_v17 = vmax.f32 %v468_v35, 0.0  ;;  %v9241_v9 = vshra.s32 %v6595_v56, 4  ;;  %v2567_v35 = vld [vmem:[#allocation8 + $0x2b8] sm:$0xff] }
 0x1d6   : > { %v6747_v45 = vsel %vm9226_vm3, %v780_v22, %v781_v16  ;;  %vm6758_vm0 = vcmp.ge.s32.totalorder %v9229_v12, 1  ;;  %vm6764_vm13 = vcmp.ge.s32.totalorder %v9233_v8, 1  ;;  %vm6768_vm3 = vcmp.ge.s32.totalorder %v722_v41, 1  ;;  %5039 = vmatprep.subr.bf16.mxu1 %v9076_v5  ;;  %4966 = vmatpush1.bf16.msra.mxu0 %v5977_v27  ;;  %v9502_v22 = vld [vmem:[#allocation79_spill] sm:$0xff]  ;;  %v9509_v41 = vld [vmem:[#allocation97_spill] sm:$0xff] }
 0x1d7   : > { %9227 = vst [vmem:[#allocation125_spill] sm:$0xff] %v6747_v45  ;;  %v9231_v11 = vsel %vm6758_vm0, 4294967295, %v9230_v11  ;;  %v9237_v44 = vsel %vm6768_vm3, 4294967295, %v9236_v44  ;;  %9239 = vst [vmem:[#allocation128_spill] sm:$0xff] %v6774_v20  ;;  %v473_v8 = vadd.f32 %v6097_v49, %v6092_v48  ;;  %vm6787_vm6 = vcmp.ge.s32.totalorder %v9241_v9, 1  ;;  %4276 = vmatmul.mubr.msk.f32.gmra.mrb[34].mxu0 %vm6553_vm7, %v6747_v45  ;;  %4967 = vmatprep.subr.bf16.mxu0 %v9076_v5 }
 0x1d8   : > { %9232 = vst [vmem:[#allocation126_spill] sm:$0xff] %v9231_v11  ;;  %9238 = vst [vmem:[#allocation127_spill] sm:$0xff] %v9237_v44  ;;  %vm6791_vm5 = vcmp.lt.s32.totalorder %v743_v24, 15  ;;  %v9244_v28 = vmov 0  ;;  %v744_v12 = vand.u32 15, %v6685_v32  ;;  %vm9247_vm11 = vcmp.lt.s32.totalorder %v6114_v4, 7  ;;  %4277 = vmatprep.mubr.msk.f32.mxu0 %vm6607_vm1, %v6562_v31 }
 0x1d9   : > { %9240 = vst [vmem:[#allocation129_spill] sm:$0xff] %v6780_v17  ;;  %v9245_v28 = vsel %vm6791_vm5, 4294967295, %v9244_v28  ;;  %v6802_v48 = vsel %vm9247_vm11, %v1187_v59, %v1188_v61  ;;  %v750_v9 = vrot.slane %v6562_v31, 7  ;;  %v1189_v24 = vrot.slane %v6581_v60, 1  ;;  %vm881_vm7 = vmand %vm6607_vm1, %vm6617_vm14  ;;  %5041 = vmatpush1.bf16.msra.mxu1 %v5040_v26 }
 0x1da   : > { %9246 = vst [vmem:[#allocation130_spill] sm:$0xff] %v9245_v28  ;;  %9248 = vst [vmem:[#allocation131_spill] sm:$0xff] %v6802_v48  ;;  %v721_v56 = vand.u32 15, %v6496_v0  ;;  %v6808_v43 = vmax.f32 %v588_v14, 0.0  ;;  %v593_v23 = vadd.f32 %v6097_v49, %v6453_v62  ;;  %4371 = vmatmul.mubr.msk.f32.gmra.mrb[20].mxu1 %vm6613_vm8, %v6802_v48  ;;  %vm9250_vm11 = vcmp.lt.s32.totalorder %v6114_v4, 1  ;;  %5042 = vmatprep.subr.bf16.mxu1 %v9076_v5 }
 0x1db   : > { %v6820_v59 = vsel %vm9250_vm11, %v772_v38, %v773_v21  ;;  %v774_v14 = vrot.slane %v6730_v6, 7  ;;  %v9252_v62 = vshra.s32 %v6623_v13, 4  ;;  %v9253_v38 = vmov 0  ;;  %4969 = vmatpush1.bf16.msra.mxu0 %v5981_v33 }
 0x1dc   : > { %9249 = vst [vmem:[#allocation132_spill] sm:$0xff] %v6808_v43  ;;  %9251 = vst [vmem:[#allocation133_spill] sm:$0xff] %v6820_v59  ;;  %3035 = vmatprep.mubr.f32.mxu1 %v6820_v59  ;;  %v5043_v2 = vpack.c.bf16 %v2567_v35, %v2566_v55  ;;  %v8813_v0 = vshra.s32 %v6774_v20, 4  ;;  %v478_v18 = vadd.f32 %v6090_v47, %v6097_v49  ;;  %v6842_v15 = vmax.f32 %v473_v8, 0.0  ;;  %v2568_v55 = vld [vmem:[#allocation8 + $0x2c0] sm:$0xff]  ;;  %v2569_v35 = vld [vmem:[#allocation8 + $0x2c8] sm:$0xff] }
 0x1dd   : > { %vm6834_vm8 = vcmp.ge.s32.totalorder %v9252_v62, 1  ;;  %v6846_v48 = vsel %vm9250_vm11, %v781_v16, %v750_v9  ;;  %v751_v26 = vrot.slane %v6780_v17, 7  ;;  %vm6849_vm9 = vcmp.ge.s32.totalorder %v744_v12, 1  ;;  %4970 = vmatprep.subr.bf16.mxu0 %v9076_v5 }
 0x1de   : > { %v9254_v38 = vsel %vm6834_vm8, 4294967295, %v9253_v38  ;;  %9256 = vst [vmem:[#allocation135_spill] sm:$0xff] %v6842_v15  ;;  %9257 = vst [vmem:[#allocation136_spill] sm:$0xff] %v6846_v48  ;;  %v9258_v62 = vmov 0  ;;  %4278 = vmatmul.mubr.msk.f32.gmra.mrb[36].mxu0 %vm881_vm7, %v6846_v48  ;;  %vm9261_vm11 = vcmp.lt.s32.totalorder %v6114_v4, 7  ;;  %v1190_v16 = vrot.slane %v6645_v39, 1  ;;  %5044 = vmatpush1.bf16.msra.mxu1 %v5043_v2 }
 0x1df   : > { %9255 = vst [vmem:[#allocation134_spill] sm:$0xff] %v9254_v38  ;;  %v9259_v62 = vsel %vm6849_vm9, 4294967295, %v9258_v62  ;;  %v6863_v47 = vsel %vm9261_vm11, %v1188_v61, %v1189_v24  ;;  %v6867_v8 = vadd.s32 216, %v6114_v4  ;;  %vm6869_vm15 = vcmp.lt.s32.totalorder %v721_v56, 15  ;;  %4279 = vmatprep.mubr.msk.f32.mxu0 %vm6678_vm4, %v6780_v17  ;;  %vm9268_vm7 = vmand %vm6636_vm10, %vm6640_vm12  ;;  %5045 = vmatprep.subr.bf16.mxu1 %v9076_v5 }
 0x1e0   : > { %9260 = vst [vmem:[#allocation137_spill] sm:$0xff] %v9259_v62  ;;  %9262 = vst [vmem:[#allocation138_spill] sm:$0xff] %v6863_v47  ;;  %v9264_v12 = vmov 0  ;;  %v598_v27 = vadd.f32 %v6433_v1, %v6097_v49  ;;  %v6876_v46 = vmax.f32 %v593_v23, 0.0  ;;  %4372 = vmatmul.mubr.msk.f32.gmra.mrb[22].mxu1 %vm9268_vm7, %v6863_v47  ;;  %vm9269_vm11 = vcmp.lt.s32.totalorder %v6114_v4, 1  ;;  %4972 = vmatpush1.bf16.msra.mxu0 %v5985_v37 }
 0x1e1   : > { %9263 = vst [vmem:[#allocation139_spill] sm:$0xff] %v6867_v8  ;;  %v9265_v12 = vsel %vm6869_vm15, 4294967295, %v9264_v12  ;;  %v6889_v61 = vsel %vm9269_vm11, %v773_v21, %v774_v14  ;;  %v775_v56 = vrot.slane %v6808_v43, 7  ;;  %vm9271_vm1 = vnez %v9213_v58  ;;  %vm9281_vm12 = vmmov %vm9269_vm11  ;;  %4973 = vmatprep.subr.bf16.mxu0 %v9076_v5 }
 0x1e2   : > { %9266 = vst [vmem:[#allocation140_spill] sm:$0xff] %v9265_v12  ;;  %9267 = vst [vmem:[#allocation141_spill] sm:$0xff] %v6876_v46  ;;  %4373 = vmatprep.mubr.msk.f32.mxu1 %vm9271_vm1, %v6889_v61  ;;  %vm6897_vm14 = vcmp.ge.s32.totalorder %v8813_v0, 1  ;;  %v9272_v1 = vmov 0  ;;  %v9275_v23 = vshra.s32 %v6685_v32, 4  ;;  %v9276_v7 = vmov 0 }
 0x1e3   : > { %9270 = vst [vmem:[#allocation142_spill] sm:$0xff] %v6889_v61  ;;  %v9273_v1 = vsel %vm6897_vm14, 4294967295, %v9272_v1  ;;  %v724_v21 = vand.u32 15, %v6774_v20  ;;  %v6909_v29 = vadd.s32 56, %v6114_v4  ;;  %v5046_v63 = vpack.c.bf16 %v2569_v35, %v2568_v55  ;;  %v2570_v55 = vld [vmem:[#allocation8 + $0x2d0] sm:$0xff]  ;;  %v2571_v35 = vld [vmem:[#allocation8 + $0x2d8] sm:$0xff] }
 0x1e4   : > { %9274 = vst [vmem:[#allocation143_spill] sm:$0xff] %v9273_v1  ;;  %vm6903_vm7 = vcmp.ge.s32.totalorder %v9275_v23, 1  ;;  %v6912_v2 = vadd.s32 224, %v6114_v4  ;;  %v6918_v0 = vmax.f32 %v478_v18, 0.0  ;;  %v483_v23 = vadd.f32 %v6097_v49, %v6102_v54  ;;  %4975 = vmatpush1.bf16.msra.mxu0 %v5989_v40  ;;  %v9451_v12 = vld [vmem:[#allocation26_spill] sm:$0xff] }
 0x1e5   : > { %v9277_v7 = vsel %vm6903_vm7, 4294967295, %v9276_v7  ;;  %9278 = vst [vmem:[#allocation144_spill] sm:$0xff] %v6909_v29  ;;  %v6924_v32 = vsel %vm9281_vm12, %v750_v9, %v751_v26  ;;  %v752_v20 = vrot.slane %v6842_v15, 7  ;;  %vm9283_vm11 = vcmp.lt.s32.totalorder %v6114_v4, 7  ;;  %5047 = vmatpush1.bf16.msra.mxu1 %v5046_v63  ;;  %4976 = vmatprep.subr.bf16.mxu0 %v9076_v5 }
 0x1e6   : > { %9279 = vst [vmem:[#allocation145_spill] sm:$0xff] %v6912_v2  ;;  %9280 = vst [vmem:[#allocation146_spill] sm:$0xff] %v6918_v0  ;;  %4280 = vmatmul.mubr.msk.f32.gmra.mrb[38].mxu0 %vm6678_vm4, %v6924_v32  ;;  %v6934_v18 = vsel %vm9283_vm11, %v1189_v24, %v1190_v16  ;;  %v1191_v54 = vrot.slane %v6730_v6, 1  ;;  %v723_v47 = vand.u32 15, %v6623_v13  ;;  %v6940_v48 = vmax.f32 %v598_v27, 0.0  ;;  %5048 = vmatprep.subr.bf16.mxu1 %v9076_v5 }
 0x1e7   : > { %9282 = vst [vmem:[#allocation147_spill] sm:$0xff] %v6924_v32  ;;  %9284 = vst [vmem:[#allocation148_spill] sm:$0xff] %v6934_v18  ;;  %v603_v33 = vadd.f32 %v6097_v49, %v6532_v3  ;;  %4281 = vmatprep.mubr.msk.f32.mxu0 %vm6758_vm0, %v6842_v15  ;;  %4374 = vmatmul.mubr.msk.f32.gmra.mrb[24].mxu1 %vm6764_vm13, %v6934_v18  ;;  %v6952_v24 = vsel %vm9281_vm12, %v774_v14, %v775_v56  ;;  %v776_v27 = vrot.slane %v6876_v46, 7  ;;  %v9287_v49 = vmov 0 }
 0x1e8   : > { %9285 = vst [vmem:[#allocation149_spill] sm:$0xff] %v6940_v48  ;;  %9286 = vst [vmem:[#allocation150_spill] sm:$0xff] %v6952_v24  ;;  %3045 = vmatprep.mubr.f32.mxu1 %v6952_v24  ;;  %vm6964_vm1 = vcmp.ge.s32.totalorder %v724_v21, 1  ;;  %v8840_v3 = vshra.s32 %v6909_v29, 4  ;;  %v745_v14 = vand.u32 15, %v6867_v8  ;;  %v5049_v9 = vpack.c.bf16 %v2571_v35, %v2570_v55  ;;  %v2572_v21 = vld [vmem:[#allocation8 + $0x2e0] sm:$0xff] }
 0x1e9   : > { %vm883_vm11 = vmand %vm6758_vm0, %vm6768_vm3  ;;  %v9288_v49 = vsel %vm6964_vm1, 4294967295, %v9287_v49  ;;  %v6970_v13 = vmax.f32 %v483_v23, 0.0  ;;  %v6974_v19 = vsel %vm9281_vm12, %v751_v26, %v752_v20  ;;  %v753_v18 = vrot.slane %v6918_v0, 7 }
 0x1ea   : > { %9289 = vst [vmem:[#allocation151_spill] sm:$0xff] %v9288_v49  ;;  %9291 = vst [vmem:[#allocation153_spill] sm:$0xff] %v6974_v19  ;;  %v746_v32 = vand.u32 15, %v6912_v2  ;;  %4282 = vmatmul.mubr.msk.f32.gmra.mrb[40].mxu0 %vm883_vm11, %v6974_v19  ;;  %vm9292_vm12 = vcmp.lt.s32.totalorder %v6114_v4, 7  ;;  %v1192_v26 = vrot.slane %v6808_v43, 1  ;;  %v9294_v23 = vshra.s32 %v6867_v8, 4  ;;  %5050 = vmatpush1.bf16.msra.mxu1 %v5049_v9 }
 0x1eb   : > { %9290 = vst [vmem:[#allocation152_spill] sm:$0xff] %v6970_v13  ;;  %v6988_v63 = vsel %vm9292_vm12, %v1190_v16, %v1191_v54  ;;  %v9295_v55 = vmov 0  ;;  %v6998_v37 = vadd.s32 64, %v6114_v4  ;;  %v7001_v35 = vmax.f32 %v603_v33, 0.0  ;;  %4283 = vmatprep.mubr.msk.f32.mxu0 %vm6834_vm8, %v6918_v0  ;;  %vm9299_vm11 = vmand %vm6787_vm6, %vm6791_vm5  ;;  %5051 = vmatprep.subr.bf16.mxu1 %v9076_v5  ;;  %v9322_v19 = vld [vmem:[#allocation29_spill] sm:$0xff] }
 0x1ec   : > { %9293 = vst [vmem:[#allocation154_spill] sm:$0xff] %v6988_v63  ;;  %vm6993_vm4 = vcmp.ge.s32.totalorder %v9294_v23, 1  ;;  %4375 = vmatmul.mubr.msk.f32.gmra.mrb[26].mxu1 %vm9299_vm11, %v6988_v63  ;;  %vm9300_vm12 = vcmp.lt.s32.totalorder %v6114_v4, 1  ;;  %v777_v23 = vrot.slane %v6940_v48, 7  ;;  %vm7017_vm0 = vcmp.lt.s32.totalorder %v723_v47, 15 }
 0x1ed   : > { %v9296_v55 = vsel %vm6993_vm4, 4294967295, %v9295_v55  ;;  %9297 = vst [vmem:[#allocation155_spill] sm:$0xff] %v6998_v37  ;;  %9298 = vst [vmem:[#allocation156_spill] sm:$0xff] %v7001_v35  ;;  %v7014_v16 = vsel %vm9300_vm12, %v775_v56, %v776_v27  ;;  %vm7026_vm3 = vcmp.ge.s32.totalorder %v8840_v3, 1  ;;  %v9304_v8 = vmov 0 }
 0x1ee   : > { %9301 = vst [vmem:[#allocation157_spill] sm:$0xff] %v7014_v16  ;;  %4376 = vmatprep.mubr.msk.f32.mxu1 %vm6849_vm9, %v7014_v16  ;;  %v9305_v8 = vsel %vm7026_vm3, 4294967295, %v9304_v8  ;;  %vm7030_vm11 = vcmp.lt.s32.totalorder %v745_v14, 15  ;;  %v9307_v11 = vmov 0  ;;  %v7035_v47 = vadd.s32 232, %v6114_v4  ;;  %vm9312_vm5 = vmmov %vm9300_vm12 }
 0x1ef   : > { %9306 = vst [vmem:[#allocation158_spill] sm:$0xff] %v9305_v8  ;;  %v9308_v11 = vsel %vm7030_vm11, 4294967295, %v9307_v11  ;;  %v5052_v56 = vpack.c.bf16 %v2573_v52, %v2572_v21  ;;  %v7042_v28 = vmax.f32 %v6100_v53, 0.0  ;;  %v7046_v3 = vsel %vm9312_vm5, %v752_v20, %v753_v18  ;;  %v2574_v52 = vld [vmem:[#allocation8 + $0x2f0] sm:$0xff]  ;;  %v2575_v21 = vld [vmem:[#allocation8 + $0x2f8] sm:$0xff] }
 0x1f0   : > { %9309 = vst [vmem:[#allocation159_spill] sm:$0xff] %v9308_v11  ;;  %9310 = vst [vmem:[#allocation160_spill] sm:$0xff] %v7035_v47  ;;  %v754_v14 = vrot.slane %v6970_v13, 7  ;;  %vm7049_vm9 = vcmp.ge.s32.totalorder %v746_v32, 1  ;;  %v9314_v9 = vmov 0  ;;  %4284 = vmatmul.mubr.msk.f32.gmra.mrb[42].mxu0 %vm6834_vm8, %v7046_v3  ;;  %vm9317_vm12 = vcmp.lt.s32.totalorder %v6114_v4, 7 }
 0x1f1   : > { %9311 = vst [vmem:[#allocation161_spill] sm:$0xff] %v7042_v28  ;;  %9313 = vst [vmem:[#allocation162_spill] sm:$0xff] %v7046_v3  ;;  %v9315_v9 = vsel %vm7049_vm9, 4294967295, %v9314_v9  ;;  %v7060_v53 = vsel %vm9317_vm12, %v1191_v54, %v1192_v26  ;;  %v1193_v20 = vrot.slane %v6876_v46, 1  ;;  %v7065_v44 = vadd.s32 72, %v6114_v4  ;;  %4285 = vmatprep.mubr.msk.f32.mxu0 %vm6897_vm14, %v6970_v13  ;;  %5053 = vmatpush1.bf16.msra.mxu1 %v5052_v56 }
 0x1f2   : > { %9316 = vst [vmem:[#allocation163_spill] sm:$0xff] %v9315_v9  ;;  %9318 = vst [vmem:[#allocation164_spill] sm:$0xff] %v7060_v53  ;;  %4377 = vmatmul.mubr.msk.f32.gmra.mrb[28].mxu1 %vm6903_vm7, %v7060_v53  ;;  %v7076_v40 = vsel %vm9312_vm5, %v776_v27, %v777_v23  ;;  %v778_v54 = vrot.slane %v7001_v35, 7  ;;  %v7084_v32 = vadd.s32 240, %v6114_v4  ;;  %v725_v38 = vand.u32 15, %v6909_v29  ;;  %5054 = vmatprep.subr.bf16.mxu1 %v9076_v5  ;;  %v9326_v27 = vld [vmem:[#allocation17_spill] sm:$0xff] }
 0x1f3   : > { %9319 = vst [vmem:[#allocation165_spill] sm:$0xff] %v7065_v44  ;;  %9320 = vst [vmem:[#allocation166_spill] sm:$0xff] %v7076_v40  ;;  %3055 = vmatprep.mubr.f32.mxu1 %v7076_v40  ;;  %v726_v53 = vand.u32 15, %v6998_v37  ;;  %v5055_v63 = vpack.c.bf16 %v2575_v21, %v2574_v52  ;;  %v7096_v16 = vmax.f32 %v9322_v19, 0.0  ;;  %v755_v40 = vrot.slane %v7042_v28, 7  ;;  %4978 = vmatpush1.bf16.msra.mxu0 %v9326_v27  ;;  %v9621_v50 = vld [vmem:[#allocation152_spill] sm:$0xff] }
 0x1f4   : > { %9321 = vst [vmem:[#allocation167_spill] sm:$0xff] %v7084_v32  ;;  %vm9324_vm12 = vmmov %vm9312_vm5  ;;  %v747_v46 = vand.u32 15, %v7035_v47  ;;  %vm9328_vm8 = vcmp.lt.s32.totalorder %v6114_v4, 7  ;;  %v9331_v56 = vmov 0  ;;  %v1194_v52 = vrot.slane %v6940_v48, 1  ;;  %4979 = vmatprep.subr.bf16.mxu0 %v9076_v5 }
 0x1f5   : > { %9323 = vst [vmem:[#allocation29_spill] sm:$0xff] %v7096_v16  ;;  %v7100_v29 = vsel %vm9324_vm12, %v753_v18, %v754_v14  ;;  %vm9327_vm5 = vmand %vm6897_vm14, %vm6964_vm1  ;;  %v7114_v19 = vsel %vm9328_vm8, %v1192_v26, %v1193_v20  ;;  %v9330_v18 = vshra.s32 %v6998_v37, 4  ;;  %v748_v27 = vand.u32 15, %v7084_v32  ;;  %5056 = vmatpush1.bf16.msra.mxu1 %v5055_v63  ;;  %v9357_v63 = vld [vmem:[#allocation18_spill] sm:$0xff] }
 0x1f6   : > { %9325 = vst [vmem:[#allocation168_spill] sm:$0xff] %v7100_v29  ;;  %4286 = vmatmul.mubr.msk.f32.gmra.mrb[44].mxu0 %vm9327_vm5, %v7100_v29  ;;  %9329 = vst [vmem:[#allocation17_spill] sm:$0xff] %v7114_v19  ;;  %vm9335_vm5 = vcmp.lt.s32.totalorder %v6114_v4, 1  ;;  %vm7142_vm14 = vcmp.lt.s32.totalorder %v725_v38, 15  ;;  %v9340_v3 = vshra.s32 %v6912_v2, 4  ;;  %v9341_v37 = vmov 0  ;;  %5057 = vmatprep.subr.bf16.mxu1 %v9076_v5 }
 0x1f7   : > { %vm7118_vm12 = vcmp.ge.s32.totalorder %v9330_v18, 1  ;;  %4287 = vmatprep.mubr.msk.f32.mxu0 %vm7026_vm3, %v7042_v28  ;;  %vm9334_vm8 = vmand %vm6993_vm4, %vm7030_vm11  ;;  %v7136_v26 = vsel %vm9335_vm5, %v777_v23, %v778_v54  ;;  %v7140_v18 = vadd.s32 80, %v6114_v4  ;;  %vm7155_vm5 = vcmp.ge.s32.totalorder %v726_v53, 1  ;;  %4981 = vmatpush1.bf16.msra.mxu0 %v9357_v63  ;;  %v9437_v29 = vld [vmem:[#allocation39_spill] sm:$0xff] }
 0x1f8   : > { %v9332_v56 = vsel %vm7118_vm12, 4294967295, %v9331_v56  ;;  %4378 = vmatmul.mubr.msk.f32.gmra.mrb[30].mxu1 %vm9334_vm8, %v7114_v19  ;;  %9336 = vst [vmem:[#allocation170_spill] sm:$0xff] %v7136_v26  ;;  %vm7151_vm8 = vcmp.ge.s32.totalorder %v9340_v3, 1  ;;  %v9343_v23 = vmov 0  ;;  %v9346_v1 = vshra.s32 %v7035_v47, 4  ;;  %v9350_v3 = vld [vmem:[#allocation28_spill] sm:$0xff]  ;;  %4982 = vmatprep.subr.bf16.mxu0 %v9076_v5 }
 0x1f9   : > { %9333 = vst [vmem:[#allocation169_spill] sm:$0xff] %v9332_v56  ;;  %9337 = vst [vmem:[#allocation171_spill] sm:$0xff] %v7140_v18  ;;  %4379 = vmatprep.mubr.msk.f32.mxu1 %vm7049_vm9, %v7136_v26  ;;  %v9342_v37 = vsel %vm7151_vm8, 4294967295, %v9341_v37  ;;  %v9344_v23 = vsel %vm7155_vm5, 4294967295, %v9343_v23  ;;  %v9347_v38 = vmov 0  ;;  %v7166_v11 = vadd.s32 248, %v6114_v4 }
 0x1fa   : > { %9345 = vst [vmem:[#allocation172_spill] sm:$0xff] %v9344_v23  ;;  %vm7161_vm11 = vcmp.ge.s32.totalorder %v9346_v1, 1  ;;  %v7173_v53 = vmax.f32 %v9350_v3, 0.0  ;;  %vm9352_vm9 = vcmp.lt.s32.totalorder %v6114_v4, 1  ;;  %v756_v1 = vrot.slane %v7096_v16, 7  ;;  %v9371_v23 = vld [vmem:[#allocation30_spill] sm:$0xff] }
 0x1fb   : > { %v9348_v38 = vsel %vm7161_vm11, 4294967295, %v9347_v38  ;;  %9349 = vst [vmem:[#allocation173_spill] sm:$0xff] %v7166_v11  ;;  %v7177_v2 = vsel %vm9352_vm9, %v754_v14, %v755_v40  ;;  %vm7180_vm4 = vcmp.lt.s32.totalorder %v747_v46, 15  ;;  %v9354_v47 = vmov 0  ;;  %v9375_v19 = vld [vmem:[#allocation19_spill] sm:$0xff] }
 0x1fc   : > { %9351 = vst [vmem:[#allocation28_spill] sm:$0xff] %v7173_v53  ;;  %9353 = vst [vmem:[#allocation174_spill] sm:$0xff] %v7177_v2  ;;  %v9355_v47 = vsel %vm7180_vm4, 4294967295, %v9354_v47  ;;  %4288 = vmatmul.mubr.msk.f32.gmra.mrb[46].mxu0 %vm7026_vm3, %v7177_v2  ;;  %vm9358_vm1 = vcmp.lt.s32.totalorder %v6114_v4, 7  ;;  %v9360_v14 = vshra.s32 %v7065_v44, 4  ;;  %v9361_v49 = vmov 0 }
 0x1fd   : > { %9356 = vst [vmem:[#allocation175_spill] sm:$0xff] %v9355_v47  ;;  %v7191_v3 = vsel %vm9358_vm1, %v1193_v20, %v1194_v52  ;;  %v1195_v46 = vrot.slane %v7001_v35, 1  ;;  %4289 = vmatprep.mubr.msk.f32.mxu0 %vm7118_vm12, %v7096_v16  ;;  %v9364_v20 = vrot.slane %v6564_v57, 7  ;;  %vm9365_vm1 = vcmp.lt.s32.totalorder %v6114_v4, 1  ;;  %vm887_vm3 = vmand %vm7118_vm12, %vm7155_vm5  ;;  %4984 = vmatpush1.bf16.msra.mxu0 %v9375_v19  ;;  %v9639_v33 = vld [vmem:[#allocation29_spill] sm:$0xff] }
 0x1fe   : > { %9359 = vst [vmem:[#allocation18_spill] sm:$0xff] %v7191_v3  ;;  %vm7195_vm9 = vcmp.ge.s32.totalorder %v9360_v14, 1  ;;  %4380 = vmatmul.mubr.msk.f32.gmra.mrb[32].mxu1 %vm7151_vm8, %v7191_v3  ;;  %vm7217_vm7 = vcmp.ge.s32.totalorder %v748_v27, 1  ;;  %v9367_v14 = vmov 0  ;;  %v727_v2 = vand.u32 15, %v7065_v44  ;;  %4985 = vmatprep.subr.bf16.mxu0 %v9076_v5 }
 0x1ff   : > { %v9362_v49 = vsel %vm7195_vm9, 4294967295, %v9361_v49  ;;  %v7211_v63 = vsel %vm9365_vm1, %v778_v54, %v9364_v20  ;;  %v9368_v14 = vsel %vm7217_vm7, 4294967295, %v9367_v14  ;;  %vm1293_vm1 = vmand %vm7161_vm11, %vm7180_vm4  ;;  %v728_v20 = vand.u32 15, %v7140_v18 }
 0x200   : > { %9363 = vst [vmem:[#allocation176_spill] sm:$0xff] %v9362_v49  ;;  %9366 = vst [vmem:[#allocation177_spill] sm:$0xff] %v7211_v63  ;;  %3065 = vmatprep.mubr.f32.mxu1 %v7211_v63  ;;  %v7231_v27 = vadd.s32 88, %v6114_v4  ;;  %v7235_v8 = vmax.f32 %v9371_v23, 0.0  ;;  %vm9373_vm12 = vcmp.lt.s32.totalorder %v6114_v4, 1  ;;  %v757_v47 = vrot.slane %v7173_v53, 7 }
 0x201   : > { %9369 = vst [vmem:[#allocation178_spill] sm:$0xff] %v9368_v14  ;;  %v7239_v44 = vsel %vm9373_vm12, %v755_v40, %v756_v1  ;;  %v749_v3 = vand.u32 15, %v7166_v11  ;;  %vm9376_vm4 = vcmp.lt.s32.totalorder %v6114_v4, 7  ;;  %v1196_v56 = vrot.slane %v6564_v57, 1  ;;  %v9408_v49 = vld [vmem:[#allocation21_spill] sm:$0xff] }
 0x202   : > { %9370 = vst [vmem:[#allocation179_spill] sm:$0xff] %v7231_v27  ;;  %9372 = vst [vmem:[#allocation30_spill] sm:$0xff] %v7235_v8  ;;  %4290 = vmatmul.mubr.msk.f32.gmra.mrb[48].mxu0 %vm887_vm3, %v7239_v44  ;;  %v7247_v54 = vsel %vm9376_vm4, %v1194_v52, %v1195_v46  ;;  %vm7255_vm12 = vcmp.lt.s32.totalorder %v727_v2, 15  ;;  %v9380_v19 = vshra.s32 %v7140_v18, 4  ;;  %v9381_v52 = vmov 0  ;;  %v9407_v18 = vld [vmem:[#allocation32_spill] sm:$0xff] }
 0x203   : > { %9374 = vst [vmem:[#allocation180_spill] sm:$0xff] %v7239_v44  ;;  %9377 = vst [vmem:[#allocation19_spill] sm:$0xff] %v7247_v54  ;;  %4291 = vmatprep.mubr.msk.f32.mxu0 %vm7195_vm9, %v7173_v53  ;;  %4381 = vmatmul.mubr.msk.f32.gmra.mrb[34].mxu1 %vm1293_vm1, %v7247_v54  ;;  %v9384_v23 = vshra.s32 %v7084_v32, 4  ;;  %v9385_v44 = vmov 0  ;;  %vm7274_vm1 = vcmp.ge.s32.totalorder %v728_v20, 1  ;;  %v9387_v2 = vmov 0 }
 0x204   : > { %4382 = vmatprep.mubr.msk.f32.mxu1 %vm7217_vm7, %v6699_v42  ;;  %vm7264_vm4 = vcmp.ge.s32.totalorder %v9380_v19, 1  ;;  %v9388_v2 = vsel %vm7274_vm1, 4294967295, %v9387_v2  ;;  %vm9390_vm7 = vcmp.lt.s32.totalorder %v6114_v4, 1  ;;  %v9392_v42 = vshra.s32 %v7166_v11, 4  ;;  %v9398_v54 = vld [vmem:[#allocation20_spill] sm:$0xff]  ;;  %v2613_v20 = vld [vmem:[#allocation8 + $0x428] sm:$0xff] }
 0x205   : > { %v9382_v52 = vsel %vm7264_vm4, 4294967295, %v9381_v52  ;;  %vm7270_vm3 = vcmp.ge.s32.totalorder %v9384_v23, 1  ;;  %9389 = vst [vmem:[#allocation182_spill] sm:$0xff] %v9388_v2  ;;  %v7285_v19 = vsel %vm9390_vm7, %v756_v1, %v757_v47  ;;  %v758_v23 = vrot.slane %v7235_v8, 7  ;;  %4987 = vmatpush1.bf16.msra.mxu0 %v9398_v54  ;;  %vm889_vm5 = vmand %vm7264_vm4, %vm7274_vm1  ;;  %v2577_v2 = vld [vmem:[#allocation8 + $0x308] sm:$0xff] }
 0x206   : > { %9383 = vst [vmem:[#allocation181_spill] sm:$0xff] %v9382_v52  ;;  %v9386_v44 = vsel %vm7270_vm3, 4294967295, %v9385_v44  ;;  %9391 = vst [vmem:[#allocation183_spill] sm:$0xff] %v7285_v19  ;;  %vm7290_vm11 = vcmp.ge.s32.totalorder %v9392_v42, 1  ;;  %vm7294_vm8 = vcmp.lt.s32.totalorder %v749_v3, 15  ;;  %v9395_v32 = vmov 0  ;;  %4292 = vmatmul.mubr.msk.f32.gmra.mrb[50].mxu0 %vm7195_vm9, %v7285_v19  ;;  %4988 = vmatprep.subr.bf16.mxu0 %v9076_v5 }
 0x207   : > { %v9396_v32 = vsel %vm7294_vm8, 4294967295, %v9395_v32  ;;  %vm9399_vm7 = vcmp.lt.s32.totalorder %v6114_v4, 7  ;;  %4293 = vmatprep.mubr.msk.f32.mxu0 %vm7264_vm4, %v7235_v8  ;;  %v1168_v42 = vrot.slane %v6780_v17, 1  ;;  %v9401_v3 = vshra.s32 %v7231_v27, 4  ;;  %vm1295_vm9 = vmand %vm7290_vm11, %vm7294_vm8  ;;  %v9420_v19 = vld [vmem:[#allocation22_spill] sm:$0xff] }
 0x208   : > { %9397 = vst [vmem:[#allocation184_spill] sm:$0xff] %v9396_v32  ;;  %v7304_v1 = vsel %vm9399_vm7, %v1195_v46, %v1196_v56  ;;  %v9402_v46 = vmov 0  ;;  %v729_v54 = vand.u32 15, %v7231_v27  ;;  %v759_v52 = vrot.slane %v9407_v18, 7 }
 0x209   : > { %9400 = vst [vmem:[#allocation20_spill] sm:$0xff] %v7304_v1  ;;  %4383 = vmatmul.mubr.msk.f32.gmra.mrb[36].mxu1 %vm7270_vm3, %v7304_v1  ;;  %vm7321_vm7 = vcmp.ge.s32.totalorder %v9401_v3, 1  ;;  %vm9405_vm3 = vcmp.lt.s32.totalorder %v6114_v4, 1  ;;  %4990 = vmatpush1.bf16.msra.mxu0 %v9408_v49  ;;  %v9409_v3 = vld [vmem:[#allocation111_spill] sm:$0xff]  ;;  %vm9411_vm4 = vcmp.lt.s32.totalorder %v6114_v4, 7  ;;  %v1169_v27 = vrot.slane %v6842_v15, 1 }
 0x20a   : > { %3075 = vmatprep.mubr.f32.mxu1 %v6747_v45  ;;  %v9403_v46 = vsel %vm7321_vm7, 4294967295, %v9402_v46  ;;  %v7332_v11 = vsel %vm9405_vm3, %v757_v47, %v758_v23  ;;  %v2576_v45 = vld [vmem:[#allocation8 + $0x300] sm:$0xff]  ;;  %v9410_v1 = vrot.slane %v9409_v3, 1  ;;  %4991 = vmatprep.subr.bf16.mxu0 %v9076_v5  ;;  %v9413_v47 = vrot.slane %v6562_v31, 1  ;;  %vm9414_vm3 = vmmov %vm9411_vm4  ;;  %v9657_v40 = vld [vmem:[#allocation30_spill] sm:$0xff] }
 0x20b   : > { %9404 = vst [vmem:[#allocation185_spill] sm:$0xff] %v9403_v46  ;;  %9406 = vst [vmem:[#allocation186_spill] sm:$0xff] %v7332_v11  ;;  %4294 = vmatmul.mubr.msk.f32.gmra.mrb[52].mxu0 %vm889_vm5, %v7332_v11  ;;  %vm7356_vm5 = vcmp.lt.s32.totalorder %v729_v54, 15  ;;  %v2579_v11 = vld [vmem:[#allocation8 + $0x318] sm:$0xff]  ;;  %v1170_v54 = vrot.slane %v6918_v0, 1 }
 0x20c   : > { %v7341_v32 = vsel %vm9411_vm4, %v1196_v56, %v9410_v1  ;;  %4295 = vmatprep.mubr.msk.f32.mxu0 %vm7321_vm7, %v9407_v18  ;;  %v7352_v49 = vsel %vm9414_vm3, %v9413_v47, %v1168_v42  ;;  %v5058_v56 = vpack.c.bf16 %v2577_v2, %v2576_v45  ;;  %vm9418_vm4 = vcmp.lt.s32.totalorder %v6114_v4, 1  ;;  %v9421_v45 = vld [vmem:[#allocation35_spill] sm:$0xff]  ;;  %v9422_v2 = vld [vmem:[#allocation41_spill] sm:$0xff] }
 0x20d   : > { %9412 = vst [vmem:[#allocation32_spill] sm:$0xff] %v7341_v32  ;;  %4384 = vmatmul.mubr.msk.f32.gmra.mrb[38].mxu1 %vm1295_vm9, %v7341_v32  ;;  %9415 = vst [vmem:[#allocation21_spill] sm:$0xff] %v7352_v49  ;;  %v7362_v3 = vsel %vm9418_vm4, %v758_v23, %v759_v52  ;;  %v2578_v32 = vld [vmem:[#allocation8 + $0x310] sm:$0xff]  ;;  %4993 = vmatpush1.bf16.msra.mxu0 %v9420_v19  ;;  %vm9423_vm3 = vnez %v9422_v2  ;;  %vm9424_vm4 = vcmp.lt.s32.totalorder %v6114_v4, 7  ;;  %v9426_v23 = vld [vmem:[#allocation40_spill] sm:$0xff]  ;;  %v9428_v46 = vrot.slane %v9421_v45, 7 }
 0x20e   : > { %3145 = vmatprep.mubr.f32.mxu1 %v7352_v49  ;;  %9419 = vst [vmem:[#allocation187_spill] sm:$0xff] %v7362_v3  ;;  %4994 = vmatprep.subr.bf16.mxu0 %v9076_v5  ;;  %v7379_v19 = vsel %vm9424_vm4, %v1168_v42, %v1169_v27  ;;  %vm9427_vm8 = vnez %v9426_v23  ;;  %v5061_v47 = vpack.c.bf16 %v2579_v11, %v2578_v32  ;;  %v2580_v42 = vld [vmem:[#allocation8 + $0x320] sm:$0xff]  ;;  %v2581_v23 = vld [vmem:[#allocation8 + $0x328] sm:$0xff]  ;;  %v9431_v2 = vld [vmem:[#allocation23_spill] sm:$0xff]  ;;  %v1171_v32 = vrot.slane %v6970_v13, 1 }
 0x20f   : > { %4296 = vmatmul.mubr.msk.f32.gmra.mrb[54].mxu0 %vm7321_vm7, %v7362_v3  ;;  %9425 = vst [vmem:[#allocation22_spill] sm:$0xff] %v7379_v19  ;;  %vm891_vm9 = vmand %vm9423_vm3, %vm9427_vm8  ;;  %vm9429_vm7 = vcmp.lt.s32.totalorder %v6114_v4, 1  ;;  %v9433_v3 = vld [vmem:[#allocation43_spill] sm:$0xff]  ;;  %v7405_v11 = vsel %vm9424_vm4, %v1169_v27, %v1170_v54  ;;  %v9438_v27 = vld [vmem:[#allocation37_spill] sm:$0xff] }
 0x210   : > { %4297 = vmatprep.mubr.msk.f32.mxu0 %vm9423_vm3, %v9421_v45  ;;  %vm9434_vm3 = vnez %v9433_v3  ;;  %9435 = vst [vmem:[#allocation41_spill] sm:$0xff] %v7405_v11  ;;  %v9454_v49 = vld [vmem:[#allocation66_spill] sm:$0xff] }
 0x211   : > { %3146 = vmatmul.mubr.f32.vlgmr.msra.gmra.mrb[40].mxu1 %v6562_v31  ;;  %v7393_v31 = vsel %vm9429_vm7, %v759_v52, %v9428_v46  ;;  %4996 = vmatpush1.bf16.msra.mxu0 %v9431_v2  ;;  %v5064_v52 = vpack.c.bf16 %v2581_v23, %v2580_v42  ;;  %v2582_v46 = vld [vmem:[#allocation8 + $0x330] sm:$0xff]  ;;  %v2583_v2 = vld [vmem:[#allocation8 + $0x338] sm:$0xff]  ;;  %v2584_v42 = vld [vmem:[#allocation8 + $0x340] sm:$0xff] }
 0x212   : > { %5059 = vmatpush1.bf16.msra.mxu1 %v5058_v56  ;;  %4385 = vmatprep.mubr.msk.f32.mxu1 %vm6726_vm2, %v7379_v19  ;;  %9430 = vst [vmem:[#allocation35_spill] sm:$0xff] %v7393_v31  ;;  %v9432_v56 = vld [vmem:[#allocation33_spill] sm:$0xff]  ;;  %v5067_v3 = vpack.c.bf16 %v2583_v2, %v2582_v46  ;;  %v1173_v46 = vrot.slane %v7096_v16, 1  ;;  %v9452_v19 = vld [vmem:[#allocation51_spill] sm:$0xff] }
 0x213   : > { %5060 = vmatprep.subr.bf16.mxu1 %v9076_v5  ;;  %4298 = vmatmul.mubr.msk.f32.gmra.mrb[56].mxu0 %vm891_vm9, %v7393_v31  ;;  %v9436_v31 = vld [vmem:[#allocation24_spill] sm:$0xff]  ;;  %vm9441_vm9 = vmmov %vm9424_vm4  ;;  %v2608_v2 = vld [vmem:[#allocation8 + $0x400] sm:$0xff] }
 0x214   : > { %4997 = vmatprep.subr.bf16.mxu0 %v9076_v5  ;;  %4299 = vmatprep.mubr.msk.f32.mxu0 %vm9434_vm3, %v9432_v56  ;;  %v7421_v23 = vsel %vm9441_vm9, %v1170_v54, %v1171_v32  ;;  %v9446_v54 = vld [vmem:[#allocation47_spill] sm:$0xff] }
 0x215   : > { %3151 = vmatmul.mubr.f32.gmra.mrb[42].mxu1 %v6780_v17  ;;  %4999 = vmatpush1.bf16.msra.mxu0 %v9436_v31  ;;  %v9439_v17 = vld [vmem:[#allocation54_spill] sm:$0xff]  ;;  %9442 = vst [vmem:[#allocation23_spill] sm:$0xff] %v7421_v23  ;;  %v1172_v31 = vrot.slane %v7042_v28, 1 }
 0x216   : > { %3155 = vmatprep.mubr.f32.mxu1 %v7405_v11  ;;  %5062 = vmatpush1.bf16.msra.mxu1 %v5061_v47  ;;  %vm9440_vm7 = vnez %v9439_v17  ;;  %v9443_v47 = vld [vmem:[#allocation52_spill] sm:$0xff] }
 0x217   : > { %5063 = vmatprep.subr.bf16.mxu1 %v9076_v5  ;;  %4300 = vmatmul.mubr.msk.f32.gmra.mrb[58].mxu0 %vm9434_vm3, %v9437_v29  ;;  %vm9444_vm4 = vnez %v9443_v47  ;;  %v9445_v29 = vld [vmem:[#allocation25_spill] sm:$0xff]  ;;  %v9447_v17 = vld [vmem:[#allocation36_spill] sm:$0xff]  ;;  %v9448_v47 = vld [vmem:[#allocation58_spill] sm:$0xff] }
 0x218   : > { %5000 = vmatprep.subr.bf16.mxu0 %v9076_v5  ;;  %4301 = vmatprep.mubr.msk.f32.mxu0 %vm9440_vm7, %v9438_v27  ;;  %vm893_vm8 = vmand %vm9440_vm7, %vm9444_vm4  ;;  %vm9449_vm3 = vnez %v9448_v47  ;;  %v2587_v11 = vld [vmem:[#allocation8 + $0x358] sm:$0xff]  ;;  %v2588_v47 = vld [vmem:[#allocation8 + $0x360] sm:$0xff] }
 0x219   : > { %3156 = vmatmul.mubr.f32.gmra.mrb[44].mxu1 %v6842_v15  ;;  %v2585_v15 = vld [vmem:[#allocation8 + $0x348] sm:$0xff]  ;;  %5002 = vmatpush1.bf16.msra.mxu0 %v9445_v29  ;;  %vm9450_vm7 = vmmov %vm9441_vm9 }
 0x21a   : > { %4386 = vmatprep.mubr.msk.f32.mxu1 %vm6869_vm15, %v7421_v23  ;;  %5065 = vmatpush1.bf16.msra.mxu1 %v5064_v52  ;;  %v7441_v52 = vsel %vm9450_vm7, %v1171_v32, %v1172_v31  ;;  %v2609_v23 = vld [vmem:[#allocation8 + $0x408] sm:$0xff]  ;;  %v5070_v29 = vpack.c.bf16 %v2585_v15, %v2584_v42  ;;  %vm9456_vm9 = vmmov %vm9450_vm7 }
 0x21b   : > { %5066 = vmatprep.subr.bf16.mxu1 %v9076_v5  ;;  %4302 = vmatmul.mubr.msk.f32.gmra.mrb[60].mxu0 %vm893_vm8, %v9446_v54  ;;  %v2586_v54 = vld [vmem:[#allocation8 + $0x350] sm:$0xff]  ;;  %v7451_v32 = vpack.c.bf16 %v2609_v23, %v2608_v2  ;;  %vm9455_vm8 = vnez %v9454_v49  ;;  %v7459_v15 = vsel %vm9456_vm9, %v1172_v31, %v1173_v46  ;;  %v2589_v42 = vld [vmem:[#allocation8 + $0x368] sm:$0xff]  ;;  %v9460_v31 = vld [vmem:[#allocation57_spill] sm:$0xff] }
 0x21c   : > { %5003 = vmatprep.subr.bf16.mxu0 %v9076_v5  ;;  %4303 = vmatprep.mubr.msk.f32.mxu0 %vm9449_vm3, %v9447_v17  ;;  %v5073_v23 = vpack.c.bf16 %v2587_v11, %v2586_v54  ;;  %v9459_v2 = vld [vmem:[#allocation27_spill] sm:$0xff]  ;;  %v9461_v49 = vld [vmem:[#allocation50_spill] sm:$0xff]  ;;  %v1175_v11 = vrot.slane %v7235_v8, 1  ;;  %v5076_v54 = vpack.c.bf16 %v2589_v42, %v2588_v47  ;;  %v2592_v47 = vld [vmem:[#allocation8 + $0x380] sm:$0xff] }
 0x21d   : > { %3161 = vmatmul.mubr.f32.gmra.mrb[46].mxu1 %v6918_v0  ;;  %5005 = vmatpush1.bf16.msra.mxu0 %v9451_v12  ;;  %v9453_v0 = vld [vmem:[#allocation46_spill] sm:$0xff]  ;;  %v1174_v12 = vrot.slane %v7173_v53, 1 }
 0x21e   : > { %3165 = vmatprep.mubr.f32.mxu1 %v7441_v52  ;;  %5068 = vmatpush1.bf16.msra.mxu1 %v5067_v3  ;;  %v9457_v3 = vld [vmem:[#allocation61_spill] sm:$0xff]  ;;  %v2593_v42 = vld [vmem:[#allocation8 + $0x388] sm:$0xff] }
 0x21f   : > { %5069 = vmatprep.subr.bf16.mxu1 %v9076_v5  ;;  %4304 = vmatmul.mubr.msk.f32.gmra.mrb[62].mxu0 %vm9449_vm3, %v9452_v19  ;;  %vm9458_vm7 = vnez %v9457_v3  ;;  %v9462_v3 = vld [vmem:[#allocation69_spill] sm:$0xff] }
 0x220   : > { %5006 = vmatprep.subr.bf16.mxu0 %v9076_v5  ;;  %4305 = vmatprep.mubr.msk.f32.mxu0 %vm9455_vm8, %v9453_v0  ;;  %vm895_vm4 = vmand %vm9455_vm8, %vm9458_vm7  ;;  %vm9463_vm3 = vnez %v9462_v3  ;;  %v9465_v19 = vld [vmem:[#allocation65_spill] sm:$0xff] }
 0x221   : > { %3166 = vmatmul.mubr.f32.gmra.mrb[48].mxu1 %v6970_v13  ;;  %5008 = vmatpush1.bf16.msra.mxu0 %v9459_v2  ;;  %vm9464_vm8 = vmmov %vm9456_vm9  ;;  %v2590_v2 = vld [vmem:[#allocation8 + $0x370] sm:$0xff]  ;;  %v9466_v13 = vld [vmem:[#allocation56_spill] sm:$0xff] }
 0x222   : > { %4387 = vmatprep.mubr.msk.f32.mxu1 %vm7017_vm0, %v7459_v15  ;;  %5071 = vmatpush1.bf16.msra.mxu1 %v5070_v29  ;;  %v7479_v29 = vsel %vm9464_vm8, %v1173_v46, %v1174_v12  ;;  %vm9469_vm9 = vmmov %vm9464_vm8 }
 0x223   : > { %5072 = vmatprep.subr.bf16.mxu1 %v9076_v5  ;;  %4306 = vmatmul.mubr.msk.f32.gmra.mrb[64].mxu0 %vm895_vm4, %v9460_v31  ;;  %v2591_v31 = vld [vmem:[#allocation8 + $0x378] sm:$0xff]  ;;  %v7493_v46 = vsel %vm9469_vm9, %v1174_v12, %v1175_v11 }
 0x224   : > { %5106 = vmatprep.subr.bf16.mxu0 %v7451_v32  ;;  %4307 = vmatprep.mubr.msk.f32.mxu0 %vm9463_vm3, %v9461_v49  ;;  %9470 = vst [vmem:[#allocation33_spill] sm:$0xff] %v7493_v46  ;;  %v5079_v3 = vpack.c.bf16 %v2591_v31, %v2590_v2  ;;  %v9475_v12 = vld [vmem:[#allocation76_spill] sm:$0xff]  ;;  %v5082_v31 = vpack.c.bf16 %v2593_v42, %v2592_v47  ;;  %v2596_v42 = vld [vmem:[#allocation8 + $0x3a0] sm:$0xff] }
 0x225   : > { %3171 = vmatmul.mubr.f32.gmra.mrb[50].mxu1 %v7042_v28  ;;  %v9467_v28 = vld [vmem:[#allocation74_spill] sm:$0xff]  ;;  %v2595_v2 = vld [vmem:[#allocation8 + $0x398] sm:$0xff] }
 0x226   : > { %3175 = vmatprep.mubr.f32.mxu1 %v7479_v29  ;;  %5074 = vmatpush1.bf16.msra.mxu1 %v5073_v23  ;;  %vm9468_vm4 = vnez %v9467_v28  ;;  %v9471_v23 = vld [vmem:[#allocation73_spill] sm:$0xff]  ;;  %v9477_v28 = vrot.slane %v9407_v18, 1 }
 0x227   : > { %5075 = vmatprep.subr.bf16.mxu1 %v9076_v5  ;;  %4308 = vmatmul.mubr.msk.f32.gmra.mrb[66].mxu0 %vm9463_vm3, %v9465_v19  ;;  %vm9472_vm8 = vnez %v9471_v23  ;;  %v9473_v19 = vld [vmem:[#allocation72_spill] sm:$0xff]  ;;  %vm9476_vm3 = vnez %v9475_v12  ;;  %v2597_v12 = vld [vmem:[#allocation8 + $0x3a8] sm:$0xff] }
 0x228   : > { %4309 = vmatprep.mubr.msk.f32.mxu0 %vm9468_vm4, %v9466_v13  ;;  %vm897_vm7 = vmand %vm9468_vm4, %vm9472_vm8 }
 0x229   : > { %3176 = vmatmul.mubr.f32.gmra.mrb[52].mxu1 %v7096_v16  ;;  %v9474_v16 = vld [vmem:[#allocation64_spill] sm:$0xff]  ;;  %vm9478_vm4 = vmmov %vm9469_vm9 }
 0x22a   : > { %4388 = vmatprep.mubr.msk.f32.mxu1 %vm7142_vm14, %v7493_v46  ;;  %5077 = vmatpush1.bf16.msra.mxu1 %v5076_v54  ;;  %v7512_v23 = vsel %vm9478_vm4, %v1175_v11, %v9477_v28  ;;  %v2594_v54 = vld [vmem:[#allocation8 + $0x390] sm:$0xff]  ;;  %v9483_v11 = vld [vmem:[#allocation84_spill] sm:$0xff] }
 0x22b   : > { %5078 = vmatprep.subr.bf16.mxu1 %v9076_v5  ;;  %4310 = vmatmul.mubr.msk.f32.gmra.mrb[68].mxu0 %vm897_vm7, %v9473_v19  ;;  %v9479_v19 = vld [vmem:[#allocation83_spill] sm:$0xff]  ;;  %vm9484_vm9 = vnez %v9483_v11  ;;  %v5085_v47 = vpack.c.bf16 %v2595_v2, %v2594_v54  ;;  %v9486_v28 = vld [vmem:[#allocation88_spill] sm:$0xff]  ;;  %v5088_v11 = vpack.c.bf16 %v2597_v12, %v2596_v42  ;;  %v9490_v2 = vld [vmem:[#allocation98_spill] sm:$0xff] }
 0x22c   : > { %4311 = vmatprep.mubr.msk.f32.mxu0 %vm9476_vm3, %v9474_v16  ;;  %v9480_v46 = vld [vmem:[#allocation71_spill] sm:$0xff]  ;;  %v2599_v54 = vld [vmem:[#allocation8 + $0x3b8] sm:$0xff]  ;;  %v2601_v12 = vld [vmem:[#allocation8 + $0x3c8] sm:$0xff] }
 0x22d   : > { %3181 = vmatmul.mubr.f32.gmra.mrb[54].mxu1 %v7173_v53  ;;  %v9481_v53 = vld [vmem:[#allocation89_spill] sm:$0xff] }
 0x22e   : > { %3185 = vmatprep.mubr.f32.mxu1 %v7512_v23  ;;  %5080 = vmatpush1.bf16.msra.mxu1 %v5079_v3  ;;  %vm9482_vm7 = vnez %v9481_v53  ;;  %v9485_v3 = vld [vmem:[#allocation42_spill] sm:$0xff]  ;;  %v9489_v53 = vld [vmem:[#allocation49_spill] sm:$0xff] }
 0x22f   : > { %5081 = vmatprep.subr.bf16.mxu1 %v9076_v5  ;;  %4312 = vmatmul.mubr.msk.f32.gmra.mrb[70].mxu0 %vm9476_vm3, %v9479_v19  ;;  %vm899_vm4 = vmand %vm9482_vm7, %vm9484_vm9  ;;  %v9487_v19 = vld [vmem:[#allocation82_spill] sm:$0xff]  ;;  %vm9488_vm3 = vnez %v9151_v30  ;;  %v2600_v30 = vld [vmem:[#allocation8 + $0x3c0] sm:$0xff] }
 0x230   : > { %4313 = vmatprep.mubr.msk.f32.mxu0 %vm9482_vm7, %v9480_v46  ;;  %vm9492_vm7 = vnez %v9183_v25  ;;  %v9496_v25 = vld [vmem:[#allocation63_spill] sm:$0xff] }
 0x231   : > { %3186 = vmatmul.mubr.f32.gmra.mrb[56].mxu1 %v7235_v8  ;;  %v9491_v8 = vld [vmem:[#allocation87_spill] sm:$0xff] }
 0x232   : > { %4389 = vmatprep.mubr.msk.f32.mxu1 %vm7255_vm12, %v9485_v3  ;;  %5083 = vmatpush1.bf16.msra.mxu1 %v5082_v31  ;;  %v2598_v31 = vld [vmem:[#allocation8 + $0x3b0] sm:$0xff] }
 0x233   : > { %5084 = vmatprep.subr.bf16.mxu1 %v9076_v5  ;;  %4314 = vmatmul.mubr.msk.f32.gmra.mrb[72].mxu0 %vm899_vm4, %v9486_v28  ;;  %vm9493_vm4 = vnez %v9167_v10  ;;  %v5091_v42 = vpack.c.bf16 %v2599_v54, %v2598_v31  ;;  %v5094_v10 = vpack.c.bf16 %v2601_v12, %v2600_v30  ;;  %v2603_v31 = vld [vmem:[#allocation8 + $0x3d8] sm:$0xff]  ;;  %v9497_v54 = vld [vmem:[#allocation115_spill] sm:$0xff]  ;;  %v9550_v28 = vld [vmem:[#allocation162_spill] sm:$0xff] }
 0x234   : > { %4315 = vmatprep.mubr.msk.f32.mxu0 %vm9488_vm3, %v9487_v19  ;;  %vm901_vm9 = vmand %vm9492_vm7, %vm9493_vm4  ;;  %v9500_v30 = vld [vmem:[#allocation44_spill] sm:$0xff] }
 0x235   : > { %3191 = vmatmul.mubr.f32.gmra.mrb[58].mxu1 %v9407_v18 }
 0x236   : > { %3195 = vmatprep.mubr.f32.mxu1 %v9489_v53  ;;  %5086 = vmatpush1.bf16.msra.mxu1 %v5085_v47  ;;  %v9494_v47 = vld [vmem:[#allocation53_spill] sm:$0xff] }
 0x237   : > { %5087 = vmatprep.subr.bf16.mxu1 %v9076_v5  ;;  %4316 = vmatmul.mubr.msk.f32.gmra.mrb[74].mxu0 %vm9488_vm3, %v9490_v2  ;;  %v9495_v2 = vld [vmem:[#allocation105_spill] sm:$0xff] }
 0x238   : > { %4317 = vmatprep.mubr.msk.f32.mxu0 %vm9492_vm7, %v9491_v8  ;;  %vm9501_vm7 = vnez %v9500_v30 }
 0x239   : > { %3196 = vmatmul.mubr.f32.gmra.mrb[60].mxu1 %v9421_v45 }
 0x23a   : > { %4390 = vmatprep.mubr.msk.f32.mxu1 %vm7356_vm5, %v9494_v47  ;;  %5089 = vmatpush1.bf16.msra.mxu1 %v5088_v11  ;;  %v2602_v11 = vld [vmem:[#allocation8 + $0x3d0] sm:$0xff] }
 0x23b   : > { %5090 = vmatprep.subr.bf16.mxu1 %v9076_v5  ;;  %4318 = vmatmul.mubr.msk.f32.gmra.mrb[76].mxu0 %vm901_vm9, %v9495_v2  ;;  %vm9498_vm9 = vnez %v9213_v58  ;;  %v5097_v12 = vpack.c.bf16 %v2603_v31, %v2602_v11  ;;  %v2607_v11 = vld [vmem:[#allocation8 + $0x3f8] sm:$0xff]  ;;  %v9505_v31 = vld [vmem:[#allocation86_spill] sm:$0xff]  ;;  %v9538_v2 = vld [vmem:[#allocation99_spill] sm:$0xff] }
 0x23c   : > { %4319 = vmatprep.mubr.msk.f32.mxu0 %vm6636_vm10, %v6525_v36  ;;  %vm903_vm3 = vmand %vm6764_vm13, %vm9498_vm9 }
 0x23d   : > { %3201 = vmatmul.mubr.f32.gmra.mrb[62].mxu1 %v9432_v56 }
 0x23e   : > { %3205 = vmatprep.mubr.f32.mxu1 %v9496_v25  ;;  %5092 = vmatpush1.bf16.msra.mxu1 %v5091_v42  ;;  %v9499_v42 = vld [vmem:[#allocation68_spill] sm:$0xff] }
 0x23f   : > { %5093 = vmatprep.subr.bf16.mxu1 %v9076_v5  ;;  %4320 = vmatmul.mubr.msk.f32.gmra.mrb[78].mxu0 %vm6636_vm10, %v9497_v54  ;;  %v2605_v54 = vld [vmem:[#allocation8 + $0x3e8] sm:$0xff]  ;;  %vm9503_vm10 = vnez %v9277_v7  ;;  %v9510_v7 = vld [vmem:[#allocation141_spill] sm:$0xff] }
 0x240   : > { %4321 = vmatprep.mubr.msk.f32.mxu0 %vm6764_vm13, %v6581_v60  ;;  %v5100_v58 = vpack.c.bf16 %v2605_v54, %v2604_v51  ;;  %vm9504_vm13 = vnez %v9259_v62  ;;  %v9506_v54 = vld [vmem:[#allocation60_spill] sm:$0xff]  ;;  %v9516_v51 = vld [vmem:[#allocation157_spill] sm:$0xff]  ;;  %v9530_v62 = vld [vmem:[#allocation95_spill] sm:$0xff] }
 0x241   : > { %3206 = vmatmul.mubr.f32.gmra.mrb[0].mxu1 %v9438_v27  ;;  %vm9507_vm9 = vnez %v9506_v54 }
 0x242   : > { %4391 = vmatprep.mubr.msk.f32.mxu1 %vm9501_vm7, %v9499_v42  ;;  %5095 = vmatpush1.bf16.msra.mxu1 %v5094_v10  ;;  %v2606_v10 = vld [vmem:[#allocation8 + $0x3f0] sm:$0xff] }
 0x243   : > { %5096 = vmatprep.subr.bf16.mxu1 %v9076_v5  ;;  %4322 = vmatmul.mubr.msk.f32.gmra.mrb[80].mxu0 %vm903_vm3, %v6740_v34  ;;  %vm905_vm3 = vmand %vm9503_vm10, %vm9504_vm13  ;;  %v9537_v34 = vld [vmem:[#allocation118_spill] sm:$0xff] }
 0x244   : > { %4323 = vmatprep.mubr.msk.f32.mxu0 %vm6787_vm6, %v6645_v39 }
 0x245   : > { %3211 = vmatmul.mubr.f32.gmra.mrb[2].mxu1 %v9447_v17 }
 0x246   : > { %3215 = vmatprep.mubr.f32.mxu1 %v9502_v22  ;;  %5098 = vmatpush1.bf16.msra.mxu1 %v5097_v12  ;;  %v5103_v12 = vpack.c.bf16 %v2607_v11, %v2606_v10  ;;  %v9519_v10 = vld [vmem:[#allocation166_spill] sm:$0xff]  ;;  %v9523_v11 = vld [vmem:[#allocation77_spill] sm:$0xff] }
 0x247   : > { %5099 = vmatprep.subr.bf16.mxu1 %v9076_v5  ;;  %4324 = vmatmul.mubr.msk.f32.gmra.mrb[82].mxu0 %vm6787_vm6, %v6820_v59  ;;  %vm9508_vm6 = vnez %v9296_v55  ;;  %v9518_v55 = vld [vmem:[#allocation112_spill] sm:$0xff]  ;;  %vm9524_vm8 = vnez %v9523_v11 }
 0x248   : > { %4325 = vmatprep.mubr.msk.f32.mxu0 %vm9503_vm10, %v6730_v6  ;;  %vm9511_vm10 = vnez %v9342_v37  ;;  %v9522_v37 = vld [vmem:[#allocation122_spill] sm:$0xff]  ;;  %v9536_v59 = vld [vmem:[#allocation148_spill] sm:$0xff] }
 0x249   : > { %3216 = vmatmul.mubr.f32.gmra.mrb[4].mxu1 %v9453_v0  ;;  %v9566_v0 = vld [vmem:[#allocation174_spill] sm:$0xff] }
 0x24a   : > { %4392 = vmatprep.mubr.msk.f32.mxu1 %vm9507_vm9, %v9505_v31  ;;  %5101 = vmatpush1.bf16.msra.mxu1 %v5100_v58  ;;  %v9514_v58 = vld [vmem:[#allocation70_spill] sm:$0xff] }
 0x24b   : > { %5102 = vmatprep.subr.bf16.mxu1 %v9076_v5  ;;  %4326 = vmatmul.mubr.msk.f32.gmra.mrb[84].mxu0 %vm905_vm3, %v6889_v61  ;;  %vm9512_vm3 = vnez %v9315_v9  ;;  %v9513_v5 = vld [vmem:[#allocation103_spill] sm:$0xff]  ;;  %vm9515_vm4 = vnez %v9514_v58  ;;  %v2612_v61 = vld [vmem:[#allocation8 + $0x420] sm:$0xff] }
 0x24c   : > { %4327 = vmatprep.mubr.msk.f32.mxu0 %vm9508_vm6, %v6808_v43  ;;  %vm907_vm13 = vmand %vm9511_vm10, %vm9512_vm3  ;;  %v9527_v9 = vld [vmem:[#allocation91_spill] sm:$0xff] }
 0x24d   : > { %3221 = vmatmul.mubr.f32.gmra.mrb[6].mxu1 %v9461_v49  ;;  %v9561_v49 = vld [vmem:[#allocation130_spill] sm:$0xff] }
 0x24e   : > { %3225 = vmatprep.mubr.f32.mxu1 %v9509_v41  ;;  %5104 = vmatpush1.bf16.msra.mxu1 %v5103_v12  ;;  %v2611_v12 = vld [vmem:[#allocation8 + $0x418] sm:$0xff] }
 0x24f   : > { %4328 = vmatmul.mubr.msk.f32.gmra.mrb[86].mxu0 %vm9508_vm6, %v6952_v24  ;;  %vm9517_vm6 = vnez %v9348_v38  ;;  %v9525_v38 = vld [vmem:[#allocation131_spill] sm:$0xff]  ;;  %v9533_v24 = vld [vmem:[#allocation90_spill] sm:$0xff] }
 0x250   : > { %4329 = vmatprep.mubr.msk.f32.mxu0 %vm9511_vm10, %v9510_v7  ;;  %vm9520_vm10 = vnez %v9386_v44  ;;  %v2610_v44 = vld [vmem:[#allocation8 + $0x410] sm:$0xff] }
 0x251   : > { %3226 = vmatmul.mubr.f32.gmra.mrb[8].mxu1 %v9466_v13  ;;  %v9553_v13 = vld [vmem:[#allocation116_spill] sm:$0xff] }
 0x252   : > { %4393 = vmatprep.mubr.msk.f32.mxu1 %vm9515_vm4, %v9513_v5 }
 0x253   : > { %4330 = vmatmul.mubr.msk.f32.gmra.mrb[88].mxu0 %vm907_vm13, %v9516_v51  ;;  %vm9521_vm13 = vnez %v9368_v14  ;;  %v9526_v14 = vld [vmem:[#allocation136_spill] sm:$0xff]  ;;  %v9532_v51 = vld [vmem:[#allocation121_spill] sm:$0xff] }
 0x254   : > { %4331 = vmatprep.mubr.msk.f32.mxu0 %vm9517_vm6, %v6940_v48  ;;  %vm909_vm3 = vmand %vm9520_vm10, %vm9521_vm13 }
 0x255   : > { %3231 = vmatmul.mubr.f32.gmra.mrb[10].mxu1 %v9474_v16  ;;  %v9552_v16 = vld [vmem:[#allocation22_spill] sm:$0xff] }
 0x256   : > { %3235 = vmatprep.mubr.f32.mxu1 %v9518_v55 }
 0x257   : > { %4332 = vmatmul.mubr.msk.f32.gmra.mrb[90].mxu0 %vm9517_vm6, %v9519_v10  ;;  %vm9528_vm6 = vnez %v9527_v9  ;;  %v5109_v10 = vpack.c.bf16 %v2611_v12, %v2610_v44  ;;  %v2615_v44 = vld [vmem:[#allocation8 + $0x438] sm:$0xff]  ;;  %v9541_v12 = vld [vmem:[#allocation153_spill] sm:$0xff] }
 0x258   : > { %4333 = vmatprep.mubr.msk.f32.mxu0 %vm9520_vm10, %v7001_v35  ;;  %vm9534_vm10 = vnez %v9533_v24  ;;  %v2614_v24 = vld [vmem:[#allocation8 + $0x430] sm:$0xff] }
 0x259   : > { %3236 = vmatmul.mubr.f32.gmra.mrb[12].mxu1 %v9480_v46  ;;  %v9551_v46 = vld [vmem:[#allocation164_spill] sm:$0xff] }
 0x25a   : > { %4394 = vmatprep.mubr.msk.f32.mxu1 %vm9524_vm8, %v9522_v37 }
 0x25b   : > { %4334 = vmatmul.mubr.msk.f32.gmra.mrb[92].mxu0 %vm909_vm3, %v7136_v26  ;;  %v9529_v26 = vld [vmem:[#allocation138_spill] sm:$0xff]  ;;  %vm9531_vm3 = vnez %v9530_v62 }
 0x25c   : > { %4335 = vmatprep.mubr.msk.f32.mxu0 %vm7290_vm11, %v6564_v57 }
 0x25d   : > { %3241 = vmatmul.mubr.f32.gmra.mrb[14].mxu1 %v9487_v19  ;;  %v2617_v19 = vld [vmem:[#allocation8 + $0x448] sm:$0xff] }
 0x25e   : > { %3245 = vmatprep.mubr.f32.mxu1 %v9525_v38 }
 0x25f   : > { %4336 = vmatmul.mubr.msk.f32.gmra.mrb[94].mxu0 %vm7290_vm11, %v7211_v63  ;;  %v9535_v63 = vld [vmem:[#allocation147_spill] sm:$0xff]  ;;  %vm9539_vm11 = vnez %v9538_v2  ;;  %v9548_v2 = vld [vmem:[#allocation108_spill] sm:$0xff] }
 0x260   : > { %4337 = vmatprep.mubr.msk.f32.mxu0 %vm9528_vm6, %v9526_v14  ;;  %v5113_v14 = vpack.c.bf16 %v2613_v20, %v2612_v61  ;;  %vm9540_vm13 = vmand %vm9539_vm11, %vm6726_vm2  ;;  %v5117_v61 = vpack.c.bf16 %v2615_v44, %v2614_v24  ;;  %vm9549_vm8 = vnez %v9548_v2  ;;  %v2616_v20 = vld [vmem:[#allocation8 + $0x440] sm:$0xff]  ;;  %v2618_v24 = vld [vmem:[#allocation8 + $0x450] sm:$0xff] }
 0x261   : > { %3246 = vmatmul.mubr.f32.gmra.mrb[16].mxu1 %v9491_v8  ;;  %v9542_v8 = vld [vmem:[#allocation109_spill] sm:$0xff]  ;;  %v2619_v44 = vld [vmem:[#allocation8 + $0x458] sm:$0xff] }
 0x262   : > { %4395 = vmatprep.mubr.msk.f32.mxu1 %vm9531_vm3, %v9529_v26  ;;  %v9557_v2 = vld [vmem:[#allocation168_spill] sm:$0xff] }
 0x263   : > { %4338 = vmatmul.mubr.msk.f32.vlgmr.msra.gmra.mrb[32].mxu0 %vm9534_vm10, %v9532_v51  ;;  %vm9543_vm10 = vnez %v9542_v8  ;;  %v9630_v8 = vld [vmem:[#allocation161_spill] sm:$0xff] }
 0x264   : > { %2925 = vmatprep.mubr.f32.mxu0 %v9535_v63  ;;  %5108 = vmatpush3.bf16.msra.mxu0 %v7451_v32  ;;  %v9544_v63 = vld [vmem:[#allocation154_spill] sm:$0xff]  ;;  %v9547_v32 = vld [vmem:[#allocation21_spill] sm:$0xff] }
 0x265   : > { %3251 = vmatmul.mubr.f32.gmra.mrb[18].mxu1 %v6525_v36  ;;  %5110 = vmatprep.subr.bf16.mxu0 %v5109_v10  ;;  %v9545_v36 = vld [vmem:[#allocation113_spill] sm:$0xff] }
 0x266   : > { %3255 = vmatprep.mubr.f32.mxu1 %v9536_v59  ;;  %vm9546_vm3 = vnez %v9545_v36  ;;  %v9567_v36 = vld [vmem:[#allocation18_spill] sm:$0xff] }
 0x267   : > { %4339 = vmatmul.mubr.msk.f32.gmra.mrb[34].mxu0 %vm9540_vm13, %v9537_v34  ;;  %vm9554_vm13 = vnez %v9553_v13  ;;  %v9563_v13 = vld [vmem:[#allocation41_spill] sm:$0xff] }
 0x268   : > { %4340 = vmatprep.mubr.msk.f32.mxu0 %vm9543_vm10, %v9541_v12  ;;  %5112 = vmatpush3.bf16.msra.mxu0 %v5109_v10  ;;  %vm9556_vm11 = vmand %vm9554_vm13, %vm6869_vm15  ;;  %v9631_v10 = vld [vmem:[#allocation128_spill] sm:$0xff] }
 0x269   : > { %3256 = vmatmul.mubr.f32.gmra.mrb[20].mxu1 %v6581_v60  ;;  %5114 = vmatprep.subr.bf16.mxu0 %v5113_v14  ;;  %v5121_v60 = vpack.c.bf16 %v2617_v19, %v2616_v20  ;;  %v9564_v19 = vld [vmem:[#allocation126_spill] sm:$0xff]  ;;  %v2620_v20 = vld [vmem:[#allocation8 + $0x460] sm:$0xff] }
 0x26a   : > { %4396 = vmatprep.mubr.msk.f32.mxu1 %vm9546_vm3, %v9544_v63  ;;  %vm9562_vm3 = vnez %v9561_v49  ;;  %vm9565_vm4 = vnez %v9564_v19  ;;  %v9568_v49 = vld [vmem:[#allocation23_spill] sm:$0xff] }
 0x26b   : > { %4341 = vmatmul.mubr.msk.f32.gmra.mrb[36].mxu0 %vm9549_vm8, %v9547_v32  ;;  %v9558_v32 = vld [vmem:[#allocation127_spill] sm:$0xff] }
 0x26c   : > { %2935 = vmatprep.mubr.f32.mxu0 %v9550_v28  ;;  %5116 = vmatpush3.bf16.msra.mxu0 %v5113_v14  ;;  %vm9559_vm8 = vnez %v9558_v32  ;;  %v5125_v14 = vpack.c.bf16 %v2619_v44, %v2618_v24  ;;  %v2623_v24 = vld [vmem:[#allocation8 + $0x478] sm:$0xff]  ;;  %v9573_v19 = vld [vmem:[#allocation151_spill] sm:$0xff] }
 0x26d   : > { %3261 = vmatmul.mubr.f32.gmra.mrb[22].mxu1 %v6645_v39  ;;  %5118 = vmatprep.subr.bf16.mxu0 %v5117_v61  ;;  %v9560_v39 = vld [vmem:[#allocation17_spill] sm:$0xff]  ;;  %v9572_v44 = vld [vmem:[#allocation180_spill] sm:$0xff] }
 0x26e   : > { %3265 = vmatprep.mubr.f32.mxu1 %v9551_v46  ;;  %v9648_v32 = vld [vmem:[#allocation28_spill] sm:$0xff] }
 0x26f   : > { %4342 = vmatmul.mubr.msk.f32.gmra.mrb[38].mxu0 %vm9556_vm11, %v9552_v16  ;;  %v2621_v16 = vld [vmem:[#allocation8 + $0x468] sm:$0xff] }
 0x270   : > { %4343 = vmatprep.mubr.msk.f32.mxu0 %vm9559_vm8, %v9557_v2  ;;  %5120 = vmatpush3.bf16.msra.mxu0 %v5117_v61  ;;  %v2622_v61 = vld [vmem:[#allocation8 + $0x470] sm:$0xff] }
 0x271   : > { %3266 = vmatmul.mubr.f32.gmra.mrb[24].mxu1 %v6730_v6  ;;  %5122 = vmatprep.subr.bf16.mxu0 %v5121_v60  ;;  %v5129_v6 = vpack.c.bf16 %v2621_v16, %v2620_v20  ;;  %v9580_v16 = vld [vmem:[#allocation183_spill] sm:$0xff]  ;;  %v9581_v20 = vld [vmem:[#allocation20_spill] sm:$0xff] }
 0x272   : > { %4397 = vmatprep.mubr.msk.f32.mxu1 %vm9562_vm3, %v9560_v39  ;;  %v9569_v39 = vld [vmem:[#allocation134_spill] sm:$0xff] }
 0x273   : > { %4344 = vmatmul.mubr.msk.f32.gmra.mrb[40].mxu0 %vm9565_vm4, %v9563_v13  ;;  %vm9570_vm13 = vnez %v9569_v39  ;;  %vm9574_vm4 = vnez %v9573_v19  ;;  %v9578_v39 = vld [vmem:[#allocation143_spill] sm:$0xff] }
 0x274   : > { %2945 = vmatprep.mubr.f32.mxu0 %v9566_v0  ;;  %5124 = vmatpush3.bf16.msra.mxu0 %v5121_v60  ;;  %vm9571_vm11 = vmand %vm9570_vm13, %vm7017_vm0  ;;  %v5133_v60 = vpack.c.bf16 %v2623_v24, %v2622_v61  ;;  %vm9579_vm9 = vnez %v9578_v39  ;;  %v9586_v61 = vld [vmem:[#allocation172_spill] sm:$0xff]  ;;  %v9589_v39 = vld [vmem:[#allocation175_spill] sm:$0xff] }
 0x275   : > { %3271 = vmatmul.mubr.f32.gmra.mrb[26].mxu1 %v6808_v43  ;;  %5126 = vmatprep.subr.bf16.mxu0 %v5125_v14  ;;  %v9575_v43 = vld [vmem:[#allocation19_spill] sm:$0xff]  ;;  %v9588_v24 = vld [vmem:[#allocation32_spill] sm:$0xff] }
 0x276   : > { %3275 = vmatprep.mubr.f32.mxu1 %v9567_v36  ;;  %v9576_v36 = vld [vmem:[#allocation159_spill] sm:$0xff] }
 0x277   : > { %4345 = vmatmul.mubr.msk.f32.gmra.mrb[42].mxu0 %vm9571_vm11, %v9568_v49  ;;  %vm9577_vm3 = vnez %v9576_v36  ;;  %v9595_v36 = vld [vmem:[#allocation176_spill] sm:$0xff] }
 0x278   : > { %4346 = vmatprep.mubr.msk.f32.mxu0 %vm9574_vm4, %v9572_v44  ;;  %5128 = vmatpush3.bf16.msra.mxu0 %v5125_v14  ;;  %v9585_v14 = vld [vmem:[#allocation186_spill] sm:$0xff] }
 0x279   : > { %3276 = vmatmul.mubr.f32.gmra.mrb[28].mxu1 %v9510_v7  ;;  %5130 = vmatprep.subr.bf16.mxu0 %v5129_v6  ;;  %v9582_v7 = vld [vmem:[#allocation158_spill] sm:$0xff] }
 0x27a   : > { %4398 = vmatprep.mubr.msk.f32.mxu1 %vm9577_vm3, %v9575_v43  ;;  %vm9583_vm13 = vnez %v9582_v7  ;;  %vm9587_vm3 = vnez %v9586_v61  ;;  %v9593_v7 = vld [vmem:[#allocation187_spill] sm:$0xff] }
 0x27b   : > { %4347 = vmatmul.mubr.msk.f32.gmra.mrb[44].mxu0 %vm9579_vm9, %v7441_v52  ;;  %vm9584_vm11 = vmand %vm9583_vm13, %vm7142_vm14  ;;  %vm9590_vm9 = vnez %v9589_v39  ;;  %vm9596_vm13 = vnez %v9595_v36  ;;  %v9599_v39 = vld [vmem:[#allocation182_spill] sm:$0xff]  ;;  %v9606_v36 = vld [vmem:[#allocation39_spill] sm:$0xff] }
 0x27c   : > { %2955 = vmatprep.mubr.f32.mxu0 %v9580_v16  ;;  %5132 = vmatpush3.bf16.msra.mxu0 %v5129_v6  ;;  %v9591_v6 = vld [vmem:[#allocation169_spill] sm:$0xff] }
 0x27d   : > { %3281 = vmatmul.mubr.f32.gmra.mrb[30].mxu1 %v6940_v48  ;;  %5134 = vmatprep.subr.bf16.mxu0 %v5133_v60  ;;  %vm9592_vm7 = vnez %v9591_v6  ;;  %v9594_v48 = vld [vmem:[#allocation33_spill] sm:$0xff]  ;;  %v9601_v6 = vld [vmem:[#allocation184_spill] sm:$0xff] }
 0x27e   : > { %3285 = vmatprep.mubr.f32.mxu1 %v9581_v20  ;;  %v9608_v20 = vld [vmem:[#allocation135_spill] sm:$0xff] }
 0x27f   : > { %4348 = vmatmul.mubr.msk.f32.gmra.mrb[46].mxu0 %vm9584_vm11, %v7459_v15  ;;  %vm9597_vm11 = vmand %vm9596_vm13, %vm7255_vm12 }
 0x280   : > { %4349 = vmatprep.mubr.msk.f32.mxu0 %vm9587_vm3, %v9585_v14  ;;  %5136 = vmatpush3.bf16.msra.mxu0 %v5133_v60  ;;  %v9600_v60 = vld [vmem:[#allocation111_spill] sm:$0xff] }
 0x281   : > { %3286 = vmatmul.mubr.f32.gmra.mrb[32].mxu1 %v7001_v35  ;;  %v9598_v35 = vld [vmem:[#allocation35_spill] sm:$0xff] }
 0x282   : > { %4399 = vmatprep.mubr.msk.f32.mxu1 %vm9590_vm9, %v9588_v24  ;;  %v9607_v24 = vld [vmem:[#allocation107_spill] sm:$0xff] }
 0x283   : > { %4350 = vmatmul.mubr.msk.f32.gmra.mrb[48].mxu0 %vm9592_vm7, %v7479_v29  ;;  %vm9602_vm7 = vnez %v9601_v6  ;;  %v9611_v6 = vld [vmem:[#allocation185_spill] sm:$0xff] }
 0x284   : > { %2965 = vmatprep.mubr.f32.mxu0 %v9593_v7 }
 0x285   : > { %3291 = vmatmul.mubr.f32.gmra.mrb[34].mxu1 %v6564_v57  ;;  %v9603_v57 = vshra.s32 %v6114_v4, 4  ;;  %v9615_v4 = vld [vmem:[#allocation81_spill] sm:$0xff] }
 0x286   : > { %3295 = vmatprep.mubr.f32.mxu1 %v9532_v51  ;;  %v9604_v51 = vld [vmem:[#allocation181_spill] sm:$0xff]  ;;  %v9616_v9 = vshra.s32 %v9615_v4, 4  ;;  %v9727_v4 = vmov 0 }
 0x287   : > { %4351 = vmatmul.mubr.msk.f32.gmra.mrb[50].mxu0 %vm9597_vm11, %v9594_v48  ;;  %vm1712_vm9 = vcmp.lt.s32.totalorder %v9603_v57, 15  ;;  %vm9605_vm3 = vnez %v9604_v51  ;;  %v9614_v57 = vld [vmem:[#allocation146_spill] sm:$0xff] }
 0x288   : > { %4352 = vmatprep.mubr.msk.f32.mxu0 %vm7274_vm1, %v9598_v35  ;;  %vm1744_vm13 = vmand %vm1712_vm9, %vm9528_vm6  ;;  %vm1714_vm6 = vcmp.lt.s32.totalorder %v9616_v9, 15 }
 0x289   : > { %3296 = vmatmul.mubr.f32.gmra.mrb[36].mxu1 %v9600_v60  ;;  %v9609_v60 = vld [vmem:[#allocation80_spill] sm:$0xff] }
 0x28a   : > { %4400 = vmatprep.mubr.msk.f32.mxu1 %vm9602_vm7, %v9537_v34  ;;  %v9610_v43 = vshra.s32 %v9609_v60, 4  ;;  %vm9612_vm7 = vnez %v9611_v6  ;;  %v9632_v6 = vshra.s32 %v9631_v10, 4  ;;  %v9762_v60 = vld [vmem:[#allocation175_spill] sm:$0xff] }
 0x28b   : > { %4353 = vmatmul.mubr.msk.f32.gmra.mrb[52].mxu0 %vm9605_vm3, %v7512_v23  ;;  %vm9613_vm1 = vmand %vm9612_vm7, %vm7356_vm5 }
 0x28c   : > { %2975 = vmatprep.mubr.f32.mxu0 %v9606_v36  ;;  %vm1713_vm11 = vcmp.lt.s32.totalorder %v9610_v43, 15  ;;  %v9617_v43 = vld [vmem:[#allocation92_spill] sm:$0xff] }
 0x28d   : > { %3301 = vmatmul.mubr.f32.gmra.mrb[38].mxu1 %v9607_v24  ;;  %vm2033_vm3 = vmand %vm1713_vm11, %vm6726_vm2  ;;  %v9618_v51 = vshra.s32 %v9617_v43, 4  ;;  %v9649_v43 = vld [vmem:[#allocation171_spill] sm:$0xff] }
 0x28e   : > { %4401 = vmatprep.mubr.msk.f32.mxu1 %vm1712_vm9, %v9608_v20 }
 0x28f   : > { %4354 = vmatmul.mubr.msk.f32.gmra.mrb[54].mxu0 %vm9613_vm1, %v9485_v3  ;;  %vm7776_vm4 = vcmp.lt.s32.totalorder %v9618_v51, 15  ;;  %vm1746_vm1 = vmand %vm1714_vm6, %vm9543_vm10  ;;  %vm7816_vm10 = vcmp.lt.s32.totalorder %v9632_v6, 15  ;;  %v9650_v51 = vshra.s32 %v9649_v43, 4  ;;  %v9719_v6 = vld [vmem:[#allocation40_spill] sm:$0xff]  ;;  %v9739_v43 = vld [vmem:[#allocation139_spill] sm:$0xff] }
 0x290   : > { %4753 = vmatprep.mubr.msk.f32.mxu0 %vm1712_vm9, %v9563_v13  ;;  %vm2035_vm2 = vmand %vm7776_vm4, %vm6869_vm15 }
 0x291   : > { %4402 = vmatmul.mubr.msk.f32.vlgmr.msra.gmra.mrb[40].mxu1 %vm1744_vm13, %v9541_v12  ;;  %v9622_v12 = vld [vmem:[#allocation94_spill] sm:$0xff] }
 0x292   : > { %4403 = vmatprep.mubr.msk.f32.mxu1 %vm1713_vm11, %v9614_v57  ;;  %v9623_v13 = vshra.s32 %v9622_v12, 4  ;;  %v9755_v12 = vld [vmem:[#allocation160_spill] sm:$0xff] }
 0x293   : > { %4754 = vmatmul.mubr.msk.f32.vlgmr.msra.gmra.mrb[96].mxu0 %vm2033_vm3, %v9568_v49  ;;  %v9626_v49 = vld [vmem:[#allocation110_spill] sm:$0xff] }
 0x294   : > { %4756 = vmatprep.mubr.msk.f32.mxu0 %vm1714_vm6, %v7441_v52  ;;  %vm7792_vm9 = vcmp.lt.s32.totalorder %v9623_v13, 15  ;;  %v9709_v52 = vmov 0 }
 0x295   : > { %4404 = vmatmul.mubr.msk.f32.gmra.mrb[42].mxu1 %vm1713_vm11, %v9550_v28  ;;  %v9627_v28 = vshra.s32 %v9626_v49, 4  ;;  %vm1748_vm11 = vmand %vm7792_vm9, %vm9559_vm8  ;;  %vm7870_vm8 = vcmp.lt.s32.totalorder %v9650_v51, 15  ;;  %v9740_v51 = vshra.s32 %v9739_v43, 4  ;;  %v9791_v43 = vld [vmem:[#allocation84_spill] sm:$0xff] }
 0x296   : > { %4405 = vmatprep.mubr.msk.f32.mxu1 %vm1714_vm6, %v9621_v50  ;;  %v9745_v50 = vld [vmem:[#allocation20_spill] sm:$0xff] }
 0x297   : > { %vm7798_vm7 = vcmp.lt.s32.totalorder %v9627_v28, 15  ;;  %4757 = vmatmul.mubr.msk.f32.gmra.mrb[98].mxu0 %vm2035_vm2, %v7459_v15  ;;  %v9635_v15 = vld [vmem:[#allocation144_spill] sm:$0xff]  ;;  %vm9658_vm2 = vnez %v9573_v19  ;;  %v9668_v19 = vld [vmem:[#allocation38_spill] sm:$0xff] }
 0x298   : > { %4759 = vmatprep.mubr.msk.f32.mxu0 %vm7792_vm9, %v7479_v29  ;;  %vm2037_vm15 = vmand %vm7798_vm7, %vm7017_vm0  ;;  %v9669_v13 = vshra.s32 %v9668_v19, 4  ;;  %v9732_v29 = vld [vmem:[#allocation130_spill] sm:$0xff]  ;;  %v9756_v19 = vshra.s32 %v9755_v12, 4  ;;  %v3799_v28 = vld [vmem:[#allocation9 + $0x58] sm:$0xff] }
 0x299   : > { %4406 = vmatmul.mubr.msk.f32.gmra.mrb[44].mxu1 %vm1746_vm1, %v9557_v2  ;;  %v9636_v2 = vshra.s32 %v9635_v15, 4  ;;  %vm1750_vm1 = vmand %vm7816_vm10, %vm9658_vm2  ;;  %v9813_v15 = vld [vmem:[#allocation137_spill] sm:$0xff] }
 0x29a   : > { %4407 = vmatprep.mubr.msk.f32.mxu1 %vm7776_vm4, %v9630_v8 }
 0x29b   : > { %vm7822_vm13 = vcmp.lt.s32.totalorder %v9636_v2, 15  ;;  %4760 = vmatmul.mubr.msk.f32.gmra.mrb[100].mxu0 %vm2037_vm15, %v9594_v48  ;;  %v9640_v48 = vld [vmem:[#allocation155_spill] sm:$0xff] }
 0x29c   : > { %4762 = vmatprep.mubr.msk.f32.mxu0 %vm7816_vm10, %v7512_v23  ;;  %vm2039_vm0 = vmand %vm7822_vm13, %vm7142_vm14  ;;  %v9644_v23 = vld [vmem:[#allocation165_spill] sm:$0xff] }
 0x29d   : > { %4408 = vmatmul.mubr.msk.f32.gmra.mrb[46].mxu1 %vm7776_vm4, %v9566_v0  ;;  %v9641_v0 = vshra.s32 %v9640_v48, 4  ;;  %v9645_v21 = vshra.s32 %v9644_v23, 4  ;;  %v9730_v48 = vld [vmem:[#allocation57_spill] sm:$0xff]  ;;  %v9734_v23 = vld [vmem:[#allocation50_spill] sm:$0xff] }
 0x29e   : > { %4409 = vmatprep.mubr.msk.f32.mxu1 %vm7792_vm9, %v9639_v33  ;;  %v9729_v33 = vld [vmem:[#allocation17_spill] sm:$0xff] }
 0x29f   : > { %vm7846_vm4 = vcmp.lt.s32.totalorder %v9641_v0, 15  ;;  %vm7852_vm3 = vcmp.lt.s32.totalorder %v9645_v21, 15  ;;  %4763 = vmatmul.mubr.msk.f32.gmra.mrb[102].mxu0 %vm2039_vm0, %v9485_v3  ;;  %v9653_v3 = vld [vmem:[#allocation179_spill] sm:$0xff]  ;;  %v9731_v0 = vld [vmem:[#allocation18_spill] sm:$0xff]  ;;  %v9735_v21 = vld [vmem:[#allocation117_spill] sm:$0xff] }
 0x2a0   : > { %4765 = vmatprep.mubr.msk.f32.mxu0 %vm7846_vm4, %v9489_v53  ;;  %vm2041_vm14 = vmand %vm7852_vm3, %vm7255_vm12  ;;  %v9659_v53 = vld [vmem:[#allocation31_spill] sm:$0xff]  ;;  %v9736_v9 = vshra.s32 %v9735_v21, 4  ;;  %v3797_v21 = vld [vmem:[#allocation9 + $0x48] sm:$0xff] }
 0x2a1   : > { %4410 = vmatmul.mubr.msk.f32.gmra.mrb[48].mxu1 %vm1748_vm11, %v9572_v44  ;;  %v9654_v44 = vshra.s32 %v9653_v3, 4  ;;  %vm9676_vm11 = vnez %v9506_v54  ;;  %v9743_v3 = vld [vmem:[#allocation19_spill] sm:$0xff] }
 0x2a2   : > { %4411 = vmatprep.mubr.msk.f32.mxu1 %vm7798_vm7, %v9648_v32  ;;  %v9737_v32 = vmov 0 }
 0x2a3   : > { %vm7876_vm6 = vcmp.lt.s32.totalorder %v9654_v44, 15  ;;  %4766 = vmatmul.mubr.msk.f32.gmra.mrb[104].mxu0 %vm2041_vm14, %v9494_v47  ;;  %v9660_v47 = vshra.s32 %v9659_v53, 4  ;;  %v9744_v44 = vld [vmem:[#allocation65_spill] sm:$0xff]  ;;  %v9748_v53 = vld [vmem:[#allocation56_spill] sm:$0xff] }
 0x2a4   : > { %4768 = vmatprep.mubr.msk.f32.mxu0 %vm7870_vm8, %v9496_v25  ;;  %vm2043_vm12 = vmand %vm7876_vm6, %vm7356_vm5  ;;  %v9663_v25 = vld [vmem:[#allocation34_spill] sm:$0xff]  ;;  %vm9667_vm5 = vnez %v9500_v30 }
 0x2a5   : > { %4412 = vmatmul.mubr.msk.f32.gmra.mrb[50].mxu1 %vm7798_vm7, %v9580_v16  ;;  %vm7900_vm9 = vcmp.lt.s32.totalorder %v9660_v47, 15  ;;  %v9664_v1 = vshra.s32 %v9663_v25, 4  ;;  %v9749_v47 = vld [vmem:[#allocation52_spill] sm:$0xff]  ;;  %v9751_v16 = vld [vmem:[#allocation145_spill] sm:$0xff] }
 0x2a6   : > { %4413 = vmatprep.mubr.msk.f32.mxu1 %vm7816_vm10, %v9657_v40  ;;  %vm7924_vm10 = vcmp.lt.s32.totalorder %v9669_v13, 15  ;;  %v9746_v40 = vld [vmem:[#allocation159_spill] sm:$0xff]  ;;  %v9752_v25 = vshra.s32 %v9751_v16, 4 }
 0x2a7   : > { %vm7906_vm7 = vcmp.lt.s32.totalorder %v9664_v1, 15  ;;  %4769 = vmatmul.mubr.msk.f32.gmra.mrb[106].mxu0 %vm2043_vm12, %v9499_v42  ;;  %v9672_v42 = vld [vmem:[#allocation45_spill] sm:$0xff]  ;;  %vm9677_vm12 = vnez %v9586_v61  ;;  %v9797_v16 = vld [vmem:[#allocation123_spill] sm:$0xff]  ;;  %v9824_v1 = vld [vmem:[#allocation178_spill] sm:$0xff] }
 0x2a8   : > { %4771 = vmatprep.mubr.msk.f32.mxu0 %vm7900_vm9, %v9502_v22  ;;  %vm2045_vm15 = vmand %vm7906_vm7, %vm9667_vm5  ;;  %v3792_v22 = vld [vmem:[#allocation9 + $0x20] sm:$0xff] }
 0x2a9   : > { %4414 = vmatmul.mubr.msk.f32.gmra.mrb[52].mxu1 %vm1750_vm1, %v9585_v14  ;;  %v9673_v14 = vshra.s32 %v9672_v42, 4  ;;  %vm1752_vm2 = vmand %vm7846_vm4, %vm9677_vm12  ;;  %v9759_v42 = vld [vmem:[#allocation32_spill] sm:$0xff] }
 0x2aa   : > { %4415 = vmatprep.mubr.msk.f32.mxu1 %vm7822_vm13, %v9407_v18  ;;  %v9678_v18 = vld [vmem:[#allocation48_spill] sm:$0xff] }
 0x2ab   : > { %vm7930_vm0 = vcmp.lt.s32.totalorder %v9673_v14, 15  ;;  %4772 = vmatmul.mubr.msk.f32.gmra.mrb[108].mxu0 %vm2045_vm15, %v9505_v31  ;;  %v9679_v30 = vshra.s32 %v9678_v18, 4  ;;  %v9682_v31 = vld [vmem:[#allocation55_spill] sm:$0xff]  ;;  %v9760_v14 = vld [vmem:[#allocation72_spill] sm:$0xff]  ;;  %v9761_v18 = vld [vmem:[#allocation121_spill] sm:$0xff] }
 0x2ac   : > { %4774 = vmatprep.mubr.msk.f32.mxu0 %vm7924_vm10, %v9509_v41  ;;  %vm2047_vm14 = vmand %vm7930_vm0, %vm9676_vm11  ;;  %v9683_v54 = vshra.s32 %v9682_v31, 4  ;;  %v9765_v31 = vld [vmem:[#allocation167_spill] sm:$0xff]  ;;  %v3795_v41 = vld [vmem:[#allocation9 + $0x38] sm:$0xff] }
 0x2ad   : > { %4416 = vmatmul.mubr.msk.f32.gmra.mrb[54].mxu1 %vm7822_vm13, %v9593_v7  ;;  %vm7954_vm13 = vcmp.lt.s32.totalorder %v9679_v30, 15  ;;  %v9764_v30 = vld [vmem:[#allocation64_spill] sm:$0xff]  ;;  %v3796_v7 = vld [vmem:[#allocation9 + $0x40] sm:$0xff] }
 0x2ae   : > { %4417 = vmatprep.mubr.msk.f32.mxu1 %vm7846_vm4, %v9421_v45  ;;  %vm7960_vm1 = vcmp.lt.s32.totalorder %v9683_v54, 15  ;;  %vm9686_vm4 = vnez %v9514_v58  ;;  %v9687_v45 = vld [vmem:[#allocation59_spill] sm:$0xff]  ;;  %v9766_v54 = vshra.s32 %v9765_v31, 4 }
 0x2af   : > { %4775 = vmatmul.mubr.msk.f32.gmra.mrb[110].mxu0 %vm2047_vm14, %v9513_v5  ;;  %vm2049_vm5 = vmand %vm7960_vm1, %vm9686_vm4  ;;  %v9688_v61 = vshra.s32 %v9687_v45, 4  ;;  %vm9695_vm14 = vnez %v9523_v11 }
 0x2b0   : > { %4777 = vmatprep.mubr.msk.f32.mxu0 %vm7954_vm13, %v9518_v55  ;;  %v3800_v55 = vld [vmem:[#allocation9 + $0x60] sm:$0xff] }
 0x2b1   : > { %4418 = vmatmul.mubr.msk.f32.gmra.mrb[56].mxu1 %vm1752_vm2, %v9598_v35  ;;  %vm7978_vm15 = vcmp.lt.s32.totalorder %v9688_v61, 15  ;;  %v9691_v35 = vld [vmem:[#allocation62_spill] sm:$0xff]  ;;  %vm9696_vm2 = vnez %v9599_v39  ;;  %v9769_v61 = vld [vmem:[#allocation173_spill] sm:$0xff] }
 0x2b2   : > { %4419 = vmatprep.mubr.msk.f32.mxu1 %vm7852_vm3, %v9432_v56  ;;  %v9692_v5 = vshra.s32 %v9691_v35, 4  ;;  %vm1754_vm4 = vmand %vm7870_vm8, %vm9696_vm2  ;;  %v9697_v56 = vld [vmem:[#allocation67_spill] sm:$0xff]  ;;  %v9707_v39 = vld [vmem:[#allocation78_spill] sm:$0xff]  ;;  %v9770_v35 = vshra.s32 %v9769_v61, 4 }
 0x2b3   : > { %4778 = vmatmul.mubr.msk.f32.gmra.mrb[112].mxu0 %vm2049_vm5, %v9522_v37  ;;  %v9698_v58 = vshra.s32 %v9697_v56, 4  ;;  %v9701_v37 = vld [vmem:[#allocation75_spill] sm:$0xff]  ;;  %v9804_v61 = vld [vmem:[#allocation141_spill] sm:$0xff] }
 0x2b4   : > { %vm7984_vm11 = vcmp.lt.s32.totalorder %v9692_v5, 15  ;;  %4780 = vmatprep.mubr.msk.f32.mxu0 %vm7978_vm15, %v9525_v38  ;;  %v9702_v11 = vshra.s32 %v9701_v37, 4  ;;  %v9703_v38 = vmov 0  ;;  %v9773_v56 = vld [vmem:[#allocation83_spill] sm:$0xff]  ;;  %v9775_v37 = vld [vmem:[#allocation184_spill] sm:$0xff] }
 0x2b5   : > { %4420 = vmatmul.mubr.msk.f32.gmra.mrb[58].mxu1 %vm7852_vm3, %v9606_v36  ;;  %vm2051_vm12 = vmand %vm7984_vm11, %vm9695_vm14  ;;  %vm8008_vm3 = vcmp.lt.s32.totalorder %v9698_v58, 15  ;;  %v9708_v36 = vshra.s32 %v9707_v39, 4  ;;  %v9774_v58 = vld [vmem:[#allocation21_spill] sm:$0xff]  ;;  %v9777_v39 = vld [vmem:[#allocation71_spill] sm:$0xff] }
 0x2b6   : > { %4421 = vmatprep.mubr.msk.f32.mxu1 %vm7870_vm8, %v9438_v27  ;;  %vm8014_vm5 = vcmp.lt.s32.totalorder %v9702_v11, 15  ;;  %v9705_v27 = vld [vmem:[#allocation47_spill] sm:$0xff]  ;;  %vm9706_vm8 = vnez %v9530_v62  ;;  %v9716_v62 = vld [vmem:[#allocation113_spill] sm:$0xff] }
 0x2b7   : > { %v9704_v38 = vsel %vm8014_vm5, 4294967295, %v9703_v38  ;;  %4781 = vmatmul.mubr.msk.f32.gmra.mrb[114].mxu0 %vm2051_vm12, %v9529_v26  ;;  %vm2053_vm14 = vmand %vm8014_vm5, %vm9706_vm8  ;;  %vm8032_vm2 = vcmp.lt.s32.totalorder %v9708_v36, 15  ;;  %v9711_v26 = vld [vmem:[#allocation85_spill] sm:$0xff]  ;;  %vm9720_vm5 = vnez %v9719_v6  ;;  %v9780_v36 = vld [vmem:[#allocation22_spill] sm:$0xff] }
 0x2b8   : > { %4783 = vmatprep.mubr.msk.f32.mxu0 %vm8008_vm3, %v9536_v59  ;;  %v9710_v52 = vsel %vm8032_vm2, 4294967295, %v9709_v52  ;;  %v9712_v8 = vshra.s32 %v9711_v26, 4  ;;  %v9715_v59 = vld [vmem:[#allocation51_spill] sm:$0xff]  ;;  %v3788_v11 = vld [vmem:[#allocation9] sm:$0xff]  ;;  %v9781_v26 = vld [vmem:[#allocation88_spill] sm:$0xff] }
 0x2b9   : > { %4422 = vmatmul.mubr.msk.f32.gmra.mrb[60].mxu1 %vm1754_vm4, %v9705_v27  ;;  %vm9717_vm4 = vnez %v9716_v62  ;;  %v3789_v27 = vld [vmem:[#allocation9 + $0x8] sm:$0xff] }
 0x2ba   : > { %4423 = vmatprep.mubr.msk.f32.mxu1 %vm7876_vm6, %v9447_v17  ;;  %vm8038_vm12 = vcmp.lt.s32.totalorder %v9712_v8, 15  ;;  %v9718_v17 = vld [vmem:[#allocation46_spill] sm:$0xff]  ;;  %v5137_v49 = vpack.c.bf16 %v3789_v27, %v3788_v11  ;;  %v3790_v8 = vld [vmem:[#allocation9 + $0x10] sm:$0xff]  ;;  %v9808_v11 = vld [vmem:[#allocation149_spill] sm:$0xff] }
 0x2bb   : > { %4784 = vmatmul.mubr.msk.f32.gmra.mrb[116].mxu0 %vm2053_vm14, %v9544_v63  ;;  %vm2055_vm8 = vmand %vm8038_vm12, %vm9717_vm4  ;;  %v9721_v63 = vld [vmem:[#allocation93_spill] sm:$0xff]  ;;  %vm8086_vm4 = vcmp.lt.s32.totalorder %v9736_v9, 15  ;;  %v9782_v62 = vld [vmem:[#allocation82_spill] sm:$0xff] }
 0x2bc   : > { %4786 = vmatprep.mubr.msk.f32.mxu0 %vm8032_vm2, %v9551_v46  ;;  %vm1756_vm14 = vmand %vm7900_vm9, %vm9720_vm5  ;;  %v9722_v57 = vshra.s32 %v9721_v63, 4  ;;  %v9725_v46 = vld [vmem:[#allocation106_spill] sm:$0xff]  ;;  %v9738_v32 = vsel %vm8086_vm4, 4294967295, %v9737_v32  ;;  %5138 = vmatprep.subr.bf16.mxu0 %v5137_v49  ;;  %v9790_v9 = vld [vmem:[#allocation104_spill] sm:$0xff] }
 0x2bd   : > { %4424 = vmatmul.mubr.msk.f32.gmra.mrb[62].mxu1 %vm7876_vm6, %v9715_v59  ;;  %v9726_v2 = vshra.s32 %v9725_v46, 4  ;;  %5140 = vmatpush3.bf16.msra.mxu0 %v5137_v49  ;;  %v3791_v59 = vld [vmem:[#allocation9 + $0x18] sm:$0xff]  ;;  %v9783_v6 = vld [vmem:[#allocation98_spill] sm:$0xff]  ;;  %v9785_v46 = vld [vmem:[#allocation73_spill] sm:$0xff] }
 0x2be   : > { %4425 = vmatprep.mubr.msk.f32.mxu1 %vm7900_vm9, %v9718_v17  ;;  %vm8062_vm6 = vcmp.lt.s32.totalorder %v9722_v57, 15  ;;  %vm9733_vm9 = vnez %v9732_v29  ;;  %v5141_v17 = vpack.c.bf16 %v3791_v59, %v3790_v8  ;;  %v3793_v63 = vld [vmem:[#allocation9 + $0x28] sm:$0xff]  ;;  %v9784_v57 = vld [vmem:[#allocation87_spill] sm:$0xff]  ;;  %v9816_v8 = vld [vmem:[#allocation101_spill] sm:$0xff] }
 0x2bf   : > { %vm8068_vm2 = vcmp.lt.s32.totalorder %v9726_v2, 15  ;;  %4787 = vmatmul.mubr.msk.f32.gmra.mrb[118].mxu0 %vm2055_vm8, %v9729_v33  ;;  %vm8092_vm8 = vcmp.lt.s32.totalorder %v9740_v51, 15  ;;  %v5145_v2 = vpack.c.bf16 %v3793_v63, %v3792_v22  ;;  %v9787_v33 = vld [vmem:[#allocation105_spill] sm:$0xff]  ;;  %v5153_v51 = vpack.c.bf16 %v3797_v21, %v3796_v7  ;;  %v9821_v63 = vld [vmem:[#allocation119_spill] sm:$0xff] }
 0x2c0   : > { %v9728_v4 = vsel %vm8068_vm2, 4294967295, %v9727_v4  ;;  %4789 = vmatprep.mubr.msk.f32.mxu0 %vm8062_vm6, %v9731_v0  ;;  %vm2057_vm5 = vmand %vm8068_vm2, %vm9733_vm9  ;;  %vm9750_vm2 = vnez %v9749_v47  ;;  %5142 = vmatprep.subr.bf16.mxu0 %v5141_v17  ;;  %v9788_v0 = vld [vmem:[#allocation96_spill] sm:$0xff]  ;;  %v3801_v47 = vld [vmem:[#allocation9 + $0x68] sm:$0xff] }
 0x2c1   : > { %4426 = vmatmul.mubr.msk.f32.gmra.mrb[0].mxu1 %vm1756_vm14, %v9730_v48  ;;  %vm9747_vm14 = vnez %v9746_v40  ;;  %5144 = vmatpush3.bf16.msra.mxu0 %v5141_v17  ;;  %v3794_v48 = vld [vmem:[#allocation9 + $0x30] sm:$0xff]  ;;  %v5161_v12 = vpack.c.bf16 %v3801_v47, %v3800_v55 }
 0x2c2   : > { %4427 = vmatprep.mubr.msk.f32.mxu1 %vm7906_vm7, %v9734_v23  ;;  %vm2059_vm9 = vmand %vm8092_vm8, %vm9747_vm14  ;;  %vm8140_vm14 = vcmp.lt.s32.totalorder %v9766_v54, 15  ;;  %5146 = vmatprep.subr.bf16.mxu0 %v5145_v2  ;;  %v5149_v29 = vpack.c.bf16 %v3795_v41, %v3794_v48  ;;  %v9789_v23 = vld [vmem:[#allocation115_spill] sm:$0xff]  ;;  %v9827_v41 = vld [vmem:[#allocation129_spill] sm:$0xff] }
 0x2c3   : > { %4790 = vmatmul.mubr.msk.f32.gmra.mrb[120].mxu0 %vm2057_vm5, %v9743_v3  ;;  %vm1758_vm5 = vmand %vm7924_vm10, %vm9750_vm2  ;;  %v9793_v3 = vld [vmem:[#allocation124_spill] sm:$0xff]  ;;  %v9818_v17 = vld [vmem:[#allocation111_spill] sm:$0xff] }
 0x2c4   : > { %4792 = vmatprep.mubr.msk.f32.mxu0 %vm8086_vm4, %v9745_v50  ;;  %vm8122_vm4 = vcmp.lt.s32.totalorder %v9756_v19, 15  ;;  %v9794_v50 = vld [vmem:[#allocation114_spill] sm:$0xff] }
 0x2c5   : > { %4428 = vmatmul.mubr.msk.f32.gmra.mrb[2].mxu1 %vm7906_vm7, %v9744_v44  ;;  %vm8116_vm7 = vcmp.lt.s32.totalorder %v9752_v25, 15  ;;  %5148 = vmatpush3.bf16.msra.mxu0 %v5145_v2  ;;  %v3798_v44 = vld [vmem:[#allocation9 + $0x50] sm:$0xff]  ;;  %v9799_v25 = vld [vmem:[#allocation102_spill] sm:$0xff]  ;;  %v9823_v2 = vld [vmem:[#allocation100_spill] sm:$0xff] }
 0x2c6   : > { %4429 = vmatprep.mubr.msk.f32.mxu1 %vm7924_vm10, %v9748_v53  ;;  %vm9763_vm10 = vnez %v9762_v60  ;;  %5150 = vmatprep.subr.bf16.mxu0 %v5149_v29  ;;  %v5157_v40 = vpack.c.bf16 %v3799_v28, %v3798_v44  ;;  %v9796_v53 = vld [vmem:[#allocation133_spill] sm:$0xff]  ;;  %v9802_v60 = vld [vmem:[#allocation132_spill] sm:$0xff] }
 0x2c7   : > { %4793 = vmatmul.mubr.msk.f32.gmra.mrb[122].mxu0 %vm2059_vm9, %v9759_v42  ;;  %vm2061_vm2 = vmand %vm8122_vm4, %vm9763_vm10  ;;  %vm8146_vm9 = vcmp.lt.s32.totalorder %v9770_v35, 15  ;;  %v9805_v35 = vld [vmem:[#allocation120_spill] sm:$0xff] }
 0x2c8   : > { %4795 = vmatprep.mubr.msk.f32.mxu0 %vm8116_vm7, %v9761_v18  ;;  %v3803_v18 = vld [vmem:[#allocation9 + $0x78] sm:$0xff] }
 0x2c9   : > { %4430 = vmatmul.mubr.msk.f32.gmra.mrb[4].mxu1 %vm1758_vm5, %v9760_v14  ;;  %vm9776_vm5 = vnez %v9775_v37  ;;  %5152 = vmatpush3.bf16.msra.mxu0 %v5149_v29  ;;  %v9801_v14 = vld [vmem:[#allocation142_spill] sm:$0xff]  ;;  %v9807_v37 = vld [vmem:[#allocation157_spill] sm:$0xff]  ;;  %v9828_v29 = vld [vmem:[#allocation147_spill] sm:$0xff] }
 0x2ca   : > { %4431 = vmatprep.mubr.msk.f32.mxu1 %vm7930_vm0, %v9764_v30  ;;  %vm2063_vm10 = vmand %vm8146_vm9, %vm9776_vm5  ;;  %5154 = vmatprep.subr.bf16.mxu0 %v5153_v51 }
 0x2cb   : > { %4796 = vmatmul.mubr.msk.f32.gmra.mrb[124].mxu0 %vm2061_vm2, %v9537_v34  ;;  %v9778_v34 = vld [vmem:[#allocation61_spill] sm:$0xff] }
 0x2cc   : > { %4798 = vmatprep.mubr.msk.f32.mxu0 %vm8140_vm14, %v9774_v58  ;;  %vm9779_vm2 = vnez %v9778_v34  ;;  %v9811_v34 = vld [vmem:[#allocation156_spill] sm:$0xff] }
 0x2cd   : > { %4432 = vmatmul.mubr.msk.f32.gmra.mrb[6].mxu1 %vm7930_vm0, %v9773_v56  ;;  %vm1760_vm0 = vmand %vm7954_vm13, %vm9779_vm2  ;;  %5156 = vmatpush3.bf16.msra.mxu0 %v5153_v51 }
 0x2ce   : > { %4433 = vmatprep.mubr.msk.f32.mxu1 %vm7954_vm13, %v9777_v39  ;;  %vm9786_vm13 = vnez %v9785_v46  ;;  %5158 = vmatprep.subr.bf16.mxu0 %v5157_v40  ;;  %v9810_v39 = vld [vmem:[#allocation166_spill] sm:$0xff]  ;;  %v9822_v46 = vld [vmem:[#allocation125_spill] sm:$0xff] }
 0x2cf   : > { %4799 = vmatmul.mubr.msk.f32.gmra.mrb[126].mxu0 %vm2063_vm10, %v9780_v36  ;;  %vm1762_vm5 = vmand %vm7978_vm15, %vm9786_vm13  ;;  %vm9800_vm10 = vnez %v9799_v25 }
 0x2d1   : > { %4434 = vmatmul.mubr.msk.f32.gmra.mrb[8].mxu1 %vm1760_vm0, %v9781_v26  ;;  %5160 = vmatpush3.bf16.msra.mxu0 %v5157_v40  ;;  %vm9806_vm0 = vnez %v9805_v35  ;;  %v9815_v26 = vld [vmem:[#allocation170_spill] sm:$0xff] }
 0x2d2   : > { %4435 = vmatprep.mubr.msk.f32.mxu1 %vm7960_vm1, %v9782_v62  ;;  %5162 = vmatprep.subr.bf16.mxu0 %v5161_v12  ;;  %vm1768_vm13 = vmand %vm8062_vm6, %vm9806_vm0  ;;  %v9817_v62 = vld [vmem:[#allocation177_spill] sm:$0xff] }
 0x2d5   : > { %4436 = vmatmul.mubr.msk.f32.gmra.mrb[10].mxu1 %vm7960_vm1, %v9783_v6  ;;  %vm9792_vm1 = vnez %v9791_v43  ;;  %5164 = vmatpush3.bf16.msra.mxu0 %v5161_v12 }
 0x2d6   : > { %4437 = vmatprep.mubr.msk.f32.mxu1 %vm7978_vm15, %v9784_v57  ;;  %vm1764_vm15 = vmand %vm8008_vm3, %vm9792_vm1 }
 0x2d9   : > { %4438 = vmatmul.mubr.msk.f32.gmra.mrb[12].mxu1 %vm1762_vm5, %v9787_v33  ;;  %vm9809_vm5 = vnez %v9728_v4 }
 0x2da   : > { %4439 = vmatprep.mubr.msk.f32.mxu1 %vm7984_vm11, %v9788_v0 }
 0x2dd   : > { %4440 = vmatmul.mubr.msk.f32.gmra.mrb[14].mxu1 %vm7984_vm11, %v9789_v23  ;;  %vm9795_vm11 = vnez %v9704_v38  ;;  %v3802_v38 = vld [vmem:[#allocation9 + $0x70] sm:$0xff] }
 0x2de   : > { %4441 = vmatprep.mubr.msk.f32.mxu1 %vm8008_vm3, %v9790_v9  ;;  %vm9798_vm3 = vnez %v9710_v52  ;;  %v5165_v30 = vpack.c.bf16 %v3803_v18, %v3802_v38  ;;  %v9803_v52 = vld [vmem:[#allocation150_spill] sm:$0xff] }
 0x2df   : > { %vm1766_vm2 = vmand %vm9798_vm3, %vm9800_vm10 }
 0x2e0   : > { %5166 = vmatprep.subr.bf16.mxu0 %v5165_v30 }
 0x2e1   : > { %4442 = vmatmul.mubr.msk.f32.gmra.mrb[16].mxu1 %vm1764_vm15, %v9793_v3  ;;  %5168 = vmatpush3.bf16.msra.mxu0 %v5165_v30 }
 0x2e2   : > { %4443 = vmatprep.mubr.msk.f32.mxu1 %vm9795_vm11, %v9794_v50 }
 0x2e5   : > { %4444 = vmatmul.mubr.msk.f32.gmra.mrb[18].mxu1 %vm9795_vm11, %v9796_v53 }
 0x2e6   : > { %4445 = vmatprep.mubr.msk.f32.mxu1 %vm9798_vm3, %v9797_v16  ;;  %v8211_v19 = vpop.f32.mrb[56].mxu0 }
 0x2e7   : > { %v2759_v42 = vpop.f32.mrb[57].mxu0 }
 0x2e9   : > { %4446 = vmatmul.mubr.msk.f32.gmra.mrb[20].mxu1 %vm1766_vm2, %v9801_v14 }
 0x2ea   : > { %4447 = vmatprep.mubr.msk.f32.mxu1 %vm8038_vm12, %v9802_v60  ;;  %v8217_v31 = vpop.f32.mrb[58].mxu0 }
 0x2eb   : > { %v2764_v54 = vpop.f32.mrb[59].mxu0 }
 0x2ed   : > { %4448 = vmatmul.mubr.msk.f32.gmra.mrb[22].mxu1 %vm8038_vm12, %v9803_v52  ;;  %vm9812_vm12 = vnez %v9738_v32  ;;  %v9819_v32 = vld [vmem:[#allocation163_spill] sm:$0xff] }
 0x2ee   : > { %4449 = vmatprep.mubr.msk.f32.mxu1 %vm8062_vm6, %v9804_v61  ;;  %v8229_v56 = vpop.f32.mrb[60].mxu0  ;;  %vm9814_vm6 = vnez %v9813_v15  ;;  %vm9820_vm15 = vnez %v9819_v32  ;;  %v8325_v32 = vld [vmem:[%s8597_s4] ss:$0 sm:$0xff] }
 0x2ef   : > { %v2769_v58 = vpop.f32.mrb[61].mxu0  ;;  %vm1770_vm1 = vmand %vm9812_vm12, %vm9814_vm6 }
 0x2f0   : > { %vm1772_vm11 = vmand %vm8116_vm7, %vm9820_vm15 }
 0x2f1   : > { %4450 = vmatmul.mubr.msk.f32.gmra.mrb[24].mxu1 %vm1768_vm13, %v9807_v37 }
 0x2f2   : > { %4451 = vmatprep.mubr.msk.f32.mxu1 %vm9809_vm5, %v9808_v11  ;;  %v8235_v10 = vpop.f32.mrb[62].mxu0 }
 0x2f3   : > { %v2774_v27 = vpop.f32.mrb[63].mxu0 }
 0x2f5   : > { %4452 = vmatmul.mubr.msk.f32.gmra.mrb[26].mxu1 %vm9809_vm5, %v9810_v39 }
 0x2f6   : > { %4453 = vmatprep.mubr.msk.f32.mxu1 %vm9812_vm12, %v9811_v34  ;;  %v8247_v49 = vpop.f32.mrb[64].mxu0 }
 0x2f7   : > { %v2779_v36 = vpop.f32.mrb[65].mxu0 }
 0x2f9   : > { %4454 = vmatmul.mubr.msk.f32.gmra.mrb[28].mxu1 %vm1770_vm1, %v9815_v26 }
 0x2fa   : > { %4455 = vmatprep.mubr.msk.f32.mxu1 %vm8092_vm8, %v9816_v8  ;;  %v8253_v4 = vpop.f32.mrb[66].mxu0 }
 0x2fb   : > { %v2784_v59 = vpop.f32.mrb[67].mxu0 }
 0x2fd   : > { %4456 = vmatmul.mubr.msk.f32.gmra.mrb[30].mxu1 %vm8092_vm8, %v9817_v62  ;;  %vm9825_vm8 = vnez %v9824_v1 }
 0x2fe   : > { %4457 = vmatprep.mubr.msk.f32.mxu1 %vm8116_vm7, %v9818_v17  ;;  %v8265_v6 = vpop.f32.mrb[68].mxu0  ;;  %vm1774_vm7 = vmand %vm8140_vm14, %vm9825_vm8 }
 0x2ff   : > { %v2789_v22 = vpop.f32.mrb[69].mxu0 }
 0x301   : > { %4458 = vmatmul.mubr.msk.f32.gmra.mrb[32].mxu1 %vm1772_vm11, %v9821_v63 }
 0x302   : > { %4459 = vmatprep.mubr.msk.f32.mxu1 %vm8122_vm4, %v9607_v24  ;;  %v8271_v20 = vpop.f32.mrb[70].mxu0  ;;  %v9826_v24 = vld [vmem:[#allocation136_spill] sm:$0xff] }
 0x303   : > { %v2794_v57 = vpop.f32.mrb[71].mxu0 }
 0x305   : > { %4460 = vmatmul.mubr.msk.f32.gmra.mrb[34].mxu1 %vm8122_vm4, %v9822_v46 }
 0x306   : > { %4461 = vmatprep.mubr.msk.f32.mxu1 %vm8140_vm14, %v9823_v2  ;;  %v8283_v33 = vpop.f32.mrb[72].mxu0 }
 0x307   : > { %v2799_v48 = vpop.f32.mrb[73].mxu0 }
 0x309   : > { %4462 = vmatmul.mubr.msk.f32.gmra.mrb[36].mxu1 %vm1774_vm7, %v9826_v24 }
 0x30a   : > { %4463 = vmatprep.mubr.msk.f32.mxu1 %vm8146_vm9, %v9827_v41  ;;  %v8289_v13 = vpop.f32.mrb[74].mxu0 }
 0x30b   : > { %v2804_v0 = vpop.f32.mrb[75].mxu0 }
 0x30d   : > { %4464 = vmatmul.mubr.msk.f32.gmra.mrb[38].mxu1 %vm8146_vm9, %v9828_v29 }
 0x30e   : > { %v8294_v23 = vpop.f32.mrb[76].mxu0 }
 0x30f   : > { %v2809_v45 = vpop.f32.mrb[77].mxu0 }
 0x312   : > { %v8296_v7 = vpop.f32.mrb[78].mxu0 }
 0x313   : > { %v2814_v21 = vpop.f32.mrb[79].mxu0 }
 0x316   : > { %v8298_v9 = vpop.f32.mrb[80].mxu0 }
 0x317   : > { %v2819_v43 = vpop.f32.mrb[81].mxu0 }
 0x31a   : > { %v8300_v51 = vpop.f32.mrb[82].mxu0 }
 0x31b   : > { %v2824_v3 = vpop.f32.mrb[83].mxu0 }
 0x31e   : > { %v8302_v44 = vpop.f32.mrb[84].mxu0 }
 0x31f   : > { %v2829_v28 = vpop.f32.mrb[85].mxu0 }
 0x322   : > { %v8304_v50 = vpop.f32.mrb[86].mxu0 }
 0x323   : > { %v2834_v40 = vpop.f32.mrb[87].mxu0 }
 0x326   : > { %v8306_v5 = vpop.f32.mrb[88].mxu0 }
 0x327   : > { %v2839_v53 = vpop.f32.mrb[89].mxu0 }
 0x32a   : > { %v8308_v55 = vpop.f32.mrb[90].mxu0 }
 0x32b   : > { %v2844_v47 = vpop.f32.mrb[91].mxu0 }
 0x32e   : > { %v8310_v16 = vpop.f32.mrb[92].mxu0 }
 0x32f   : > { %v2849_v25 = vpop.f32.mrb[93].mxu0 }
 0x332   : > { %v8312_v12 = vpop.f32.mrb[94].mxu0 }
 0x333   : > { %v2854_v42 = vpop.f32.mrb[95].mxu0 }
 0x336   : > { %v2922_v14 = vpop.f32.mrb[32].mxu0 }
 0x337   : > { %v2924_v38 = vpop.f32.mrb[33].mxu0  ;;  %v5201_v22 = vadd.f32 %v8325_v32, %v2922_v14 }
 0x33a   : > { %v2927_v18 = vpop.f32.mrb[34].mxu0 }
 0x33b   : > { %v2929_v60 = vpop.f32.mrb[35].mxu0  ;;  %v5203_v48 = vadd.f32 %v8325_v32, %v2927_v18 }
 0x33e   : > { %v2932_v30 = vpop.f32.mrb[36].mxu0 }
 0x33f   : > { %v2934_v54 = vpop.f32.mrb[37].mxu0  ;;  %v5205_v43 = vadd.f32 %v8325_v32, %v2932_v30 }
 0x342   : > { %v2937_v52 = vpop.f32.mrb[38].mxu0 }
 0x343   : > { %v2939_v61 = vpop.f32.mrb[39].mxu0  ;;  %v5207_v38 = vadd.f32 %v8325_v32, %v2937_v52 }
 0x346   : > { %v2942_v35 = vpop.f32.mrb[40].mxu0 }
 0x347   : > { %v2944_v58 = vpop.f32.mrb[41].mxu0  ;;  %v5209_v30 = vadd.f32 %v8325_v32, %v2942_v35 }
 0x34a   : > { %v2947_v37 = vpop.f32.mrb[42].mxu0 }
 0x34b   : > { %v2949_v11 = vpop.f32.mrb[43].mxu0  ;;  %v5211_v52 = vadd.f32 %v8325_v32, %v2947_v37 }
 0x34e   : > { %v2952_v27 = vpop.f32.mrb[44].mxu0 }
 0x34f   : > { %v2954_v39 = vpop.f32.mrb[45].mxu0  ;;  %v5213_v35 = vadd.f32 %v8325_v32, %v2952_v27 }
 0x352   : > { %v8314_v34 = vpop.f32.mrb[46].mxu0 }
 0x353   : > { %v2959_v15 = vpop.f32.mrb[47].mxu0  ;;  %v5215_v37 = vadd.f32 %v8325_v32, %v8314_v34 }
 0x356   : > { %v8316_v36 = vpop.f32.mrb[48].mxu0 }
 0x357   : > { %v2964_v26 = vpop.f32.mrb[49].mxu0  ;;  %v5217_v27 = vadd.f32 %v8325_v32, %v8316_v36 }
 0x35a   : > { %v8318_v8 = vpop.f32.mrb[50].mxu0 }
 0x35b   : > { %v2969_v59 = vpop.f32.mrb[51].mxu0 }
 0x35e   : > { %v8320_v62 = vpop.f32.mrb[52].mxu0 }
 0x35f   : > { %v2974_v17 = vpop.f32.mrb[53].mxu0 }
 0x362   : > { %v8328_v63 = vpop.f32.mrb[54].mxu0 }
 0x363   : > { %v2979_v57 = vpop.f32.mrb[55].mxu0 }
 0x364   : > { %v3372_v46 = vpop.f32.mrb[40].mxu1 }
 0x365   : > { %v5202_v2 = vadd.f32 %v5201_v22, %v3372_v46  ;;  %v3374_v1 = vpop.f32.mrb[41].mxu1 }
 0x366   : > { %v4755_v24 = vpop.f32.mrb[96].mxu0 }
 0x367   : > { %v3597_v0 = vpop.f32.mrb[97].mxu0 }
 0x368   : > { %v3377_v41 = vpop.f32.mrb[42].mxu1  ;;  %v3598_v45 = vadd.f32 %v5202_v2, %v3597_v0 }
 0x369   : > { %v5204_v29 = vadd.f32 %v5203_v48, %v3377_v41  ;;  %v3379_v21 = vpop.f32.mrb[43].mxu1 }
 0x36a   : > { %v3756_v28 = vmax.f32 %v3598_v45, 0.0  ;;  %v4758_v40 = vpop.f32.mrb[98].mxu0 }
 0x36b   : > { %v3603_v3 = vadd.f32 %v5204_v29, %v4755_v24  ;;  %v3607_v47 = vpop.f32.mrb[99].mxu0 }
 0x36c   : > { %v3382_v53 = vpop.f32.mrb[44].mxu1  ;;  %4833 = vmatprep.mubr.f32.mxu0 %v3756_v28 }
 0x36d   : > { %v3757_v25 = vmax.f32 %v3603_v3, 0.0  ;;  %v5206_v42 = vadd.f32 %v5205_v43, %v3382_v53  ;;  %v3384_v14 = vpop.f32.mrb[45].mxu1 }
 0x36e   : > { %v4761_v60 = vpop.f32.mrb[100].mxu0 }
 0x36f   : > { %v3608_v18 = vadd.f32 %v5206_v42, %v3607_v47  ;;  %4834 = vmatmul.mubr.f32.vlgmr.msra.gmra.mrb[128].mxu0 %v3757_v25  ;;  %v3617_v61 = vpop.f32.mrb[101].mxu0 }
 0x370   : > { %v3387_v54 = vpop.f32.mrb[46].mxu1 }
 0x371   : > { %v3758_v58 = vmax.f32 %v3608_v18, 0.0  ;;  %v5208_v11 = vadd.f32 %v5207_v38, %v3387_v54  ;;  %v3389_v39 = vpop.f32.mrb[47].mxu1 }
 0x372   : > { %v4764_v26 = vpop.f32.mrb[102].mxu0 }
 0x373   : > { %v3613_v15 = vadd.f32 %v5208_v11, %v4758_v40  ;;  %4836 = vmatprep.mubr.f32.mxu0 %v3758_v58  ;;  %v3627_v17 = vpop.f32.mrb[103].mxu0 }
 0x374   : > { %v3392_v59 = vpop.f32.mrb[48].mxu1 }
 0x375   : > { %v3759_v22 = vmax.f32 %v3613_v15, 0.0  ;;  %v5210_v57 = vadd.f32 %v5209_v30, %v3392_v59  ;;  %v3394_v46 = vpop.f32.mrb[49].mxu1  ;;  %v5219_v15 = vadd.f32 %v8325_v32, %v8318_v8 }
 0x376   : > { %v4767_v1 = vpop.f32.mrb[104].mxu0 }
 0x377   : > { %v3618_v2 = vadd.f32 %v5210_v57, %v3617_v61  ;;  %4837 = vmatmul.mubr.f32.gmra.mrb[130].mxu0 %v3759_v22  ;;  %v3637_v24 = vpop.f32.mrb[105].mxu0 }
 0x378   : > { %v3397_v48 = vpop.f32.mrb[50].mxu1 }
 0x379   : > { %v3760_v41 = vmax.f32 %v3618_v2, 0.0  ;;  %v5212_v0 = vadd.f32 %v5211_v52, %v3397_v48  ;;  %v3399_v29 = vpop.f32.mrb[51].mxu1  ;;  %v5221_v52 = vadd.f32 %v8325_v32, %v8320_v62 }
 0x37a   : > { %v4770_v21 = vpop.f32.mrb[106].mxu0 }
 0x37b   : > { %v3623_v45 = vadd.f32 %v5212_v0, %v4761_v60  ;;  %4839 = vmatprep.mubr.f32.mxu0 %v3760_v41  ;;  %v3647_v3 = vpop.f32.mrb[107].mxu0 }
 0x37c   : > { %v3402_v43 = vpop.f32.mrb[52].mxu1 }
 0x37d   : > { %v3761_v28 = vmax.f32 %v3623_v45, 0.0  ;;  %v5214_v40 = vadd.f32 %v5213_v35, %v3402_v43  ;;  %v3404_v53 = vpop.f32.mrb[53].mxu1  ;;  %v5223_v35 = vadd.f32 %v8325_v32, %v8328_v63 }
 0x37e   : > { %v4773_v25 = vpop.f32.mrb[108].mxu0 }
 0x37f   : > { %v3628_v47 = vadd.f32 %v5214_v40, %v3627_v17  ;;  %4840 = vmatmul.mubr.f32.gmra.mrb[132].mxu0 %v3761_v28  ;;  %v3657_v14 = vpop.f32.mrb[109].mxu0 }
 0x380   : > { %v3407_v42 = vpop.f32.mrb[54].mxu1 }
 0x381   : > { %v3762_v38 = vmax.f32 %v3628_v47, 0.0  ;;  %v5216_v18 = vadd.f32 %v5215_v37, %v3407_v42  ;;  %v3409_v54 = vpop.f32.mrb[55].mxu1  ;;  %v2758_v37 = vadd.f32 %v8325_v32, %v8211_v19 }
 0x382   : > { %v8340_v61 = vpop.f32.mrb[110].mxu0 }
 0x383   : > { %v3633_v60 = vadd.f32 %v5216_v18, %v4764_v26  ;;  %4842 = vmatprep.mubr.f32.mxu0 %v3762_v38  ;;  %v3667_v11 = vpop.f32.mrb[111].mxu0 }
 0x384   : > { %v3412_v58 = vpop.f32.mrb[56].mxu1 }
 0x385   : > { %v3763_v39 = vmax.f32 %v3633_v60, 0.0  ;;  %v5218_v30 = vadd.f32 %v5217_v27, %v3412_v58  ;;  %v3414_v34 = vpop.f32.mrb[57].mxu1  ;;  %v2763_v27 = vadd.f32 %v8325_v32, %v8217_v31 }
 0x386   : > { %v8344_v17 = vpop.f32.mrb[112].mxu0 }
 0x387   : > { %v3638_v59 = vadd.f32 %v5218_v30, %v3637_v24  ;;  %4843 = vmatmul.mubr.f32.gmra.mrb[134].mxu0 %v3763_v39  ;;  %v8346_v57 = vpop.f32.mrb[113].mxu0 }
 0x388   : > { %v3417_v22 = vpop.f32.mrb[58].mxu1 }
 0x389   : > { %v3764_v36 = vmax.f32 %v3638_v59, 0.0  ;;  %v5220_v26 = vadd.f32 %v5219_v15, %v3417_v22  ;;  %v3419_v46 = vpop.f32.mrb[59].mxu1  ;;  %v2768_v15 = vadd.f32 %v8325_v32, %v8229_v56 }
 0x38a   : > { %v8350_v48 = vpop.f32.mrb[114].mxu0 }
 0x38b   : > { %v3643_v2 = vadd.f32 %v5220_v26, %v4767_v1  ;;  %4845 = vmatprep.mubr.f32.mxu0 %v3764_v36  ;;  %v8352_v0 = vpop.f32.mrb[115].mxu0 }
 0x38c   : > { %v3422_v41 = vpop.f32.mrb[60].mxu1 }
 0x38d   : > { %v3765_v8 = vmax.f32 %v3643_v2, 0.0  ;;  %v5222_v24 = vadd.f32 %v5221_v52, %v3422_v41  ;;  %v3424_v29 = vpop.f32.mrb[61].mxu1  ;;  %v2773_v52 = vadd.f32 %v8325_v32, %v8235_v10 }
 0x38e   : > { %v8356_v43 = vpop.f32.mrb[116].mxu0 }
 0x38f   : > { %v3648_v45 = vadd.f32 %v5222_v24, %v3647_v3  ;;  %4846 = vmatmul.mubr.f32.gmra.mrb[136].mxu0 %v3765_v8  ;;  %v8358_v40 = vpop.f32.mrb[117].mxu0 }
 0x390   : > { %v3427_v28 = vpop.f32.mrb[62].mxu1 }
 0x391   : > { %v3766_v62 = vmax.f32 %v3648_v45, 0.0  ;;  %v5224_v1 = vadd.f32 %v5223_v35, %v3427_v28  ;;  %v3429_v53 = vpop.f32.mrb[63].mxu1  ;;  %v2778_v35 = vadd.f32 %v8325_v32, %v8247_v49 }
 0x392   : > { %v8362_v42 = vpop.f32.mrb[118].mxu0 }
 0x393   : > { %v3653_v47 = vadd.f32 %v5224_v1, %v4770_v21  ;;  %4848 = vmatprep.mubr.f32.mxu0 %v3766_v62  ;;  %v8364_v18 = vpop.f32.mrb[119].mxu0 }
 0x394   : > { %v3432_v38 = vpop.f32.mrb[0].mxu1 }
 0x395   : > { %v3767_v63 = vmax.f32 %v3653_v47, 0.0  ;;  %v5226_v3 = vadd.f32 %v3432_v38, %v2758_v37  ;;  %v3434_v54 = vpop.f32.mrb[1].mxu1  ;;  %v2783_v37 = vadd.f32 %v8325_v32, %v8253_v4  ;;  %v2793_v4 = vadd.f32 %v8325_v32, %v8271_v20 }
 0x396   : > { %v8368_v58 = vpop.f32.mrb[120].mxu0  ;;  %v2803_v20 = vadd.f32 %v8325_v32, %v8289_v13  ;;  %v2813_v13 = vadd.f32 %v8325_v32, %v8296_v7  ;;  %v2823_v7 = vadd.f32 %v8325_v32, %v8300_v51  ;;  %v2833_v51 = vadd.f32 %v8325_v32, %v8304_v50 }
 0x397   : > { %v3658_v60 = vadd.f32 %v5226_v3, %v3657_v14  ;;  %4849 = vmatmul.mubr.f32.gmra.mrb[138].mxu0 %v3767_v63  ;;  %v8370_v30 = vpop.f32.mrb[121].mxu0  ;;  %v2843_v50 = vadd.f32 %v8325_v32, %v8308_v55  ;;  %v2853_v55 = vadd.f32 %v8325_v32, %v8312_v12 }
 0x398   : > { %v3437_v39 = vpop.f32.mrb[2].mxu1 }
 0x399   : > { %v3768_v19 = vmax.f32 %v3658_v60, 0.0  ;;  %v5228_v21 = vadd.f32 %v3437_v39, %v2763_v27  ;;  %v3439_v34 = vpop.f32.mrb[3].mxu1 }
 0x39a   : > { %v8374_v22 = vpop.f32.mrb[122].mxu0 }
 0x39b   : > { %v3663_v59 = vadd.f32 %v5228_v21, %v4773_v25  ;;  %4851 = vmatprep.mubr.f32.mxu0 %v3768_v19  ;;  %v8376_v26 = vpop.f32.mrb[123].mxu0 }
 0x39c   : > { %v3442_v36 = vpop.f32.mrb[4].mxu1 }
 0x39d   : > { %v3769_v31 = vmax.f32 %v3663_v59, 0.0  ;;  %v5230_v14 = vadd.f32 %v3442_v36, %v2768_v15  ;;  %v3444_v46 = vpop.f32.mrb[5].mxu1 }
 0x39e   : > { %v8380_v41 = vpop.f32.mrb[124].mxu0 }
 0x39f   : > { %v3668_v2 = vadd.f32 %v5230_v14, %v3667_v11  ;;  %4852 = vmatmul.mubr.f32.gmra.mrb[140].mxu0 %v3769_v31  ;;  %v8382_v24 = vpop.f32.mrb[125].mxu0 }
 0x3a0   : > { %v3447_v8 = vpop.f32.mrb[6].mxu1 }
 0x3a1   : > { %v3770_v56 = vmax.f32 %v3668_v2, 0.0  ;;  %v5232_v25 = vadd.f32 %v3447_v8, %v2773_v52  ;;  %v3449_v29 = vpop.f32.mrb[7].mxu1 }
 0x3a2   : > { %v8387_v28 = vpop.f32.mrb[126].mxu0 }
 0x3a3   : > { %v3673_v45 = vadd.f32 %v5232_v25, %v8340_v61  ;;  %4854 = vmatprep.mubr.f32.mxu0 %v3770_v56  ;;  %v8389_v10 = vpop.f32.mrb[127].mxu0  ;;  %v2788_v61 = vadd.f32 %v8325_v32, %v8265_v6  ;;  %v2798_v6 = vadd.f32 %v8325_v32, %v8283_v33  ;;  %v2808_v33 = vadd.f32 %v8325_v32, %v8294_v23 }
 0x3a4   : > { %v3452_v62 = vpop.f32.mrb[8].mxu1  ;;  %v2818_v23 = vadd.f32 %v8325_v32, %v8298_v9  ;;  %v2828_v9 = vadd.f32 %v8325_v32, %v8302_v44  ;;  %v2838_v44 = vadd.f32 %v8325_v32, %v8306_v5  ;;  %v2848_v5 = vadd.f32 %v8325_v32, %v8310_v16 }
 0x3a5   : > { %v3771_v11 = vmax.f32 %v3673_v45, 0.0  ;;  %v5234_v1 = vadd.f32 %v3452_v62, %v2778_v35  ;;  %v3454_v53 = vpop.f32.mrb[9].mxu1 }
 0x3a7   : > { %v3678_v47 = vadd.f32 %v5234_v1, %v8346_v57  ;;  %4855 = vmatmul.mubr.f32.gmra.mrb[142].mxu0 %v3771_v11 }
 0x3a8   : > { %v3457_v38 = vpop.f32.mrb[10].mxu1 }
 0x3a9   : > { %v3772_v63 = vmax.f32 %v3678_v47, 0.0  ;;  %v5236_v49 = vadd.f32 %v3457_v38, %v2783_v37  ;;  %v3459_v3 = vpop.f32.mrb[11].mxu1 }
 0x3ab   : > { %v3683_v54 = vadd.f32 %v5236_v49, %v8344_v17  ;;  %4857 = vmatprep.mubr.f32.mxu0 %v3772_v63 }
 0x3ac   : > { %v3462_v27 = vpop.f32.mrb[12].mxu1 }
 0x3ad   : > { %v3773_v60 = vmax.f32 %v3683_v54, 0.0  ;;  %v5238_v39 = vadd.f32 %v3462_v27, %v2788_v61  ;;  %v3464_v19 = vpop.f32.mrb[13].mxu1 }
 0x3af   : > { %v3688_v57 = vadd.f32 %v5238_v39, %v8352_v0  ;;  %4858 = vmatmul.mubr.f32.gmra.mrb[144].mxu0 %v3773_v60 }
 0x3b0   : > { %v3467_v21 = vpop.f32.mrb[14].mxu1 }
 0x3b1   : > { %v3774_v34 = vmax.f32 %v3688_v57, 0.0  ;;  %v5240_v15 = vadd.f32 %v3467_v21, %v2793_v4  ;;  %v3469_v59 = vpop.f32.mrb[15].mxu1 }
 0x3b3   : > { %v3693_v17 = vadd.f32 %v5240_v15, %v8350_v48  ;;  %4860 = vmatprep.mubr.f32.mxu0 %v3774_v34 }
 0x3b4   : > { %v3472_v36 = vpop.f32.mrb[16].mxu1 }
 0x3b5   : > { %v3775_v31 = vmax.f32 %v3693_v17, 0.0  ;;  %v5242_v14 = vadd.f32 %v3472_v36, %v2798_v6  ;;  %v3474_v46 = vpop.f32.mrb[17].mxu1 }
 0x3b7   : > { %v3698_v0 = vadd.f32 %v5242_v14, %v8358_v40  ;;  %4861 = vmatmul.mubr.f32.gmra.mrb[146].mxu0 %v3775_v31 }
 0x3b8   : > { %v3477_v52 = vpop.f32.mrb[18].mxu1 }
 0x3b9   : > { %v3776_v2 = vmax.f32 %v3698_v0, 0.0  ;;  %v5244_v8 = vadd.f32 %v3477_v52, %v2803_v20  ;;  %v3479_v56 = vpop.f32.mrb[19].mxu1 }
 0x3bb   : > { %v3703_v48 = vadd.f32 %v5244_v8, %v8356_v43  ;;  %4863 = vmatprep.mubr.f32.mxu0 %v3776_v2 }
 0x3bc   : > { %v3482_v25 = vpop.f32.mrb[20].mxu1 }
 0x3bd   : > { %v3777_v29 = vmax.f32 %v3703_v48, 0.0  ;;  %v5246_v35 = vadd.f32 %v3482_v25, %v2808_v33  ;;  %v3484_v45 = vpop.f32.mrb[21].mxu1  ;;  %v8440_v25 = vld [vmem:[%s8599_s6] ss:$0 sm:$0xff] }
 0x3bf   : > { %v3708_v40 = vadd.f32 %v5246_v35, %v8364_v18  ;;  %4864 = vmatmul.mubr.f32.gmra.mrb[148].mxu0 %v3777_v29  ;;  %v5475_v35 = vld [vmem:[%s5958_s8 + $0x8] sm:$0xff] }
 0x3c0   : > { %v3487_v62 = vpop.f32.mrb[22].mxu1 }
 0x3c1   : > { %v3778_v11 = vmax.f32 %v3708_v40, 0.0  ;;  %v5248_v1 = vadd.f32 %v3487_v62, %v2813_v13  ;;  %v3489_v53 = vpop.f32.mrb[23].mxu1  ;;  %v5476_v13 = vld [vmem:[%s5958_s8] sm:$0xff] }
 0x3c3   : > { %v3713_v43 = vadd.f32 %v5248_v1, %v8362_v42  ;;  %4866 = vmatprep.mubr.f32.mxu0 %v3778_v11 }
 0x3c4   : > { %v3492_v37 = vpop.f32.mrb[24].mxu1 }
 0x3c5   : > { %v3779_v47 = vmax.f32 %v3713_v43, 0.0  ;;  %v5250_v38 = vadd.f32 %v3492_v37, %v2818_v23  ;;  %v3494_v63 = vpop.f32.mrb[25].mxu1  ;;  %v5477_v43 = vld [vmem:[%s5958_s8 + $0x18] sm:$0xff] }
 0x3c7   : > { %v3718_v18 = vadd.f32 %v5250_v38, %v8370_v30  ;;  %4867 = vmatmul.mubr.f32.gmra.mrb[150].mxu0 %v3779_v47  ;;  %v5478_v47 = vld [vmem:[%s5958_s8 + $0x10] sm:$0xff] }
 0x3c8   : > { %v3497_v49 = vpop.f32.mrb[26].mxu1 }
 0x3c9   : > { %v3780_v3 = vmax.f32 %v3718_v18, 0.0  ;;  %v5252_v61 = vadd.f32 %v3497_v49, %v2823_v7  ;;  %v3499_v54 = vpop.f32.mrb[27].mxu1 }
 0x3ca   : > { %v5479_v54 = vld [vmem:[%s5958_s8 + $0x28] sm:$0xff] }
 0x3cb   : > { %v3723_v42 = vadd.f32 %v5252_v61, %v8368_v58  ;;  %4869 = vmatprep.mubr.f32.mxu0 %v3780_v3 }
 0x3cc   : > { %v3502_v27 = vpop.f32.mrb[28].mxu1 }
 0x3cd   : > { %v3781_v60 = vmax.f32 %v3723_v42, 0.0  ;;  %v5254_v39 = vadd.f32 %v3502_v27, %v2828_v9  ;;  %v3504_v19 = vpop.f32.mrb[29].mxu1  ;;  %v5480_v42 = vld [vmem:[%s5958_s8 + $0x20] sm:$0xff] }
 0x3cf   : > { %v3728_v30 = vadd.f32 %v5254_v39, %v8376_v26  ;;  %4870 = vmatmul.mubr.f32.gmra.mrb[152].mxu0 %v3781_v60 }
 0x3d0   : > { %v3507_v4 = vpop.f32.mrb[30].mxu1 }
 0x3d1   : > { %v3782_v57 = vmax.f32 %v3728_v30, 0.0  ;;  %v5256_v21 = vadd.f32 %v3507_v4, %v2833_v51  ;;  %v3509_v34 = vpop.f32.mrb[31].mxu1 }
 0x3d2   : > { %v5482_v34 = vld [vmem:[%s5958_s8 + $0x30] sm:$0xff] }
 0x3d3   : > { %v3733_v58 = vadd.f32 %v5256_v21, %v8374_v22  ;;  %4872 = vmatprep.mubr.f32.mxu0 %v3782_v57  ;;  %v5481_v57 = vld [vmem:[%s5958_s8 + $0x38] sm:$0xff] }
 0x3d4   : > { %v3512_v15 = vpop.f32.mrb[32].mxu1 }
 0x3d5   : > { %v3783_v59 = vmax.f32 %v3733_v58, 0.0  ;;  %v5258_v6 = vadd.f32 %v3512_v15, %v2838_v44  ;;  %v3514_v17 = vpop.f32.mrb[33].mxu1 }
 0x3d7   : > { %v3738_v26 = vadd.f32 %v5258_v6, %v8382_v24  ;;  %4873 = vmatmul.mubr.f32.gmra.mrb[154].mxu0 %v3783_v59 }
 0x3d8   : > { %v3517_v36 = vpop.f32.mrb[34].mxu1 }
 0x3d9   : > { %v3784_v31 = vmax.f32 %v3738_v26, 0.0  ;;  %v5260_v14 = vadd.f32 %v3517_v36, %v2843_v50  ;;  %v3519_v46 = vpop.f32.mrb[35].mxu1  ;;  %v5483_v26 = vld [vmem:[%s5958_s8 + $0x48] sm:$0xff] }
 0x3db   : > { %v3743_v22 = vadd.f32 %v5260_v14, %v8380_v41  ;;  %4875 = vmatprep.mubr.f32.mxu0 %v3784_v31  ;;  %v5484_v31 = vld [vmem:[%s5958_s8 + $0x40] sm:$0xff] }
 0x3dc   : > { %v3522_v20 = vpop.f32.mrb[36].mxu1 }
 0x3dd   : > { %v3785_v0 = vmax.f32 %v3743_v22, 0.0  ;;  %v5262_v52 = vadd.f32 %v3522_v20, %v2848_v5  ;;  %v3524_v2 = vpop.f32.mrb[37].mxu1 }
 0x3de   : > { %v5485_v2 = vld [vmem:[%s5958_s8 + $0x58] sm:$0xff] }
 0x3df   : > { %v3748_v24 = vadd.f32 %v5262_v52, %v8389_v10  ;;  %4876 = vmatmul.mubr.f32.gmra.mrb[156].mxu0 %v3785_v0 }
 0x3e0   : > { %v3527_v8 = vpop.f32.mrb[38].mxu1 }
 0x3e1   : > { %v3786_v56 = vmax.f32 %v3748_v24, 0.0  ;;  %v5264_v33 = vadd.f32 %v3527_v8, %v2853_v55  ;;  %v3529_v48 = vpop.f32.mrb[39].mxu1  ;;  %v5486_v24 = vld [vmem:[%s5958_s8 + $0x50] sm:$0xff] }
 0x3e3   : > { %v3753_v16 = vadd.f32 %v5264_v33, %v8387_v28  ;;  %4878 = vmatprep.mubr.f32.mxu0 %v3786_v56 }
 0x3e5   : > { %v3787_v41 = vmax.f32 %v3753_v16, 0.0 }
 0x3e7   : > { %4879 = vmatmul.mubr.f32.gmra.mrb[158].mxu0 %v3787_v41 }
 0x442   : > { %v4835_v12 = vpop.f32.mrb[128].mxu0 }
 0x443   : > { %v3883_v32 = vadd.f32 %v4835_v12, %v8440_v25  ;;  %v3877_v10 = vpop.f32.mrb[129].mxu0 }
 0x444   : > { %v3878_v29 = vadd.f32 %v8440_v25, %v3877_v10 }
 0x445   : > { %v4037_v45 = vadd.f32 %v5475_v35, %v3883_v32  ;;  %v5487_v32 = vld [vmem:[%s5958_s8 + $0x68] sm:$0xff] }
 0x446   : > { %v4036_v28 = vadd.f32 %v5476_v13, %v3878_v29  ;;  %v5488_v29 = vld [vmem:[%s5958_s8 + $0x60] sm:$0xff] }
 0x447   : > { %v4069_v40 = vmax.f32 %v4037_v45, 0.0 }
 0x448   : > { %v4068_v62 = vmax.f32 %v4036_v28, 0.0 }
 0x449   : > { %4101 = vst [vmem:[%s8448_s12 + $0x8] sm:$0xff] %v4069_v40 }
 0x44a   : > { %4100 = vst [vmem:[%s8448_s12] sm:$0xff] %v4068_v62  ;;  %v4838_v11 = vpop.f32.mrb[130].mxu0 }
 0x44b   : > { %v3893_v1 = vadd.f32 %v4838_v11, %v8440_v25  ;;  %v3887_v53 = vpop.f32.mrb[131].mxu0 }
 0x44c   : > { %v3888_v23 = vadd.f32 %v8440_v25, %v3887_v53 }
 0x44d   : > { %v4039_v37 = vadd.f32 %v5477_v43, %v3893_v1  ;;  %v5489_v1 = vld [vmem:[%s5958_s8 + $0x78] sm:$0xff] }
 0x44e   : > { %v4038_v38 = vadd.f32 %v5478_v47, %v3888_v23  ;;  %v5490_v23 = vld [vmem:[%s5958_s8 + $0x70] sm:$0xff] }
 0x44f   : > { %v4071_v63 = vmax.f32 %v4039_v37, 0.0 }
 0x450   : > { %v4070_v7 = vmax.f32 %v4038_v38, 0.0 }
 0x451   : > { %4103 = vst [vmem:[%s8448_s12 + $0x18] sm:$0xff] %v4071_v63 }
 0x452   : > { %4102 = vst [vmem:[%s8448_s12 + $0x10] sm:$0xff] %v4070_v7  ;;  %v4841_v18 = vpop.f32.mrb[132].mxu0 }
 0x453   : > { %v3903_v49 = vadd.f32 %v4841_v18, %v8440_v25  ;;  %v3897_v3 = vpop.f32.mrb[133].mxu0 }
 0x454   : > { %v3898_v61 = vadd.f32 %v8440_v25, %v3897_v3 }
 0x455   : > { %v4041_v9 = vadd.f32 %v5479_v54, %v3903_v49  ;;  %v5491_v49 = vld [vmem:[%s5958_s8 + $0x88] sm:$0xff] }
 0x456   : > { %v4040_v27 = vadd.f32 %v5480_v42, %v3898_v61  ;;  %v5492_v61 = vld [vmem:[%s5958_s8 + $0x80] sm:$0xff] }
 0x457   : > { %v4073_v60 = vmax.f32 %v4041_v9, 0.0 }
 0x458   : > { %v4072_v39 = vmax.f32 %v4040_v27, 0.0 }
 0x459   : > { %4105 = vst [vmem:[%s8448_s12 + $0x28] sm:$0xff] %v4073_v60 }
 0x45a   : > { %4104 = vst [vmem:[%s8448_s12 + $0x20] sm:$0xff] %v4072_v39  ;;  %v4844_v19 = vpop.f32.mrb[134].mxu0 }
 0x45b   : > { %v3913_v51 = vadd.f32 %v4844_v19, %v8440_v25  ;;  %v3907_v30 = vpop.f32.mrb[135].mxu0 }
 0x45c   : > { %v3908_v4 = vadd.f32 %v8440_v25, %v3907_v30 }
 0x45d   : > { %v4043_v21 = vadd.f32 %v5481_v57, %v3913_v51  ;;  %v5493_v51 = vld [vmem:[%s5958_s8 + $0x98] sm:$0xff] }
 0x45e   : > { %v4042_v44 = vadd.f32 %v5482_v34, %v3908_v4  ;;  %v5494_v4 = vld [vmem:[%s5958_s8 + $0x90] sm:$0xff] }
 0x45f   : > { %v4075_v58 = vmax.f32 %v4043_v21, 0.0 }
 0x460   : > { %v4074_v15 = vmax.f32 %v4042_v44, 0.0 }
 0x461   : > { %4107 = vst [vmem:[%s8448_s12 + $0x38] sm:$0xff] %v4075_v58 }
 0x462   : > { %4106 = vst [vmem:[%s8448_s12 + $0x30] sm:$0xff] %v4074_v15  ;;  %v4847_v59 = vpop.f32.mrb[136].mxu0 }
 0x463   : > { %v3923_v6 = vadd.f32 %v4847_v59, %v8440_v25  ;;  %v3917_v17 = vpop.f32.mrb[137].mxu0 }
 0x464   : > { %v3918_v50 = vadd.f32 %v8440_v25, %v3917_v17 }
 0x465   : > { %v4045_v36 = vadd.f32 %v5483_v26, %v3923_v6  ;;  %v5495_v6 = vld [vmem:[%s5958_s8 + $0xa8] sm:$0xff] }
 0x466   : > { %v4044_v14 = vadd.f32 %v5484_v31, %v3918_v50  ;;  %v5496_v50 = vld [vmem:[%s5958_s8 + $0xa0] sm:$0xff] }
 0x467   : > { %v4077_v46 = vmax.f32 %v4045_v36, 0.0 }
 0x468   : > { %v4076_v5 = vmax.f32 %v4044_v14, 0.0 }
 0x469   : > { %4109 = vst [vmem:[%s8448_s12 + $0x48] sm:$0xff] %v4077_v46 }
 0x46a   : > { %4108 = vst [vmem:[%s8448_s12 + $0x40] sm:$0xff] %v4076_v5  ;;  %v4850_v22 = vpop.f32.mrb[138].mxu0 }
 0x46b   : > { %v3933_v20 = vadd.f32 %v4850_v22, %v8440_v25  ;;  %v3927_v0 = vpop.f32.mrb[139].mxu0 }
 0x46c   : > { %v3928_v52 = vadd.f32 %v8440_v25, %v3927_v0 }
 0x46d   : > { %v4047_v55 = vadd.f32 %v5485_v2, %v3933_v20  ;;  %v5497_v20 = vld [vmem:[%s5958_s8 + $0xb8] sm:$0xff] }
 0x46e   : > { %v4046_v8 = vadd.f32 %v5486_v24, %v3928_v52  ;;  %v5498_v52 = vld [vmem:[%s5958_s8 + $0xb0] sm:$0xff] }
 0x46f   : > { %v4079_v56 = vmax.f32 %v4047_v55, 0.0 }
 0x470   : > { %v4078_v33 = vmax.f32 %v4046_v8, 0.0 }
 0x471   : > { %4111 = vst [vmem:[%s8448_s12 + $0x58] sm:$0xff] %v4079_v56 }
 0x472   : > { %4110 = vst [vmem:[%s8448_s12 + $0x50] sm:$0xff] %v4078_v33  ;;  %v4853_v48 = vpop.f32.mrb[140].mxu0 }
 0x473   : > { %v3943_v16 = vadd.f32 %v4853_v48, %v8440_v25  ;;  %v3937_v41 = vpop.f32.mrb[141].mxu0 }
 0x474   : > { %v3938_v12 = vadd.f32 %v8440_v25, %v3937_v41 }
 0x475   : > { %v4049_v10 = vadd.f32 %v5487_v32, %v3943_v16  ;;  %v5499_v16 = vld [vmem:[%s5958_s8 + $0xc8] sm:$0xff] }
 0x476   : > { %v4048_v35 = vadd.f32 %v5488_v29, %v3938_v12  ;;  %v5500_v12 = vld [vmem:[%s5958_s8 + $0xc0] sm:$0xff] }
 0x477   : > { %v4081_v45 = vmax.f32 %v4049_v10, 0.0 }
 0x478   : > { %v4080_v13 = vmax.f32 %v4048_v35, 0.0 }
 0x479   : > { %4113 = vst [vmem:[%s8448_s12 + $0x68] sm:$0xff] %v4081_v45 }
 0x47a   : > { %4112 = vst [vmem:[%s8448_s12 + $0x60] sm:$0xff] %v4080_v13  ;;  %v4856_v28 = vpop.f32.mrb[142].mxu0 }
 0x47b   : > { %v3953_v40 = vadd.f32 %v4856_v28, %v8440_v25  ;;  %v3947_v62 = vpop.f32.mrb[143].mxu0 }
 0x47c   : > { %v3948_v11 = vadd.f32 %v8440_v25, %v3947_v62 }
 0x47d   : > { %v4051_v53 = vadd.f32 %v5489_v1, %v3953_v40  ;;  %v5501_v40 = vld [vmem:[%s5958_s8 + $0xd8] sm:$0xff] }
 0x47e   : > { %v4050_v43 = vadd.f32 %v5490_v23, %v3948_v11  ;;  %v5502_v11 = vld [vmem:[%s5958_s8 + $0xd0] sm:$0xff] }
 0x47f   : > { %v4083_v37 = vmax.f32 %v4051_v53, 0.0 }
 0x480   : > { %v4082_v47 = vmax.f32 %v4050_v43, 0.0 }
 0x481   : > { %4115 = vst [vmem:[%s8448_s12 + $0x78] sm:$0xff] %v4083_v37 }
 0x482   : > { %4114 = vst [vmem:[%s8448_s12 + $0x70] sm:$0xff] %v4082_v47  ;;  %v4859_v38 = vpop.f32.mrb[144].mxu0 }
 0x483   : > { %v3963_v63 = vadd.f32 %v4859_v38, %v8440_v25  ;;  %v3957_v7 = vpop.f32.mrb[145].mxu0 }
 0x484   : > { %v3958_v18 = vadd.f32 %v8440_v25, %v3957_v7 }
 0x485   : > { %v4053_v3 = vadd.f32 %v5491_v49, %v3963_v63  ;;  %v5503_v63 = vld [vmem:[%s5958_s8 + $0xe8] sm:$0xff] }
 0x486   : > { %v4052_v54 = vadd.f32 %v5492_v61, %v3958_v18  ;;  %v5504_v18 = vld [vmem:[%s5958_s8 + $0xe0] sm:$0xff] }
 0x487   : > { %v4085_v9 = vmax.f32 %v4053_v3, 0.0 }
 0x488   : > { %v4084_v42 = vmax.f32 %v4052_v54, 0.0 }
 0x489   : > { %4117 = vst [vmem:[%s8448_s12 + $0x88] sm:$0xff] %v4085_v9 }
 0x48a   : > { %4116 = vst [vmem:[%s8448_s12 + $0x80] sm:$0xff] %v4084_v42  ;;  %v4862_v27 = vpop.f32.mrb[146].mxu0 }
 0x48b   : > { %v3973_v60 = vadd.f32 %v4862_v27, %v8440_v25  ;;  %v3967_v39 = vpop.f32.mrb[147].mxu0 }
 0x48c   : > { %v3968_v19 = vadd.f32 %v8440_v25, %v3967_v39 }
 0x48d   : > { %v4055_v30 = vadd.f32 %v5493_v51, %v3973_v60  ;;  %v5505_v60 = vld [vmem:[%s5958_s8 + $0xf8] sm:$0xff] }
 0x48e   : > { %v4054_v57 = vadd.f32 %v5494_v4, %v3968_v19  ;;  %v5506_v19 = vld [vmem:[%s5958_s8 + $0xf0] sm:$0xff]  ;;  %s5704_s8 = smov [#allocation11]  }
 0x48f   : > { %v4087_v21 = vmax.f32 %v4055_v30, 0.0  ;;  %s5625_s30 = sshll.u32 %s5704_s8, 4  ;;  %s5626_s30 = int_to_ptr.vmem [resolvable:$false] %s5625_s30 }
 0x490   : > { %v4086_v34 = vmax.f32 %v4054_v57, 0.0  ;;  %s5627_s9 = scalar_lea.vmem %s5626_s30, 8192  ;;  %p5628_p12 = scmp.lt.s32.totalorder %s8547_s21, %s5626_s30 }
 0x491   : > { %4119 = vst [vmem:[%s8448_s12 + $0x98] sm:$0xff] %v4087_v21  ;;  %p5629_p1 = scmp.lt.s32.totalorder %s5627_s9, %s5621_s11 }
 0x492   : > { %4118 = vst [vmem:[%s8448_s12 + $0x90] sm:$0xff] %v4086_v34  ;;  %v4865_v44 = vpop.f32.mrb[148].mxu0 }
 0x493   : > { %v3983_v58 = vadd.f32 %v4865_v44, %v8440_v25  ;;  %v3977_v15 = vpop.f32.mrb[149].mxu0  ;;  %p5630_p2 = por %p5629_p1, %p5628_p12 }
 0x494   : > { %v3978_v59 = vadd.f32 %v8440_v25, %v3977_v15 }
 0x495   : > { %v4057_v17 = vadd.f32 %v5495_v6, %v3983_v58  ;;  %p5631_p4 = pnand %p5630_p2, %p5624_p7 }
 0x496   : > { %v4056_v26 = vadd.f32 %v5496_v50, %v3978_v59 }
 0x497   : > { %v4089_v36 = vmax.f32 %v4057_v17, 0.0 }
 0x498   : > { %v4088_v31 = vmax.f32 %v4056_v26, 0.0 }
 0x499   : > { %4121 = vst [vmem:[%s8448_s12 + $0xa8] sm:$0xff] %v4089_v36 }
 0x49a   : > { %4120 = vst [vmem:[%s8448_s12 + $0xa0] sm:$0xff] %v4088_v31  ;;  %v4868_v14 = vpop.f32.mrb[150].mxu0 }
 0x49b   : > { %v3993_v46 = vadd.f32 %v4868_v14, %v8440_v25  ;;  %v3987_v5 = vpop.f32.mrb[151].mxu0 }
 0x49c   : > { %v3988_v22 = vadd.f32 %v8440_v25, %v3987_v5 }
 0x49d   : > { %v4059_v0 = vadd.f32 %v5497_v20, %v3993_v46 }
 0x49e   : > { %v4058_v2 = vadd.f32 %v5498_v52, %v3988_v22 }
 0x49f   : > { %v4091_v55 = vmax.f32 %v4059_v0, 0.0 }
 0x4a0   : > { %v4090_v24 = vmax.f32 %v4058_v2, 0.0 }
 0x4a1   : > { %4123 = vst [vmem:[%s8448_s12 + $0xb8] sm:$0xff] %v4091_v55 }
 0x4a2   : > { %4122 = vst [vmem:[%s8448_s12 + $0xb0] sm:$0xff] %v4090_v24  ;;  %v4871_v8 = vpop.f32.mrb[152].mxu0 }
 0x4a3   : > { %v4003_v56 = vadd.f32 %v4871_v8, %v8440_v25  ;;  %v3997_v33 = vpop.f32.mrb[153].mxu0 }
 0x4a4   : > { %v3998_v48 = vadd.f32 %v8440_v25, %v3997_v33 }
 0x4a5   : > { %v4061_v41 = vadd.f32 %v5499_v16, %v4003_v56 }
 0x4a6   : > { %v4060_v32 = vadd.f32 %v5500_v12, %v3998_v48 }
 0x4a7   : > { %v4093_v10 = vmax.f32 %v4061_v41, 0.0 }
 0x4a8   : > { %v4092_v29 = vmax.f32 %v4060_v32, 0.0 }
 0x4a9   : > { %4125 = vst [vmem:[%s8448_s12 + $0xc8] sm:$0xff] %v4093_v10 }
 0x4aa   : > { %4124 = vst [vmem:[%s8448_s12 + $0xc0] sm:$0xff] %v4092_v29  ;;  %v4874_v35 = vpop.f32.mrb[154].mxu0 }
 0x4ab   : > { %v4013_v45 = vadd.f32 %v4874_v35, %v8440_v25  ;;  %v4007_v13 = vpop.f32.mrb[155].mxu0 }
 0x4ac   : > { %v4008_v28 = vadd.f32 %v8440_v25, %v4007_v13 }
 0x4ad   : > { %v4063_v62 = vadd.f32 %v5501_v40, %v4013_v45 }
 0x4ae   : > { %v4062_v1 = vadd.f32 %v5502_v11, %v4008_v28 }
 0x4af   : > { %v4095_v53 = vmax.f32 %v4063_v62, 0.0 }
 0x4b0   : > { %v4094_v23 = vmax.f32 %v4062_v1, 0.0 }
 0x4b1   : > { %4127 = vst [vmem:[%s8448_s12 + $0xd8] sm:$0xff] %v4095_v53 }
 0x4b2   : > { %4126 = vst [vmem:[%s8448_s12 + $0xd0] sm:$0xff] %v4094_v23  ;;  %v4877_v43 = vpop.f32.mrb[156].mxu0 }
 0x4b3   : > { %v4023_v37 = vadd.f32 %v4877_v43, %v8440_v25  ;;  %v4017_v47 = vpop.f32.mrb[157].mxu0 }
 0x4b4   : > { %v4018_v38 = vadd.f32 %v8440_v25, %v4017_v47 }
 0x4b5   : > { %v4065_v7 = vadd.f32 %v5503_v63, %v4023_v37 }
 0x4b6   : > { %v4064_v49 = vadd.f32 %v5504_v18, %v4018_v38 }
 0x4b7   : > { %v4097_v3 = vmax.f32 %v4065_v7, 0.0 }
 0x4b8   : > { %v4096_v61 = vmax.f32 %v4064_v49, 0.0 }
 0x4b9   : > { %4129 = vst [vmem:[%s8448_s12 + $0xe8] sm:$0xff] %v4097_v3 }
 0x4ba   : > { %4128 = vst [vmem:[%s8448_s12 + $0xe0] sm:$0xff] %v4096_v61  ;;  %v4880_v54 = vpop.f32.mrb[158].mxu0 }
 0x4bb   : > { %v4033_v9 = vadd.f32 %v4880_v54, %v8440_v25  ;;  %v4027_v42 = vpop.f32.mrb[159].mxu0 }
 0x4bc   : > { %v4028_v27 = vadd.f32 %v8440_v25, %v4027_v42 }
 0x4bd   : > { %v4067_v39 = vadd.f32 %v5505_v60, %v4033_v9 }
 0x4be   : > { %v4066_v51 = vadd.f32 %v5506_v19, %v4028_v27 }
 0x4bf   : > { %v4099_v30 = vmax.f32 %v4067_v39, 0.0 }
 0x4c0   : > { %v4098_v4 = vmax.f32 %v4066_v51, 0.0 }
 0x4c1   : > { %4131 = vst [vmem:[%s8448_s12 + $0xf8] sm:$0xff] %v4099_v30 }
 0x4c2   : > { %4130 = vst [vmem:[%s8448_s12 + $0xf0] sm:$0xff] %v4098_v4 }
 0x4c3   : > { %5634 = shalt.err (!%p5631_p4)
}
 0x4c4   : > { %s5635_s13 = scalar_lea.hbm %s8545_s23, 4096  ;;  %s5639_s14 = scalar_lea.hbm %s8600_s7, 8192 }
 0x4c5   : > { %p5636_p9 = scmp.ne.s32.totalorder %s8545_s23, %s5635_s13  ;;  %p5640_p8 = scmp.lt.u32.totalorder %s8545_s23, %s8600_s7 }
 0x4c6   : > { %p5641_p13 = scmp.lt.u32.totalorder %s5639_s14, %s5635_s13  ;;  %p5643_p10 = scmp.lt.u32.totalorder %s5635_s13, %s8545_s23 }
 0x4c7   : > { %p5637_p0 = pnand %p5636_p9, %p5901_p5 }
 0x4c8   : > { %p5642_p6 = por %p5641_p13, %p5640_p8 }
 0x4c9   : > { %p5638_p11 = pneg %p5637_p0 }
 0x4ca   : > { %p5644_p3 = por %p5643_p10, %p5642_p6 }
 0x4cc   : > { %p5645_p7 = pnand %p5644_p3, %p5638_p11 }
 0x4ce   : > { %5648 = shalt.err (!%p5645_p7)
}
 0x4cf   : > { %s5705_s16 = smov 128   ;;  %s5706_s29 = smov 8  }
 0x4d0   : > { %5407 = dma.vmem_to_hbm [thread:$0]  (%p5901_p5), %s8547_s21, 4096, %s8545_s23, %s4133_s28, %s5705_s16, %s5705_s16, %s5706_s29  }
 0x4d1 PF: > { %s9829_s11 = sld [smem:[#allocation16_spill]]  ;;  %s4161_s8 = sand.u32 1, %s5683_s24  }
 0x4d2   : > { %p9831_p1 = scmp.ge.s32.totalorder %s5695_s27, 2  ;;  %s4162_s30 = scalar_lea.sflag [#allocation5], %s4161_s8 }
 0x4d7   : > { %p9830_p12 = scmp.ne.s32.totalorder %s9829_s11, 0 }
 0x4d9   : > { %p5424_p2 = pnand %p9831_p1, %p9830_p12 }
 0x4db   : > { %5678 = dma.done.wait (!%p5424_p2), %s4162_s30, 4096  }
 0x4dc   : > { %5680 = vsyncadd (!%p5424_p2), %s4162_s30, 4294963200  ;;  %p22_p4 = scmp.ge.s32.totalorder %s5887_s22, 4   ;;  %s9832_s24 = smov %s5687_s25 }
 0x4dd   : > { %s9833_s25 = smov %s5691_s26  ;;  %s9834_s26 = smov %s5897_s18 }
 0x4de   : > { %s9835_s27 = smov %s5887_s22  ;;  %24 = sbr.rel (!%p22_p4) target bundleno = 7 (0x7), region = 105 }
 0x4e5   :  { %4167 = vsyncpa [#allocation4], 1 }
 0x4e6   :  { %4169 = vsyncpa [#allocation4 + $0x1], 1 }
 0x4e7   :  { %4170 = vsyncpa [#allocation7], 1 }
 0x4e8   :  { %4171 = vsyncpa [#allocation10], 1 }
 0x4e9   :  { %4172 = vsyncpa [#allocation5], 1 }
 0x4ea   :  { %4174 = vsyncpa [#allocation5 + $0x1], 1 }

</bundles_post_ra>
